<compile_context>
chip_gen: v6e
topology: v6e:2x2x1
jax: 0.10.0
libtpu: 0.0.40
codegen_flags: <defaults>
</compile_context>

<pallas_src>
import functools

import jax
import jax.numpy as jnp
from jax.experimental import pallas as pl
from jax.experimental.pallas import tpu as pltpu


def _resblock_kernel(x_ref, w1_ref, b1_ref, w2_ref, b2_ref, o_ref,
                     xpad_ref, ypad_ref, *, res_scale):
    """One image per grid step: conv3x3 + b -> ReLU -> conv3x3 + b -> *s + x."""
    _, H, W, C = x_ref.shape
    HW = H * W

    # ---- re-zero only the 1-pixel halo rings of the persistent scratches ----
    # O(perimeter) per step, done every step (megacore-safe: no reliance on a
    # program_id==0 init that the second TensorCore would never execute).
    zrow = jnp.zeros((1, W + 2, C), jnp.bfloat16)
    zcol = jnp.zeros((H + 2, 1, C), jnp.bfloat16)
    for pad_ref in (xpad_ref, ypad_ref):
        pad_ref[0:1, :, :] = zrow
        pad_ref[H + 1:H + 2, :, :] = zrow
        pad_ref[:, 0:1, :] = zcol
        pad_ref[:, W + 1:W + 2, :] = zcol

    x_bf = x_ref[0]                                    # (H, W, C) bf16
    xpad_ref[1:H + 1, 1:W + 1, :] = x_bf               # pad lives in VMEM only

    def im2col9(padded):
        # (H+2, W+2, C) -> (H*W, 9*C): one lane-axis concat + one
        # minor-preserving reshape per conv (no per-tap reshapes).
        taps = [padded[kh:kh + H, kw:kw + W, :]
                for kh in range(3) for kw in range(3)]
        return jnp.concatenate(taps, axis=-1).reshape(HW, 9 * C)

    # ---- conv1: single K=9C MXU dot + bias + ReLU (f32 accumulate) ---------
    a1 = jnp.dot(im2col9(xpad_ref[...]), w1_ref[...],
                 preferred_element_type=jnp.float32)   # (HW, C) f32
    y = jnp.maximum(a1 + b1_ref[...], 0.0)

    # bf16 intermediate written straight into the padded scratch interior.
    ypad_ref[1:H + 1, 1:W + 1, :] = y.astype(jnp.bfloat16).reshape(H, W, C)

    # ---- conv2: single K=9C MXU dot + bias ----------------------------------
    body = jnp.dot(im2col9(ypad_ref[...]), w2_ref[...],
                   preferred_element_type=jnp.float32) + b2_ref[...]

    # ---- residual epilogue in f32: out = body * res_scale + x ---------------
    res = body * res_scale + x_bf.astype(jnp.float32).reshape(HW, C)

    # Lane-dense, NCHW-ready store: (C, H*W) with H*W in the lane dimension.
    o_ref[0] = jnp.transpose(res, (1, 0)).astype(o_ref.dtype)


def _prep_w(w):
    """(C_out, C_in, 3, 3) PyTorch layout -> (9*C_in, C_out) bf16 for one dot."""
    c_out, c_in, kh, kw = w.shape
    return (jnp.transpose(w, (2, 3, 1, 0))          # (kh, kw, C_in, C_out)
            .reshape(kh * kw * c_in, c_out)
            .astype(jnp.bfloat16))


def resblock_forward(x_nchw, w1, b1, w2, b2, *, res_scale=1.0):
    """ResBlock forward. x_nchw: (N,C,H,W); w*: (C,C,3,3); b*: (C,)."""
    N, C, H, W = x_nchw.shape

    # Single boundary pass: NCHW -> NHWC fused with the bf16 cast (halves the
    # kernel's input DMA bytes).  No HBM pad; no output-side transpose needed.
    x_nhwc = jnp.transpose(x_nchw, (0, 2, 3, 1)).astype(jnp.bfloat16)

    w1p, w2p = _prep_w(w1), _prep_w(w2)
    b1p = b1.astype(jnp.float32).reshape(1, C)         # epilogue stays f32
    b2p = b2.astype(jnp.float32).reshape(1, C)

    kernel = functools.partial(_resblock_kernel, res_scale=float(res_scale))

    out_flat = pl.pallas_call(
        kernel,
        out_shape=jax.ShapeDtypeStruct((N, C, H * W), x_nchw.dtype),
        grid_spec=pltpu.PrefetchScalarGridSpec(
            num_scalar_prefetch=0,
            grid=(N,),
            in_specs=[
                # unpadded bf16 image, one per grid step
                pl.BlockSpec((1, H, W, C), lambda n: (n, 0, 0, 0)),
                # weights / biases: constant index_map -> VMEM-resident
                pl.BlockSpec((9 * C, C), lambda n: (0, 0)),
                pl.BlockSpec((1, C), lambda n: (0, 0)),
                pl.BlockSpec((9 * C, C), lambda n: (0, 0)),
                pl.BlockSpec((1, C), lambda n: (0, 0)),
            ],
            # lane-dense NCHW-ready output slab (last dim H*W, multiple of 128)
            out_specs=pl.BlockSpec((1, C, H * W), lambda n: (n, 0, 0)),
            scratch_shapes=[
                pltpu.VMEM((H + 2, W + 2, C), jnp.bfloat16),   # padded x
                pltpu.VMEM((H + 2, W + 2, C), jnp.bfloat16),   # padded ReLU out
            ],
        ),
        compiler_params=pltpu.CompilerParams(
            dimension_semantics=("parallel",),       # batch shards across TCs
            vmem_limit_bytes=32 * 1024 * 1024,       # safe on v5e/v6e/v7x
        ),
    )(x_nhwc, w1p, b1p, w2p, b2p)

    return out_flat.reshape(N, C, H, W)              # free reshape, no transpose


if __name__ == "__main__":
    key = jax.random.PRNGKey(0)
    kx, kw1, kb1, kw2, kb2 = jax.random.split(key, 5)

    N, C, H, W = 2, 4, 16, 16
    RES_SCALE = 0.5

    x = jax.random.normal(kx, (N, C, H, W), dtype=jnp.float32)
    fan_in = C * 3 * 3
    bound = 1.0 / (fan_in ** 0.5)                    # PyTorch-style uniform init
    w1 = jax.random.uniform(kw1, (C, C, 3, 3), jnp.float32, -bound, bound)
    b1 = jax.random.uniform(kb1, (C,), jnp.float32, -bound, bound)
    w2 = jax.random.uniform(kw2, (C, C, 3, 3), jnp.float32, -bound, bound)
    b2 = jax.random.uniform(kb2, (C,), jnp.float32, -bound, bound)

    out = resblock_forward(x, w1, b1, w2, b2, res_scale=RES_SCALE)
    out = jax.block_until_ready(out)

    # Reference: f32 XLA convs matching nn.Conv2d(C, C, 3, 1, 1) semantics.
    def conv(inp, w, b):
        o = jax.lax.conv_general_dilated(
            inp, w, window_strides=(1, 1), padding=((1, 1), (1, 1)),
            dimension_numbers=("NCHW", "OIHW", "NCHW"))
        return o + b.reshape(1, -1, 1, 1)

    ref = conv(x, w1, b1)
    ref = jnp.maximum(ref, 0.0)
    ref = conv(ref, w2, b2)
    ref = ref * RES_SCALE + x

    assert out.shape == (N, C, H, W)
    # bf16 MXU operands + bf16 residual source (deliberate, halves input DMA)
    # with f32 accumulation/epilogue -> tolerance loosened vs f32 reference.
    max_err = float(jnp.max(jnp.abs(out - ref)))
    assert jnp.allclose(out, ref, atol=3e-2, rtol=3e-2), max_err

    print("KERNEL_OK")
</pallas_src>

<mosaic_0001>
module attributes {stable_mosaic.version = 11 : i64} {
  func.func @_resblock_kernel(%arg0: i32, %arg1: memref<1x16x16x4xbf16, #tpu.memory_space<vmem>>, %arg2: memref<36x4xbf16, #tpu.memory_space<vmem>>, %arg3: memref<1x4xf32, #tpu.memory_space<vmem>>, %arg4: memref<36x4xbf16, #tpu.memory_space<vmem>>, %arg5: memref<1x4xf32, #tpu.memory_space<vmem>>, %arg6: memref<1x4x256xf32, #tpu.memory_space<vmem>>, %arg7: memref<18x18x4xbf16, #tpu.memory_space<vmem>>, %arg8: memref<18x18x4xbf16, #tpu.memory_space<vmem>>) attributes {dimension_semantics = [#tpu.dimension_semantics<parallel>], iteration_bounds = array<i64: 2>, scalar_prefetch = 0 : i64, scratch_operands = 2 : i64, tpu.core_type = #tpu.core_type<tc>, window_params = [{transform_indices = @transform_0, window_bounds = array<i64: 1, 16, 16, 4>}, {pipeline_mode = #tpu.pipeline_mode<synchronous>, transform_indices = @transform_1, window_bounds = array<i64: 36, 4>}, {pipeline_mode = #tpu.pipeline_mode<synchronous>, transform_indices = @transform_2, window_bounds = array<i64: 1, 4>}, {pipeline_mode = #tpu.pipeline_mode<synchronous>, transform_indices = @transform_3, window_bounds = array<i64: 36, 4>}, {pipeline_mode = #tpu.pipeline_mode<synchronous>, transform_indices = @transform_4, window_bounds = array<i64: 1, 4>}, {transform_indices = @transform_5, window_bounds = array<i64: 1, 4, 256>}]} {
    %cst = arith.constant 0.000000e+00 : bf16
    %0 = vector.broadcast %cst : bf16 to vector<1x18x4xbf16>
    %cst_0 = arith.constant 0.000000e+00 : bf16
    %1 = vector.broadcast %cst_0 : bf16 to vector<18x1x4xbf16>
    %c0 = arith.constant 0 : index
    %c0_1 = arith.constant 0 : index
    %c0_2 = arith.constant 0 : index
    %2 = vector.load %arg7[%c0, %c0_1, %c0_2] : memref<18x18x4xbf16, #tpu.memory_space<vmem>>, vector<1x18x4xbf16>
    tpu.vector_store %arg7[%c0, %c0_1, %c0_2], %0 {strides = array<i32>} : memref<18x18x4xbf16, #tpu.memory_space<vmem>>, vector<1x18x4xbf16>,
    %c17 = arith.constant 17 : index
    %c0_3 = arith.constant 0 : index
    %c0_4 = arith.constant 0 : index
    %3 = vector.load %arg7[%c17, %c0_3, %c0_4] : memref<18x18x4xbf16, #tpu.memory_space<vmem>>, vector<1x18x4xbf16>
    tpu.vector_store %arg7[%c17, %c0_3, %c0_4], %0 {strides = array<i32>} : memref<18x18x4xbf16, #tpu.memory_space<vmem>>, vector<1x18x4xbf16>,
    %c0_5 = arith.constant 0 : index
    %c0_6 = arith.constant 0 : index
    %c0_7 = arith.constant 0 : index
    %4 = vector.load %arg7[%c0_5, %c0_6, %c0_7] : memref<18x18x4xbf16, #tpu.memory_space<vmem>>, vector<18x1x4xbf16>
    tpu.vector_store %arg7[%c0_5, %c0_6, %c0_7], %1 {strides = array<i32>} : memref<18x18x4xbf16, #tpu.memory_space<vmem>>, vector<18x1x4xbf16>,
    %c0_8 = arith.constant 0 : index
    %c17_9 = arith.constant 17 : index
    %c0_10 = arith.constant 0 : index
    %5 = vector.load %arg7[%c0_8, %c17_9, %c0_10] : memref<18x18x4xbf16, #tpu.memory_space<vmem>>, vector<18x1x4xbf16>
    tpu.vector_store %arg7[%c0_8, %c17_9, %c0_10], %1 {strides = array<i32>} : memref<18x18x4xbf16, #tpu.memory_space<vmem>>, vector<18x1x4xbf16>,
    %c0_11 = arith.constant 0 : index
    %c0_12 = arith.constant 0 : index
    %c0_13 = arith.constant 0 : index
    %6 = vector.load %arg8[%c0_11, %c0_12, %c0_13] : memref<18x18x4xbf16, #tpu.memory_space<vmem>>, vector<1x18x4xbf16>
    tpu.vector_store %arg8[%c0_11, %c0_12, %c0_13], %0 {strides = array<i32>} : memref<18x18x4xbf16, #tpu.memory_space<vmem>>, vector<1x18x4xbf16>,
    %c17_14 = arith.constant 17 : index
    %c0_15 = arith.constant 0 : index
    %c0_16 = arith.constant 0 : index
    %7 = vector.load %arg8[%c17_14, %c0_15, %c0_16] : memref<18x18x4xbf16, #tpu.memory_space<vmem>>, vector<1x18x4xbf16>
    tpu.vector_store %arg8[%c17_14, %c0_15, %c0_16], %0 {strides = array<i32>} : memref<18x18x4xbf16, #tpu.memory_space<vmem>>, vector<1x18x4xbf16>,
    %c0_17 = arith.constant 0 : index
    %c0_18 = arith.constant 0 : index
    %c0_19 = arith.constant 0 : index
    %8 = vector.load %arg8[%c0_17, %c0_18, %c0_19] : memref<18x18x4xbf16, #tpu.memory_space<vmem>>, vector<18x1x4xbf16>
    tpu.vector_store %arg8[%c0_17, %c0_18, %c0_19], %1 {strides = array<i32>} : memref<18x18x4xbf16, #tpu.memory_space<vmem>>, vector<18x1x4xbf16>,
    %c0_20 = arith.constant 0 : index
    %c17_21 = arith.constant 17 : index
    %c0_22 = arith.constant 0 : index
    %9 = vector.load %arg8[%c0_20, %c17_21, %c0_22] : memref<18x18x4xbf16, #tpu.memory_space<vmem>>, vector<18x1x4xbf16>
    tpu.vector_store %arg8[%c0_20, %c17_21, %c0_22], %1 {strides = array<i32>} : memref<18x18x4xbf16, #tpu.memory_space<vmem>>, vector<18x1x4xbf16>,
    %c0_23 = arith.constant 0 : index
    %c0_24 = arith.constant 0 : index
    %c0_25 = arith.constant 0 : index
    %c0_26 = arith.constant 0 : index
    %10 = vector.load %arg1[%c0_23, %c0_24, %c0_25, %c0_26] : memref<1x16x16x4xbf16, #tpu.memory_space<vmem>>, vector<1x16x16x4xbf16>
    %11 = vector.shape_cast %10 : vector<1x16x16x4xbf16> to vector<16x16x4xbf16>
    %c1 = arith.constant 1 : index
    %c1_27 = arith.constant 1 : index
    %c0_28 = arith.constant 0 : index
    %12 = vector.load %arg7[%c1, %c1_27, %c0_28] : memref<18x18x4xbf16, #tpu.memory_space<vmem>>, vector<16x16x4xbf16>
    tpu.vector_store %arg7[%c1, %c1_27, %c0_28], %11 {strides = array<i32>} : memref<18x18x4xbf16, #tpu.memory_space<vmem>>, vector<16x16x4xbf16>,
    %c0_29 = arith.constant 0 : index
    %c0_30 = arith.constant 0 : index
    %c0_31 = arith.constant 0 : index
    %13 = vector.load %arg7[%c0_29, %c0_30, %c0_31] : memref<18x18x4xbf16, #tpu.memory_space<vmem>>, vector<18x18x4xbf16>
    %14 = vector.extract_strided_slice %13 {offsets = [0, 0, 0], sizes = [16, 16, 4], strides = [1, 1, 1]} : vector<18x18x4xbf16> to vector<16x16x4xbf16>
    %15 = vector.extract_strided_slice %13 {offsets = [0, 1, 0], sizes = [16, 16, 4], strides = [1, 1, 1]} : vector<18x18x4xbf16> to vector<16x16x4xbf16>
    %16 = vector.extract_strided_slice %13 {offsets = [0, 2, 0], sizes = [16, 16, 4], strides = [1, 1, 1]} : vector<18x18x4xbf16> to vector<16x16x4xbf16>
    %17 = vector.extract_strided_slice %13 {offsets = [1, 0, 0], sizes = [16, 16, 4], strides = [1, 1, 1]} : vector<18x18x4xbf16> to vector<16x16x4xbf16>
    %18 = vector.extract_strided_slice %13 {offsets = [1, 1, 0], sizes = [16, 16, 4], strides = [1, 1, 1]} : vector<18x18x4xbf16> to vector<16x16x4xbf16>
    %19 = vector.extract_strided_slice %13 {offsets = [1, 2, 0], sizes = [16, 16, 4], strides = [1, 1, 1]} : vector<18x18x4xbf16> to vector<16x16x4xbf16>
    %20 = vector.extract_strided_slice %13 {offsets = [2, 0, 0], sizes = [16, 16, 4], strides = [1, 1, 1]} : vector<18x18x4xbf16> to vector<16x16x4xbf16>
    %21 = vector.extract_strided_slice %13 {offsets = [2, 1, 0], sizes = [16, 16, 4], strides = [1, 1, 1]} : vector<18x18x4xbf16> to vector<16x16x4xbf16>
    %22 = vector.extract_strided_slice %13 {offsets = [2, 2, 0], sizes = [16, 16, 4], strides = [1, 1, 1]} : vector<18x18x4xbf16> to vector<16x16x4xbf16>
    %23 = tpu.concatenate %14, %15, %16, %17, %18, %19, %20, %21, %22 in 2 : vector<16x16x4xbf16>, vector<16x16x4xbf16>, vector<16x16x4xbf16>, vector<16x16x4xbf16>, vector<16x16x4xbf16>, vector<16x16x4xbf16>, vector<16x16x4xbf16>, vector<16x16x4xbf16>, vector<16x16x4xbf16> -> vector<16x16x36xbf16>
    %24 = vector.shape_cast %23 : vector<16x16x36xbf16> to vector<256x36xbf16>
    %c0_32 = arith.constant 0 : index
    %c0_33 = arith.constant 0 : index
    %25 = vector.load %arg2[%c0_32, %c0_33] : memref<36x4xbf16, #tpu.memory_space<vmem>>, vector<36x4xbf16>
    %cst_34 = arith.constant dense<0.000000e+00> : vector<256x4xf32>
    %26 = tpu.matmul %24, %25, %cst_34 {dimension_numbers = #tpu.dot_dimension_numbers<[1], [0], [0], [1], [0, 0, 1, 1], [], []>} : vector<256x36xbf16>, vector<36x4xbf16>, vector<256x4xf32> -> vector<256x4xf32>
    %c0_35 = arith.constant 0 : index
    %c0_36 = arith.constant 0 : index
    %27 = vector.load %arg3[%c0_35, %c0_36] : memref<1x4xf32, #tpu.memory_space<vmem>>, vector<1x4xf32>
    %28 = vector.broadcast %27 : vector<1x4xf32> to vector<256x4xf32>
    %29 = arith.addf %26, %28 : vector<256x4xf32>
    %cst_37 = arith.constant 0.000000e+00 : f32
    %30 = vector.broadcast %cst_37 : f32 to vector<256x4xf32>
    %31 = arith.maximumf %29, %30 : vector<256x4xf32>
    %32 = arith.truncf %31 : vector<256x4xf32> to vector<256x4xbf16>
    %33 = vector.shape_cast %32 : vector<256x4xbf16> to vector<16x16x4xbf16>
    %c1_38 = arith.constant 1 : index
    %c1_39 = arith.constant 1 : index
    %c0_40 = arith.constant 0 : index
    %34 = vector.load %arg8[%c1_38, %c1_39, %c0_40] : memref<18x18x4xbf16, #tpu.memory_space<vmem>>, vector<16x16x4xbf16>
    tpu.vector_store %arg8[%c1_38, %c1_39, %c0_40], %33 {strides = array<i32>} : memref<18x18x4xbf16, #tpu.memory_space<vmem>>, vector<16x16x4xbf16>,
    %c0_41 = arith.constant 0 : index
    %c0_42 = arith.constant 0 : index
    %c0_43 = arith.constant 0 : index
    %35 = vector.load %arg8[%c0_41, %c0_42, %c0_43] : memref<18x18x4xbf16, #tpu.memory_space<vmem>>, vector<18x18x4xbf16>
    %36 = vector.extract_strided_slice %35 {offsets = [0, 0, 0], sizes = [16, 16, 4], strides = [1, 1, 1]} : vector<18x18x4xbf16> to vector<16x16x4xbf16>
    %37 = vector.extract_strided_slice %35 {offsets = [0, 1, 0], sizes = [16, 16, 4], strides = [1, 1, 1]} : vector<18x18x4xbf16> to vector<16x16x4xbf16>
    %38 = vector.extract_strided_slice %35 {offsets = [0, 2, 0], sizes = [16, 16, 4], strides = [1, 1, 1]} : vector<18x18x4xbf16> to vector<16x16x4xbf16>
    %39 = vector.extract_strided_slice %35 {offsets = [1, 0, 0], sizes = [16, 16, 4], strides = [1, 1, 1]} : vector<18x18x4xbf16> to vector<16x16x4xbf16>
    %40 = vector.extract_strided_slice %35 {offsets = [1, 1, 0], sizes = [16, 16, 4], strides = [1, 1, 1]} : vector<18x18x4xbf16> to vector<16x16x4xbf16>
    %41 = vector.extract_strided_slice %35 {offsets = [1, 2, 0], sizes = [16, 16, 4], strides = [1, 1, 1]} : vector<18x18x4xbf16> to vector<16x16x4xbf16>
    %42 = vector.extract_strided_slice %35 {offsets = [2, 0, 0], sizes = [16, 16, 4], strides = [1, 1, 1]} : vector<18x18x4xbf16> to vector<16x16x4xbf16>
    %43 = vector.extract_strided_slice %35 {offsets = [2, 1, 0], sizes = [16, 16, 4], strides = [1, 1, 1]} : vector<18x18x4xbf16> to vector<16x16x4xbf16>
    %44 = vector.extract_strided_slice %35 {offsets = [2, 2, 0], sizes = [16, 16, 4], strides = [1, 1, 1]} : vector<18x18x4xbf16> to vector<16x16x4xbf16>
    %45 = tpu.concatenate %36, %37, %38, %39, %40, %41, %42, %43, %44 in 2 : vector<16x16x4xbf16>, vector<16x16x4xbf16>, vector<16x16x4xbf16>, vector<16x16x4xbf16>, vector<16x16x4xbf16>, vector<16x16x4xbf16>, vector<16x16x4xbf16>, vector<16x16x4xbf16>, vector<16x16x4xbf16> -> vector<16x16x36xbf16>
    %46 = vector.shape_cast %45 : vector<16x16x36xbf16> to vector<256x36xbf16>
    %c0_44 = arith.constant 0 : index
    %c0_45 = arith.constant 0 : index
    %47 = vector.load %arg4[%c0_44, %c0_45] : memref<36x4xbf16, #tpu.memory_space<vmem>>, vector<36x4xbf16>
    %cst_46 = arith.constant dense<0.000000e+00> : vector<256x4xf32>
    %48 = tpu.matmul %46, %47, %cst_46 {dimension_numbers = #tpu.dot_dimension_numbers<[1], [0], [0], [1], [0, 0, 1, 1], [], []>} : vector<256x36xbf16>, vector<36x4xbf16>, vector<256x4xf32> -> vector<256x4xf32>
    %c0_47 = arith.constant 0 : index
    %c0_48 = arith.constant 0 : index
    %49 = vector.load %arg5[%c0_47, %c0_48] : memref<1x4xf32, #tpu.memory_space<vmem>>, vector<1x4xf32>
    %50 = vector.broadcast %49 : vector<1x4xf32> to vector<256x4xf32>
    %51 = arith.addf %48, %50 : vector<256x4xf32>
    %cst_49 = arith.constant 5.000000e-01 : f32
    %52 = vector.broadcast %cst_49 : f32 to vector<256x4xf32>
    %53 = arith.mulf %51, %52 : vector<256x4xf32>
    %54 = arith.extf %11 : vector<16x16x4xbf16> to vector<16x16x4xf32>
    %55 = vector.shape_cast %54 : vector<16x16x4xf32> to vector<256x4xf32>
    %56 = arith.addf %53, %55 : vector<256x4xf32>
    %57 = tpu.transpose %56, [1, 0] : vector<256x4xf32> -> vector<4x256xf32>
    %c0_50 = arith.constant 0 : index
    %c0_51 = arith.constant 0 : index
    %c0_52 = arith.constant 0 : index
    %58 = vector.load %arg6[%c0_50, %c0_51, %c0_52] : memref<1x4x256xf32, #tpu.memory_space<vmem>>, vector<1x4x256xf32>
    %59 = vector.shape_cast %58 : vector<1x4x256xf32> to vector<4x256xf32>
    %60 = vector.shape_cast %57 : vector<4x256xf32> to vector<1x4x256xf32>
    tpu.vector_store %arg6[%c0_50, %c0_51, %c0_52], %60 {strides = array<i32>} : memref<1x4x256xf32, #tpu.memory_space<vmem>>, vector<1x4x256xf32>,
    return
  }
  func.func @transform_0(%arg0: i32) -> (i32, i32, i32, i32) {
    %c0_i32 = arith.constant 0 : i32
    %c0_i32_0 = arith.constant 0 : i32
    %c0_i32_1 = arith.constant 0 : i32
    %c0_i32_2 = arith.constant 0 : i32
    return %arg0, %c0_i32, %c0_i32_0, %c0_i32_1 : i32, i32, i32, i32
  }
  func.func @transform_1(%arg0: i32) -> (i32, i32) {
    %c0_i32 = arith.constant 0 : i32
    %c0_i32_0 = arith.constant 0 : i32
    %c0_i32_1 = arith.constant 0 : i32
    return %c0_i32, %c0_i32_0 : i32, i32
  }
  func.func @transform_2(%arg0: i32) -> (i32, i32) {
    %c0_i32 = arith.constant 0 : i32
    %c0_i32_0 = arith.constant 0 : i32
    %c0_i32_1 = arith.constant 0 : i32
    return %c0_i32, %c0_i32_0 : i32, i32
  }
  func.func @transform_3(%arg0: i32) -> (i32, i32) {
    %c0_i32 = arith.constant 0 : i32
    %c0_i32_0 = arith.constant 0 : i32
    %c0_i32_1 = arith.constant 0 : i32
    return %c0_i32, %c0_i32_0 : i32, i32
  }
  func.func @transform_4(%arg0: i32) -> (i32, i32) {
    %c0_i32 = arith.constant 0 : i32
    %c0_i32_0 = arith.constant 0 : i32
    %c0_i32_1 = arith.constant 0 : i32
    return %c0_i32, %c0_i32_0 : i32, i32
  }
  func.func @transform_5(%arg0: i32) -> (i32, i32, i32) {
    %c0_i32 = arith.constant 0 : i32
    %c0_i32_0 = arith.constant 0 : i32
    %c0_i32_1 = arith.constant 0 : i32
    return %arg0, %c0_i32, %c0_i32_0 : i32, i32, i32
  }
}

</mosaic_0001>

<bundles_post_ra>
// kernel: tpu_custom_call.1
= control target key start
LH: loop header
LB: loop body
LE: loop exit
PB: predicated region body
PF: predicated region fallthrough
CT: control target
= control target key end

     0   :  { %10 = vsyncpa [#allocation5], 0  ;;  %s6562_s0 = inlined_call_operand.vmem [shape: bf16[2,16,16,4], index: 0, kind: input, shape index: {}]   ;;  %s6563_s1 = inlined_call_operand.vmem [shape: bf16[36,4], index: 1, kind: input, shape index: {}]   ;;  %s6564_s2 = inlined_call_operand.vmem [shape: f32[1,4], index: 2, kind: input, shape index: {}]   ;;  %s6565_s3 = inlined_call_operand.vmem [shape: bf16[36,4], index: 3, kind: input, shape index: {}]   ;;  %s6566_s4 = inlined_call_operand.vmem [shape: f32[1,4], index: 4, kind: input, shape index: {}]   ;;  %s6567_s5 = inlined_call_operand.hbm [shape: f32[2,4,256], index: 5, kind: output, shape index: {}]  }
   0x1   :  { %12 = vsyncpa [#allocation5 + $0x1], 0  ;;  %s4732_s18 = smov 0   ;;  %s4734_s19 = smov 0  }
   0x2   :  { %s4736_s20 = smov 0   ;;  %s4738_s21 = smov 0  }
   0x3 LB: > { %s4753_s22 = sadd.s32 4294967295, %s4690_s21   ;;  %s4148_s23 = sadd.s32 4294967294, %s4690_s21   ;;  %s4690_s21 = sphi %s4738_s21, %s6618_s21   ;;  %s4686_s20 = sphi %s4736_s20, %s6617_s20   ;;  %s4682_s19 = sphi %s4734_s19, %s6616_s19   ;;  %s4678_s18 = sphi %s4732_s18, %s6615_s18  }
   0x4   : > { %s4757_s24 = sadd.s32 1, %s4690_s21   ;;  %s135_s25 = sadd.s32 1, %s4686_s20 }
   0x5   : > { %s132_s26 = ssub.s32 %s4690_s21, %s4757_s24  ;;  %p145_p0 = scmp.ne.s32.totalorder %s4686_s20, %s4682_s19 }
   0x6   : > { %p133_p1 = scmp.eq.s32.totalorder %s132_s26, 0  ;;  %p146_p2 = scmp.eq.s32.totalorder %s4753_s22, 1 }
   0x7   : > { %p151_p3 = scmp.ne.s32.totalorder %s4682_s19, %s4678_s18  ;;  %p152_p4 = scmp.eq.s32.totalorder %s4148_s23, 1 }
   0x8   : > { %s4768_s27 = scalar_select %p133_p1, %s4686_s20, %s135_s25  }
   0x9   : > { %p4770_p5 = por %p146_p2, %p145_p0  ;;  %p4774_p6 = por %p152_p4, %p151_p3 }
   0xa   : > { %p4151_p7 = scmp.ge.s32.totalorder %s4690_s21, 1  ;;  %p190_p8 = scmp.lt.s32.totalorder %s4690_s21, 3 }
   0xc   : > { %p191_p9 = pnand %p4151_p7, %p190_p8 }
   0xd   : > { %p218_p10 = scmp.lt.s32.totalorder (!%p191_p9), %s4753_s22, 1  ;;  %s4693_s10 = smov (!%p191_p9), 8  }
   0xe   : > { %194 = sbr.rel (%p191_p9) target bundleno = 1092 (0x444), region = 40  ;;  %s4694_s11 = smov (!%p191_p9), 12  }
   0xf   : > { %s4695_s12 = smov (!%p191_p9), 24   ;;  %s4696_s13 = smov (!%p191_p9), 4  }
  0x10   : > { %s4697_s14 = smov (!%p191_p9), 20   ;;  %s4698_s15 = smov (!%p191_p9), 32  }
  0x11   : > { %s4699_s16 = smov (!%p191_p9), 16   ;;  %s4700_s17 = smov (!%p191_p9), 28  }
  0x12   : > { %s4701_s7 = smov (!%p191_p9), [#allocation4]  }
  0x13   : > { %vm224_vm0 = vcmask 27648   ;;  %vm227_vm1 = vcmask 24576   ;;  %vm234_vm2 = vsmask.f32 256  ;;  %v4692_v0 = vmov 0   ;;  %s219_s30 = scalar_select %p218_p10, %s4753_s22, 1 }
  0x14   : > { %225 = vst.msk [vmem:[#allocation2] sm:$0xf] %vm224_vm0, %v4692_v0  ;;  %226 = vst.msk [vmem:[#allocation2 + $0x4] sm:$0xf] %vm224_vm0, %v4692_v0  ;;  %vm290_vm4 = vsmask.f32 7938 }
  0x15   : > { %228 = vst.msk [vmem:[#allocation2 + $0x8] sm:$0x1] %vm227_vm1, %v4692_v0  ;;  %vm4785_vm3 = vmand %vm227_vm1, %vm234_vm2  ;;  %v239_v2 = vld [vmem:[#allocation2 + $0xc] sm:$0x1]  ;;  %v242_v4 = vld [vmem:[#allocation2 + $0x18] sm:$0x1] }
  0x16   : > { %230 = vst.msk [vmem:[#allocation2 + $0xcc] sm:$0xf] %vm224_vm0, %v4692_v0  ;;  %231 = vst.msk [vmem:[#allocation2 + $0xd0] sm:$0xf] %vm224_vm0, %v4692_v0  ;;  %v240_v3 = vsel %vm4785_vm3, 0, %v239_v2  ;;  %v243_v5 = vsel %vm4785_vm3, 0, %v242_v4 }
  0x17   : > { %232 = vst.msk [vmem:[#allocation2 + $0xd4] sm:$0x1] %vm227_vm1, %v4692_v0  ;;  %348 = vst.msk [vmem:[#allocation3 + $0x8] sm:$0x1] %vm227_vm1, %v4692_v0  ;;  %v245_v6 = vld [vmem:[#allocation2 + $0x24] sm:$0x1] }
  0x18   : > { %346 = vst.msk [vmem:[#allocation3] sm:$0xf] %vm224_vm0, %v4692_v0  ;;  %347 = vst.msk [vmem:[#allocation3 + $0x4] sm:$0xf] %vm224_vm0, %v4692_v0  ;;  %v246_v8 = vsel %vm4785_vm3, 0, %v245_v6  ;;  %s4304_s6 = sshll.u32 %s219_s30, 7 }
  0x19   : > { %350 = vst.msk [vmem:[#allocation3 + $0xcc] sm:$0xf] %vm224_vm0, %v4692_v0  ;;  %351 = vst.msk [vmem:[#allocation3 + $0xd0] sm:$0xf] %vm224_vm0, %v4692_v0  ;;  %v295_v9 = vld [vmem:[#allocation2 + $0x14] sm:$0x1]  ;;  %s4817_s9 = scalar_lea.vmem %s6562_s0, %s4304_s6 }
  0x1a   : > { %352 = vst.msk [vmem:[#allocation3 + $0xd4] sm:$0x1] %vm227_vm1, %v4692_v0  ;;  %241 = vst [vmem:[#allocation2 + $0xc] sm:$0x1] %v240_v3  ;;  %v298_v11 = vld [vmem:[#allocation2 + $0x20] sm:$0x1] }
  0x1b   : > { %vm4806_vm5 = vmand %vm227_vm1, %vm290_vm4  ;;  %244 = vst [vmem:[#allocation2 + $0x18] sm:$0x1] %v243_v5  ;;  %vm493_vm6 = vsmask.f32 4368  ;;  %v461_v13 = vld [vmem:[%s4817_s9] sm:$0xf] }
  0x1c   : > { %247 = vst [vmem:[#allocation2 + $0x24] sm:$0x1] %v246_v8  ;;  %v296_v10 = vsel %vm4806_vm5, 0, %v295_v9  ;;  %v299_v12 = vsel %vm4806_vm5, 0, %v298_v11  ;;  %v462_v14 = vld [vmem:[%s4817_s9 + $0x4] sm:$0xf]  ;;  %vm4831_vm7 = vmand %vm224_vm0, %vm290_vm4 }
  0x1d   : > { %297 = vst [vmem:[#allocation2 + $0x14] sm:$0x1] %v296_v10  ;;  %v463_v15 = vld [vmem:[%s4817_s9 + $0x8] sm:$0xf]  ;;  %300 = vst [vmem:[#allocation2 + $0x20] sm:$0x1] %v299_v12 }
  0x1e   : > { %v236_v16 = vld [vmem:[#allocation2] sm:$0x1]  ;;  %v292_v17 = vld [vmem:[#allocation2 + $0x8] sm:$0x1]  ;;  %v496_v20 = vshrl.u32 %v461_v13, 16  ;;  %v499_v21 = vshll.u32 %v461_v13, 16  ;;  %vm4839_vm8 = vmor %vm234_vm2, %vm493_vm6 }
  0x1f   : > { %v237_v18 = vsel %vm4785_vm3, 0, %v236_v16  ;;  %v293_v19 = vsel %vm4806_vm5, 0, %v292_v17  ;;  %v464_v22 = vld [vmem:[%s4817_s9 + $0xc] sm:$0xf]  ;;  %v504_v23 = vshrl.u32 %v462_v14, 16  ;;  %v507_v24 = vshll.u32 %v462_v14, 16 }
  0x20   : > { %238 = vst [vmem:[#allocation2] sm:$0x1] %v237_v18  ;;  %294 = vst [vmem:[#allocation2 + $0x8] sm:$0x1] %v293_v19  ;;  %v513_v25 = vshrl.u32 %v463_v15, 16  ;;  %v516_v26 = vshll.u32 %v463_v15, 16 }
  0x21   : > { %v498_v27 = vrot.slane %v496_v20, 7  ;;  %v818_v28 = vld [vmem:[#allocation2 + $0xc] sm:$0xf]  ;;  %v521_v29 = vshrl.u32 %v464_v22, 16  ;;  %v524_v30 = vshll.u32 %v464_v22, 16  ;;  %v506_v31 = vrot.slane %v504_v23, 7 }
  0x22   : > { %v515_v33 = vrot.slane %v513_v25, 7  ;;  %v465_v34 = vld [vmem:[%s4817_s9 + $0x10] sm:$0xf]  ;;  %v466_v35 = vld [vmem:[%s4817_s9 + $0x14] sm:$0xf]  ;;  %vm1337_vm9 = vcmask 1046528  }
  0x23   : > { %v501_v37 = vor.u32 %v499_v21, %v498_v27  ;;  %v502_v38 = vrot.slane %v498_v27, 4  ;;  %v523_v39 = vrot.slane %v521_v29, 7  ;;  %v825_v40 = vld [vmem:[#allocation2 + $0x18] sm:$0xf]  ;;  %v530_v41 = vshrl.u32 %v465_v34, 16  ;;  %s4634_s8 = sshll.u32 %s4701_s7, 4  ;;  %s4635_s8 = int_to_ptr.vmem [resolvable:$false] %s4634_s8 }
  0x24   : > { %v509_v42 = vor.u32 %v507_v24, %v506_v31  ;;  %v518_v43 = vor.u32 %v516_v26, %v515_v33  ;;  %v519_v44 = vrot.slane %v515_v33, 4  ;;  %v533_v45 = vshll.u32 %v465_v34, 16  ;;  %v301_v46 = vld [vmem:[#allocation2 + $0x2c] sm:$0x1]  ;;  %v832_v51 = vld [vmem:[#allocation2 + $0x24] sm:$0xf] }
  0x25   : > { %v819_v47 = vsel %vm4831_vm7, %v501_v37, %v818_v28  ;;  %v526_v48 = vor.u32 %v524_v30, %v523_v39  ;;  %v532_v49 = vrot.slane %v530_v41, 7  ;;  %v538_v50 = vshrl.u32 %v466_v35, 16  ;;  %v822_v52 = vld [vmem:[#allocation2 + $0x14] sm:$0x1]  ;;  %v829_v57 = vld [vmem:[#allocation2 + $0x20] sm:$0x1] }
  0x26   : > { %v510_v53 = vsel %vm4839_vm8, %v502_v38, %v509_v42  ;;  %820 = vst [vmem:[#allocation2 + $0xc] sm:$0xf] %v819_v47  ;;  %v826_v54 = vsel %vm4831_vm7, %v518_v43, %v825_v40  ;;  %v541_v55 = vshll.u32 %v466_v35, 16  ;;  %v511_v56 = vrot.slane %v506_v31, 4  ;;  %v248_v58 = vld [vmem:[#allocation2 + $0x30] sm:$0x1] }
  0x27   : > { %v467_v59 = vld [vmem:[%s4817_s9 + $0x18] sm:$0xf]  ;;  %v4502_v60 = vld [vmem:[#allocation2] sm:$0xff]   ;;  %821 = vst.msk [vmem:[#allocation2 + $0x10] sm:$0xf] %vm224_vm0, %v510_v53  ;;  %v527_v61 = vsel %vm4839_vm8, %v519_v44, %v526_v48  ;;  %v535_v62 = vor.u32 %v533_v45, %v532_v49  ;;  %v536_v63 = vrot.slane %v532_v49, 4 }
  0x28   : > { %827 = vst [vmem:[#allocation2 + $0x18] sm:$0xf] %v826_v54  ;;  %v4503_v0 = vld [vmem:[#allocation2 + $0x8] ss:$0 sps:$4 sm:$0x11]   ;;  %v4854_v2 = vrot.slane %v538_v50, 7  ;;  %v823_v3 = vsel %vm4785_vm3, %v511_v56, %v822_v52 }
  0x29   : > { %828 = vst.msk [vmem:[#allocation2 + $0x1c] sm:$0xf] %vm224_vm0, %v527_v61  ;;  %v528_v4 = vrot.slane %v523_v39, 4  ;;  %v302_v5 = vsel %vm4806_vm5, 0, %v301_v46  ;;  %v1338_v6 = vrot.slane %v4502_v60, 1  ;;  %v833_v8 = vsel %vm4831_vm7, %v535_v62, %v832_v51 }
  0x2a   : > { %v1116_v9 = vshll.u32 %v4502_v60, 16  ;;  %824 = vst [vmem:[#allocation2 + $0x14] sm:$0x1] %v823_v3  ;;  %303 = vst [vmem:[#allocation2 + $0x2c] sm:$0x1] %v302_v5  ;;  %v1339_v10 = vrot.slane %v4503_v0, 1  ;;  %v543_v11 = vor.u32 %v541_v55, %v4854_v2 }
  0x2b   : > { %834 = vst [vmem:[#allocation2 + $0x24] sm:$0xf] %v833_v8  ;;  %vm1112_vm10 = vsmask.f32 7424  ;;  %v830_v12 = vsel %vm4785_vm3, %v528_v4, %v829_v57  ;;  %v468_v13 = vld [vmem:[%s4817_s9 + $0x1c] sm:$0xf] }
  0x2c   : > { %v1114_v14 = vshrl.u32 %v4502_v60, 16  ;;  %831 = vst [vmem:[#allocation2 + $0x20] sm:$0x1] %v830_v12  ;;  %v249_v15 = vsel %vm4785_vm3, 0, %v248_v58  ;;  %v547_v16 = vshrl.u32 %v467_v59, 16  ;;  %v1340_v18 = vsel %vm1337_vm9, %v1338_v6, %v1339_v10 }
  0x2d   : > { %v304_v17 = vld [vmem:[#allocation2 + $0x38] sm:$0x1]  ;;  %v544_v19 = vsel %vm4839_vm8, %v536_v63, %v543_v11  ;;  %v1118_v20 = vrot.slane %v1116_v9, 1  ;;  %v1121_v21 = vshll.u32 %v4503_v0, 16  ;;  %250 = vst [vmem:[#allocation2 + $0x30] sm:$0x1] %v249_v15  ;;  %1386 = vrot.lane.b32.xlu1 %v1340_v18, %s4693_s10 }
  0x2e   : > { %835 = vst.msk [vmem:[#allocation2 + $0x28] sm:$0xf] %vm224_vm0, %v544_v19  ;;  %v549_v22 = vrot.slane %v547_v16, 7  ;;  %v550_v23 = vshll.u32 %v467_v59, 16  ;;  %v555_v24 = vshrl.u32 %v468_v13, 16  ;;  %v558_v25 = vshll.u32 %v468_v13, 16 }
  0x2f   : > { %v4873_v26 = vld [vmem:[#allocation2 + $0xc] sm:$0xff]   ;;  %v305_v27 = vsel %vm4806_vm5, 0, %v304_v17  ;;  %v545_v29 = vrot.slane %v4854_v2, 4  ;;  %v1119_v31 = vor.u32 %v1118_v20, %v1114_v14  ;;  %v1123_v33 = vrot.slane %v1121_v21, 1  ;;  %v251_v49 = vld [vmem:[#allocation2 + $0x3c] sm:$0x1] }
  0x30   : > { %v4505_v28 = vld [vmem:[#allocation2 + $0x18] sm:$0xff]   ;;  %v557_v30 = vrot.slane %v555_v24, 7  ;;  %306 = vst [vmem:[#allocation2 + $0x38] sm:$0x1] %v305_v27  ;;  %1423 = vrot.lane.b32.xlu0 %v4873_v26, %s4694_s11  ;;  %v1341_v35 = vrot.slane %v4873_v26, 1  ;;  %v553_v39 = vrot.slane %v549_v22, 4  ;;  %v552_v42 = vor.u32 %v550_v23, %v549_v22 }
  0x31   : > { %v4507_v34 = vld [vmem:[#allocation2 + $0x14] ss:$0 sps:$4 sm:$0x11]   ;;  %1425 = vrot.lane.b32.xlu1 %v4505_v28, %s4694_s11  ;;  %v1138_v37 = vshrl.u32 %v4505_v28, 16  ;;  %v1140_v38 = vshll.u32 %v4505_v28, 16  ;;  %v1128_v45 = vshll.u32 %v4873_v26, 16  ;;  %v1124_v55 = vsel %vm1112_vm10, %v1119_v31, %v1123_v33 }
  0x32   : > { %v1342_v40 = vrot.slane %v4507_v34, 1  ;;  %v560_v43 = vor.u32 %v558_v25, %v557_v30  ;;  %v1133_v46 = vshll.u32 %v4507_v34, 16  ;;  %v836_v47 = vld [vmem:[#allocation2 + $0x2c] sm:$0x1]  ;;  %v562_v48 = vrot.slane %v557_v30, 4 }
  0x33   : > { %v4508_v41 = vld [vmem:[#allocation2 + $0x20] ss:$0 sps:$4 sm:$0x11]   ;;  %v1142_v44 = vrot.slane %v1140_v38, 1  ;;  %v1344_v51 = vrot.slane %v4505_v28, 1  ;;  %v837_v54 = vsel %vm4785_vm3, %v545_v29, %v836_v47  ;;  %v1126_v62 = vshrl.u32 %v4873_v26, 16 }
  0x34   : > { %1542 = vrot.lane.b32.xlu0 %v4505_v28, %s4695_s12  ;;  %v1345_v52 = vrot.slane %v4508_v41, 1  ;;  %v1145_v53 = vshll.u32 %v4508_v41, 16  ;;  %838 = vst [vmem:[#allocation2 + $0x2c] sm:$0x1] %v837_v54  ;;  %v561_v56 = vsel %vm4839_vm8, %v553_v39, %v560_v43  ;;  %v839_v57 = vld [vmem:[#allocation2 + $0x30] sm:$0xf]  ;;  %v1343_v60 = vsel %vm1337_vm9, %v1341_v35, %v1342_v40 }
  0x35   : > { %v4884_v50 = vld [vmem:[#allocation2 + $0x24] sm:$0xff]   ;;  %v469_v58 = vld [vmem:[%s4817_s9 + $0x20] sm:$0xf]  ;;  %v1143_v61 = vor.u32 %v1142_v44, %v1138_v37  ;;  %842 = vst.msk [vmem:[#allocation2 + $0x34] sm:$0xf] %vm224_vm0, %v561_v56  ;;  %v1130_v3 = vrot.slane %v1128_v45, 1  ;;  %v840_v5 = vsel %vm4831_vm7, %v552_v42, %v839_v57 }
  0x36   : > { %v470_v59 = vld [vmem:[%s4817_s9 + $0x24] sm:$0xf]  ;;  %1544 = vrot.lane.b32.xlu1 %v4884_v50, %s4695_s12  ;;  %v1152_v63 = vshll.u32 %v4884_v50, 16  ;;  %v1135_v4 = vrot.slane %v1133_v46, 1  ;;  %v254_v8 = vld [vmem:[#allocation2 + $0x48] sm:$0x1]  ;;  %v4906_v10 = vsel %vm1337_vm9, %v1344_v51, %v1345_v52 }
  0x37   : > { %v843_v0 = vld [vmem:[#allocation2 + $0x38] sm:$0x1]  ;;  %v307_v2 = vld [vmem:[#allocation2 + $0x44] sm:$0x1]  ;;  %v471_v9 = vld [vmem:[%s4817_s9 + $0x28] sm:$0xf]  ;;  %v1131_v29 = vor.u32 %v1130_v3, %v1126_v62 }
  0x38   : > { %v844_v6 = vsel %vm4785_vm3, %v562_v48, %v843_v0  ;;  %1305 = vrot.lane.b32.xlu0 %v1124_v55, %s4696_s13  ;;  %v1147_v11 = vrot.slane %v1145_v53, 1  ;;  %841 = vst [vmem:[#allocation2 + $0x30] sm:$0xf] %v840_v5  ;;  %v252_v12 = vsel %vm4785_vm3, 0, %v251_v49  ;;  %v564_v13 = vshrl.u32 %v469_v58, 16 }
  0x39   : > { %845 = vst [vmem:[#allocation2 + $0x38] sm:$0x1] %v844_v6  ;;  %v472_v14 = vld [vmem:[%s4817_s9 + $0x2c] sm:$0xf]  ;;  %v1150_v15 = vshrl.u32 %v4884_v50, 16  ;;  %v567_v16 = vshll.u32 %v469_v58, 16  ;;  %v1136_v49 = vsel %vm1112_vm10, %v1131_v29, %v1135_v4 }
  0x3a   : > { %253 = vst [vmem:[#allocation2 + $0x3c] sm:$0x1] %v252_v12  ;;  %v572_v17 = vshrl.u32 %v470_v59, 16  ;;  %v575_v18 = vshll.u32 %v470_v59, 16  ;;  %1388 = vrot.lane.b32.xlu1 %v1343_v60, %s4693_s10  ;;  %v1154_v19 = vrot.slane %v1152_v63, 1  ;;  %v566_v20 = vrot.slane %v564_v13, 7 }
  0x3b   : > { %v308_v21 = vsel %vm4806_vm5, 0, %v307_v2  ;;  %v255_v22 = vsel %vm4785_vm3, 0, %v254_v8  ;;  %v581_v24 = vshrl.u32 %v471_v9, 16  ;;  %v584_v25 = vshll.u32 %v471_v9, 16  ;;  %v310_v27 = vld [vmem:[#allocation2 + $0x50] sm:$0x1] }
  0x3c   : > { %v574_v23 = vrot.slane %v572_v17, 7  ;;  %309 = vst [vmem:[#allocation2 + $0x44] sm:$0x1] %v308_v21  ;;  %256 = vst [vmem:[#allocation2 + $0x48] sm:$0x1] %v255_v22  ;;  %v589_v26 = vshrl.u32 %v472_v14, 16  ;;  %1505 = vrot.lane.b32.xlu0 %v1343_v60, %s4697_s14  ;;  %v4919_v28 = vsel %vm1112_vm10, %v1143_v61, %v1147_v11  ;;  %v569_v33 = vor.u32 %v567_v16, %v566_v20 }
  0x3d   : > { %v4921_v30 = vld [vmem:[#allocation2 + $0x2c] ss:$0 sps:$4 sm:$0x11]   ;;  %v570_v31 = vrot.slane %v566_v20, 4  ;;  %v583_v35 = vrot.slane %v581_v24, 7  ;;  %v1155_v38 = vor.u32 %v1154_v19, %v1150_v15  ;;  %v592_v40 = vshll.u32 %v472_v14, 16 }
  0x3e   : > { %v577_v34 = vor.u32 %v575_v18, %v574_v23  ;;  %v591_v37 = vrot.slane %v589_v26, 7  ;;  %1507 = vrot.lane.b32.xlu1 %v4906_v10, %s4697_s14  ;;  %v1157_v39 = vshll.u32 %v4921_v30, 16  ;;  %v311_v41 = vsel %vm4806_vm5, 0, %v310_v27  ;;  %v257_v52 = vld [vmem:[#allocation2 + $0x54] sm:$0x1] }
  0x3f   : > { %v579_v43 = vrot.slane %v574_v23, 4  ;;  %v586_v44 = vor.u32 %v584_v25, %v583_v35  ;;  %v587_v45 = vrot.slane %v583_v35, 4  ;;  %312 = vst [vmem:[#allocation2 + $0x50] sm:$0x1] %v311_v41  ;;  %v473_v53 = vld [vmem:[%s4817_s9 + $0x30] sm:$0xf] }
  0x40   : > { %v578_v42 = vsel %vm4839_vm8, %v570_v31, %v577_v34  ;;  %1624 = vrot.lane.b32.xlu0 %v4906_v10, %s4698_s15  ;;  %v1159_v46 = vrot.slane %v1157_v39, 1  ;;  %v594_v48 = vor.u32 %v592_v40, %v591_v37  ;;  %v474_v54 = vld [vmem:[%s4817_s9 + $0x34] sm:$0xf]  ;;  %v313_v58 = vld [vmem:[#allocation2 + $0x5c] sm:$0x1]  ;;  %v596_v62 = vrot.slane %v591_v37, 4 }
  0x41   : > { %v846_v47 = vld [vmem:[#allocation2 + $0x3c] sm:$0xf]  ;;  %849 = vst.msk [vmem:[#allocation2 + $0x40] sm:$0xf] %vm224_vm0, %v578_v42  ;;  %v260_v63 = vld [vmem:[#allocation2 + $0x60] sm:$0x1] }
  0x42   : > { %v847_v51 = vsel %vm4831_vm7, %v569_v33, %v846_v47  ;;  %1472 = vrot.lane.b32.xlu1 %v4919_v28, %s4699_s16  ;;  %v595_v56 = vsel %vm4839_vm8, %v587_v45, %v594_v48  ;;  %v4943_v59 = vsel %vm1112_vm10, %v1155_v38, %v1159_v46  ;;  %v475_v0 = vld [vmem:[%s4817_s9 + $0x38] sm:$0xf]  ;;  %v258_v2 = vsel %vm4785_vm3, 0, %v257_v52  ;;  %v476_v4 = vld [vmem:[%s4817_s9 + $0x3c] sm:$0xf]  ;;  %v4956_v6 = vld [vmem:[#allocation2 + $0x30] sm:$0xff]  }
  0x43   : > { %848 = vst [vmem:[#allocation2 + $0x3c] sm:$0xf] %v847_v51  ;;  %v850_v55 = vld [vmem:[#allocation2 + $0x44] sm:$0x1]  ;;  %v853_v57 = vld [vmem:[#allocation2 + $0x48] sm:$0xf] }
  0x44   : > { %v851_v60 = vsel %vm4785_vm3, %v579_v43, %v850_v55  ;;  %v854_v61 = vsel %vm4831_vm7, %v586_v44, %v853_v57  ;;  %856 = vst.msk [vmem:[#allocation2 + $0x4c] sm:$0xf] %vm224_vm0, %v595_v56  ;;  %1307 = vrot.lane.b32.xlu0 %v1136_v49, %s4696_s13  ;;  %v598_v3 = vshrl.u32 %v473_v53, 16  ;;  %v1347_v5 = vrot.slane %v4884_v50, 1  ;;  %259 = vst [vmem:[#allocation2 + $0x54] sm:$0x1] %v258_v2 }
  0x45   : > { %852 = vst [vmem:[#allocation2 + $0x44] sm:$0x1] %v851_v60  ;;  %855 = vst [vmem:[#allocation2 + $0x48] sm:$0xf] %v854_v61  ;;  %v606_v8 = vshrl.u32 %v474_v54, 16  ;;  %v609_v9 = vshll.u32 %v474_v54, 16 }
  0x46   : > { %v316_v11 = vld [vmem:[#allocation2 + $0x68] sm:$0x1]  ;;  %1591 = vrot.lane.b32.xlu1 %v4943_v59, %s4700_s17  ;;  %v857_v12 = vld [vmem:[#allocation2 + $0x50] sm:$0x1]  ;;  %v600_v13 = vrot.slane %v598_v3, 7  ;;  %v314_v14 = vsel %vm4806_vm5, 0, %v313_v58 }
  0x47   : > { %v261_v15 = vsel %vm4785_vm3, 0, %v260_v63  ;;  %v615_v16 = vshrl.u32 %v475_v0, 16  ;;  %v858_v17 = vsel %vm4785_vm3, %v596_v62, %v857_v12  ;;  %v601_v18 = vshll.u32 %v473_v53, 16  ;;  %315 = vst [vmem:[#allocation2 + $0x5c] sm:$0x1] %v314_v14 }
  0x48   : > { %v608_v19 = vrot.slane %v606_v8, 7  ;;  %262 = vst [vmem:[#allocation2 + $0x60] sm:$0x1] %v261_v15  ;;  %v263_v20 = vld [vmem:[#allocation2 + $0x6c] sm:$0x1]  ;;  %1470 = vrot.lane.b32.xlu0 %v1136_v49, %s4699_s16  ;;  %v1348_v21 = vrot.slane %v4921_v30, 1 }
  0x49   : > { %859 = vst [vmem:[#allocation2 + $0x50] sm:$0x1] %v858_v17  ;;  %v604_v22 = vrot.slane %v600_v13, 4  ;;  %v617_v23 = vrot.slane %v615_v16, 7  ;;  %v623_v24 = vshrl.u32 %v476_v4, 16  ;;  %v618_v27 = vshll.u32 %v475_v0, 16 }
  0x4a   : > { %v4968_v25 = vld [vmem:[#allocation2 + $0x38] ss:$0 sps:$4 sm:$0x11]   ;;  %v611_v26 = vor.u32 %v609_v9, %v608_v19  ;;  %v626_v29 = vshll.u32 %v476_v4, 16  ;;  %v317_v31 = vsel %vm4806_vm5, 0, %v316_v11  ;;  %1309 = vrot.lane.b32.xlu1 %v4919_v28, %s4696_s13  ;;  %v264_v30 = vsel %vm4785_vm3, 0, %v263_v20 }
  0x4b   : > { %v625_v33 = vrot.slane %v623_v24, 7  ;;  %318 = vst [vmem:[#allocation2 + $0x68] sm:$0x1] %v317_v31  ;;  %v477_v34 = vld [vmem:[%s4817_s9 + $0x40] sm:$0xf]  ;;  %v1164_v35 = vshll.u32 %v4956_v6, 16  ;;  %v603_v37 = vor.u32 %v601_v18, %v600_v13  ;;  %v4984_v42 = vsel %vm1337_vm9, %v1347_v5, %v1348_v21 }
  0x4c   : > { %v612_v38 = vsel %vm4839_vm8, %v604_v22, %v611_v26  ;;  %v613_v39 = vrot.slane %v608_v19, 4  ;;  %265 = vst [vmem:[#allocation2 + $0x6c] sm:$0x1] %v264_v30  ;;  %1589 = vrot.lane.b32.xlu0 %v4919_v28, %s4700_s17  ;;  %v621_v40 = vrot.slane %v617_v23, 4  ;;  %v1162_v43 = vshrl.u32 %v4956_v6, 16  ;;  %v5005_v2 = vld [vmem:[#allocation2 + $0x3c] sm:$0xff]  }
  0x4d   : > { %863 = vst.msk [vmem:[#allocation2 + $0x58] sm:$0xf] %vm224_vm0, %v612_v38  ;;  %v628_v41 = vor.u32 %v626_v29, %v625_v33  ;;  %v860_v44 = vld [vmem:[#allocation2 + $0x54] sm:$0xf]  ;;  %v620_v45 = vor.u32 %v618_v27, %v617_v23  ;;  %v632_v46 = vshrl.u32 %v477_v34, 16  ;;  %v630_v48 = vrot.slane %v625_v33, 4 }
  0x4e   : > { %1311 = vrot.lane.b32.xlu1 %v4943_v59, %s4696_s13  ;;  %v864_v47 = vld [vmem:[#allocation2 + $0x5c] sm:$0x1]  ;;  %v478_v49 = vld [vmem:[%s4817_s9 + $0x44] sm:$0xf]  ;;  %v635_v51 = vshll.u32 %v477_v34, 16  ;;  %v1166_v28 = vrot.slane %v1164_v35, 1  ;;  %v861_v53 = vsel %vm4831_vm7, %v603_v37, %v860_v44 }
  0x4f   : > { %v1169_v52 = vshll.u32 %v4968_v25, 16  ;;  %v865_v54 = vsel %vm4785_vm3, %v613_v39, %v864_v47  ;;  %862 = vst [vmem:[#allocation2 + $0x54] sm:$0xf] %v861_v53  ;;  %v629_v55 = vsel %vm4839_vm8, %v621_v40, %v628_v41  ;;  %v867_v56 = vld [vmem:[#allocation2 + $0x60] sm:$0xf]  ;;  %v634_v57 = vrot.slane %v632_v46, 7 }
  0x50   : > { %1626 = vrot.lane.b32.xlu0 %v4984_v42, %s4698_s15  ;;  %866 = vst [vmem:[#allocation2 + $0x5c] sm:$0x1] %v865_v54  ;;  %v319_v58 = vld [vmem:[#allocation2 + $0x74] sm:$0x1]  ;;  %v868_v60 = vsel %vm4831_vm7, %v620_v45, %v867_v56  ;;  %870 = vst.msk [vmem:[#allocation2 + $0x64] sm:$0xf] %vm224_vm0, %v629_v55  ;;  %v1167_v8 = vor.u32 %v1166_v28, %v1162_v43 }
  0x51   : > { %v640_v62 = vshrl.u32 %v478_v49, 16  ;;  %v266_v63 = vld [vmem:[#allocation2 + $0x78] sm:$0x1]  ;;  %v1350_v0 = vrot.slane %v4956_v6, 1  ;;  %869 = vst [vmem:[#allocation2 + $0x60] sm:$0xf] %v868_v60  ;;  %v637_v4 = vor.u32 %v635_v51, %v634_v57 }
  0x52   : > { %v871_v61 = vld [vmem:[#allocation2 + $0x68] sm:$0x1]  ;;  %1392 = vrot.lane.b32.xlu1 %v4984_v42, %s4693_s10  ;;  %v1171_v9 = vrot.slane %v1169_v52, 1  ;;  %v638_v13 = vrot.slane %v634_v57, 4  ;;  %v643_v14 = vshll.u32 %v478_v49, 16  ;;  %v320_v16 = vsel %vm4806_vm5, 0, %v319_v58 }
  0x53   : > { %v872_v3 = vsel %vm4785_vm3, %v630_v48, %v871_v61  ;;  %v874_v5 = vld [vmem:[#allocation2 + $0x6c] sm:$0xf]  ;;  %v642_v11 = vrot.slane %v640_v62, 7  ;;  %v479_v12 = vld [vmem:[%s4817_s9 + $0x48] sm:$0xf]  ;;  %v1351_v17 = vrot.slane %v4968_v25, 1 }
  0x54   : > { %873 = vst [vmem:[#allocation2 + $0x68] sm:$0x1] %v872_v3  ;;  %1390 = vrot.lane.b32.xlu0 %v4906_v10, %s4693_s10  ;;  %v875_v15 = vsel %vm4831_vm7, %v637_v4, %v874_v5  ;;  %v5017_v18 = vld [vmem:[#allocation2 + $0x44] ss:$0 sps:$4 sm:$0x11]   ;;  %v1176_v10 = vshll.u32 %v5005_v2, 16  ;;  %v5025_v22 = vsel %vm1112_vm10, %v1167_v8, %v1171_v9 }
  0x55   : > { %876 = vst [vmem:[#allocation2 + $0x6c] sm:$0xf] %v875_v15  ;;  %321 = vst [vmem:[#allocation2 + $0x74] sm:$0x1] %v320_v16  ;;  %v645_v19 = vor.u32 %v643_v14, %v642_v11  ;;  %v267_v20 = vsel %vm4785_vm3, 0, %v266_v63  ;;  %v649_v21 = vshrl.u32 %v479_v12, 16  ;;  %v5036_v31 = vsel %vm1337_vm9, %v1350_v0, %v1351_v17 }
  0x56   : > { %1429 = vrot.lane.b32.xlu1 %v4956_v6, %s4694_s11  ;;  %268 = vst [vmem:[#allocation2 + $0x78] sm:$0x1] %v267_v20  ;;  %v480_v23 = vld [vmem:[%s4817_s9 + $0x4c] sm:$0xf]  ;;  %v652_v26 = vshll.u32 %v479_v12, 16  ;;  %v647_v27 = vrot.slane %v642_v11, 4 }
  0x57   : > { %v646_v24 = vsel %vm4839_vm8, %v638_v13, %v645_v19  ;;  %v651_v25 = vrot.slane %v649_v21, 7  ;;  %v657_v29 = vshrl.u32 %v480_v23, 16  ;;  %v1174_v33 = vshrl.u32 %v5005_v2, 16  ;;  %v4523_v34 = vld [vmem:[%s6563_s1 + $0x10] ss:$0 sps:$4 sm:$0x33]  }
  0x58   : > { %1427 = vrot.lane.b32.xlu0 %v4884_v50, %s4694_s11  ;;  %877 = vst.msk [vmem:[#allocation2 + $0x70] sm:$0xf] %vm224_vm0, %v646_v24  ;;  %v1178_v30 = vrot.slane %v1176_v10, 1  ;;  %v1181_v50 = vshll.u32 %v5017_v18, 16  ;;  %v660_v41 = vshll.u32 %v480_v23, 16  ;;  %vm6568_vm11 = vcmask 1041408  }
  0x59   : > { %v654_v37 = vor.u32 %v652_v26, %v651_v25  ;;  %v655_v38 = vrot.slane %v651_v25, 4  ;;  %v5049_v40 = vrot.slane %v657_v29, 7  ;;  %v4525_v44 = vld [vmem:[%s6563_s1 + $0x8] sm:$0xff]   ;;  %4452 = vmatprep.subr.msk.bf16.mxu0 %vm6568_vm11, %v4523_v34  ;;  %v1982_v48 = vsel %vm6568_vm11, %v4523_v34, 0  ;;  %v322_v49 = vld [vmem:[#allocation2 + $0x80] sm:$0x1] }
  0x5a   : > { %1476 = vrot.lane.b32.xlu1 %v5025_v22, %s4699_s16  ;;  %v1183_v45 = vrot.slane %v1181_v50, 1  ;;  %4377 = vmatpush3.bf16.msra.mxu0 %v1982_v48  ;;  %v269_v51 = vld [vmem:[#allocation2 + $0x84] sm:$0x1]  ;;  %v481_v28 = vld [vmem:[%s4817_s9 + $0x50] sm:$0xf]  ;;  %v323_v55 = vsel %vm4806_vm5, 0, %v322_v49 }
  0x5b   : > { %v662_v46 = vor.u32 %v660_v41, %v5049_v40  ;;  %4378 = vmatprep.subr.bf16.mxu0 %v4525_v44  ;;  %v482_v53 = vld [vmem:[%s4817_s9 + $0x54] sm:$0xf]  ;;  %v325_v56 = vld [vmem:[#allocation2 + $0x8c] sm:$0x1]  ;;  %324 = vst [vmem:[#allocation2 + $0x80] sm:$0x1] %v323_v55 }
  0x5c   : > { %1474 = vrot.lane.b32.xlu0 %v4943_v59, %s4699_s16  ;;  %v878_v35 = vld [vmem:[#allocation2 + $0x74] sm:$0x1]  ;;  %v1179_v59 = vor.u32 %v1178_v30, %v1174_v33  ;;  %v5078_v57 = vld [vmem:[#allocation2 + $0x48] sm:$0xff]   ;;  %v270_v58 = vsel %vm4785_vm3, 0, %v269_v51  ;;  %v666_v60 = vshrl.u32 %v481_v28, 16  ;;  %v669_v61 = vshll.u32 %v481_v28, 16 }
  0x5d   : > { %v879_v39 = vsel %vm4785_vm3, %v647_v27, %v878_v35  ;;  %v881_v43 = vld [vmem:[#allocation2 + $0x78] sm:$0xf]  ;;  %v663_v52 = vsel %vm4839_vm8, %v655_v38, %v662_v46  ;;  %v272_v62 = vld [vmem:[#allocation2 + $0x90] sm:$0x1]  ;;  %271 = vst [vmem:[#allocation2 + $0x84] sm:$0x1] %v270_v58 }
  0x5e   : > { %1511 = vrot.lane.b32.xlu1 %v5036_v31, %s4697_s14  ;;  %880 = vst [vmem:[#allocation2 + $0x74] sm:$0x1] %v879_v39  ;;  %v882_v47 = vsel %vm4831_vm7, %v654_v37, %v881_v43  ;;  %v5071_v54 = vsel %vm1112_vm10, %v1179_v59, %v1183_v45  ;;  %884 = vst.msk [vmem:[#allocation2 + $0x7c] sm:$0xf] %vm224_vm0, %v663_v52  ;;  %4379 = vmatpush3.bf16.msra.mxu0 %v4525_v44  ;;  %v674_v63 = vshrl.u32 %v482_v53, 16  ;;  %vm1656_vm12 = vcmask 31744  }
  0x5f   : > { %883 = vst [vmem:[#allocation2 + $0x78] sm:$0xf] %v882_v47  ;;  %v677_v0 = vshll.u32 %v482_v53, 16  ;;  %v326_v3 = vsel %vm4806_vm5, 0, %v325_v56  ;;  %v483_v4 = vld [vmem:[%s4817_s9 + $0x58] sm:$0xf] }
  0x60   : > { %1509 = vrot.lane.b32.xlu0 %v4984_v42, %s4697_s14  ;;  %v4526_v42 = vld [vmem:[%s6563_s1] sm:$0xff]   ;;  %v668_v5 = vrot.slane %v666_v60, 7  ;;  %327 = vst [vmem:[#allocation2 + $0x8c] sm:$0x1] %v326_v3  ;;  %v1353_v8 = vrot.slane %v5005_v2, 1  ;;  %v676_v9 = vrot.slane %v674_v63, 7 }
  0x61   : > { %4380 = vmatprep.subr.bf16.mxu0 %v4526_v42  ;;  %v484_v11 = vld [vmem:[%s4817_s9 + $0x5c] sm:$0xf]  ;;  %v683_v12 = vshrl.u32 %v483_v4, 16  ;;  %v686_v13 = vshll.u32 %v483_v4, 16  ;;  %v1354_v14 = vrot.slane %v5017_v18, 1  ;;  %v1188_v16 = vshll.u32 %v5078_v57, 16 }
  0x62   : > { %1548 = vrot.lane.b32.xlu1 %v5005_v2, %s4695_s12  ;;  %v5094_v15 = vld [vmem:[#allocation2 + $0x50] ss:$0 sps:$4 sm:$0x11]   ;;  %v664_v17 = vrot.slane %v5049_v40, 4  ;;  %v672_v10 = vrot.slane %v668_v5, 4  ;;  %4381 = vmatpush3.bf16.msra.mxu0 %v4526_v42  ;;  %v671_v19 = vor.u32 %v669_v61, %v668_v5  ;;  %v679_v20 = vor.u32 %v677_v0, %v676_v9 }
  0x63   : > { %v685_v21 = vrot.slane %v683_v12, 7  ;;  %v691_v23 = vshrl.u32 %v484_v11, 16  ;;  %v328_v24 = vld [vmem:[#allocation2 + $0x98] sm:$0x1]  ;;  %v681_v25 = vrot.slane %v676_v9, 4  ;;  %v694_v26 = vshll.u32 %v484_v11, 16 }
  0x64   : > { %1546 = vrot.lane.b32.xlu0 %v4956_v6, %s4695_s12  ;;  %v273_v6 = vsel %vm4785_vm3, 0, %v272_v62  ;;  %v329_v18 = vsel %vm4806_vm5, 0, %v328_v24  ;;  %v885_v27 = vld [vmem:[#allocation2 + $0x80] sm:$0x1]  ;;  %v680_v29 = vsel %vm4839_vm8, %v672_v10, %v679_v20  ;;  %v275_v34 = vld [vmem:[#allocation2 + $0x9c] sm:$0x1]  ;;  %v5112_v39 = vsel %vm1337_vm9, %v1353_v8, %v1354_v14 }
  0x65   : > { %274 = vst [vmem:[#allocation2 + $0x90] sm:$0x1] %v273_v6  ;;  %v688_v33 = vor.u32 %v686_v13, %v685_v21  ;;  %v689_v30 = vrot.slane %v685_v21, 4  ;;  %v693_v50 = vrot.slane %v691_v23, 7  ;;  %330 = vst [vmem:[#allocation2 + $0x98] sm:$0x1] %v329_v18  ;;  %v886_v35 = vsel %vm4785_vm3, %v664_v17, %v885_v27 }
  0x66   : > { %1595 = vrot.lane.b32.xlu1 %v5071_v54, %s4700_s17  ;;  %v888_v37 = vld [vmem:[#allocation2 + $0x84] sm:$0xf]  ;;  %891 = vst.msk [vmem:[#allocation2 + $0x88] sm:$0xf] %vm224_vm0, %v680_v29  ;;  %v485_v38 = vld [vmem:[%s4817_s9 + $0x60] sm:$0xf] }
  0x67   : > { %v1190_v40 = vrot.slane %v1188_v16, 1  ;;  %887 = vst [vmem:[#allocation2 + $0x80] sm:$0x1] %v886_v35  ;;  %v889_v41 = vsel %vm4831_vm7, %v671_v19, %v888_v37  ;;  %v892_v43 = vld [vmem:[#allocation2 + $0x8c] sm:$0x1]  ;;  %v696_v44 = vor.u32 %v694_v26, %v693_v50  ;;  %v1193_v45 = vshll.u32 %v5094_v15, 16 }
  0x68   : > { %1593 = vrot.lane.b32.xlu0 %v5025_v22, %s4700_s17  ;;  %890 = vst [vmem:[#allocation2 + $0x84] sm:$0xf] %v889_v41  ;;  %v893_v46 = vsel %vm4785_vm3, %v681_v25, %v892_v43  ;;  %v276_v48 = vsel %vm4785_vm3, 0, %v275_v34  ;;  %v486_v49 = vld [vmem:[%s4817_s9 + $0x64] sm:$0xf]  ;;  %v698_v52 = vrot.slane %v693_v50, 4 }
  0x69   : > { %v331_v51 = vld [vmem:[#allocation2 + $0xa4] sm:$0x1]  ;;  %894 = vst [vmem:[#allocation2 + $0x8c] sm:$0x1] %v893_v46  ;;  %v697_v28 = vsel %vm4839_vm8, %v689_v30, %v696_v44  ;;  %277 = vst [vmem:[#allocation2 + $0x9c] sm:$0x1] %v276_v48 }
  0x6a   : > { %1313 = vrot.lane.b32.xlu1 %v5025_v22, %s4696_s13  ;;  %v1186_v22 = vshrl.u32 %v5078_v57, 16  ;;  %v700_v42 = vshrl.u32 %v485_v38, 16  ;;  %v708_v53 = vshrl.u32 %v486_v49, 16  ;;  %v278_v55 = vld [vmem:[#allocation2 + $0xa8] sm:$0x1]  ;;  %v711_v56 = vshll.u32 %v486_v49, 16 }
  0x6b   : > { %898 = vst.msk [vmem:[#allocation2 + $0x94] sm:$0xf] %vm224_vm0, %v697_v28  ;;  %v332_v58 = vsel %vm4806_vm5, 0, %v331_v51  ;;  %v279_v60 = vsel %vm4785_vm3, 0, %v278_v55  ;;  %v487_v61 = vld [vmem:[%s4817_s9 + $0x68] sm:$0xf] }
  0x6c   : > { %1628 = vrot.lane.b32.xlu0 %v5036_v31, %s4698_s15  ;;  %v895_v59 = vld [vmem:[#allocation2 + $0x90] sm:$0xf]  ;;  %v702_v62 = vrot.slane %v700_v42, 7  ;;  %v703_v63 = vshll.u32 %v485_v38, 16  ;;  %v710_v0 = vrot.slane %v708_v53, 7  ;;  %v717_v6 = vshrl.u32 %v487_v61, 16 }
  0x6d   : > { %v896_v47 = vsel %vm4831_vm7, %v688_v33, %v895_v59  ;;  %333 = vst [vmem:[#allocation2 + $0xa4] sm:$0x1] %v332_v58  ;;  %280 = vst [vmem:[#allocation2 + $0xa8] sm:$0x1] %v279_v60  ;;  %v488_v3 = vld [vmem:[%s4817_s9 + $0x6c] sm:$0xf]  ;;  %v1191_v4 = vor.u32 %v1190_v40, %v1186_v22 }
  0x6e   : > { %1315 = vrot.lane.b32.xlu1 %v5071_v54, %s4696_s13  ;;  %897 = vst [vmem:[#allocation2 + $0x90] sm:$0xf] %v896_v47  ;;  %v899_v5 = vld [vmem:[#allocation2 + $0x98] sm:$0x1]  ;;  %v725_v8 = vshrl.u32 %v488_v3, 16  ;;  %v1195_v11 = vrot.slane %v1193_v45, 1  ;;  %v713_v16 = vor.u32 %v711_v56, %v710_v0  ;;  %v705_v19 = vor.u32 %v703_v63, %v702_v62 }
  0x6f   : > { %v334_v9 = vld [vmem:[#allocation2 + $0xb0] sm:$0x1]  ;;  %v5139_v12 = vld [vmem:[#allocation2 + $0x54] sm:$0xff]   ;;  %v900_v13 = vsel %vm4785_vm3, %v698_v52, %v899_v5  ;;  %v706_v14 = vrot.slane %v702_v62, 4  ;;  %v1356_v17 = vrot.slane %v5078_v57, 1  ;;  %v720_v10 = vshll.u32 %v487_v61, 16 }
  0x70   : > { %1630 = vrot.lane.b32.xlu0 %v5112_v39, %s4698_s15  ;;  %901 = vst [vmem:[#allocation2 + $0x98] sm:$0x1] %v900_v13  ;;  %v719_v21 = vrot.slane %v717_v6, 7  ;;  %v335_v23 = vsel %vm4806_vm5, 0, %v334_v9  ;;  %v727_v24 = vrot.slane %v725_v8, 7  ;;  %v728_v25 = vshll.u32 %v488_v3, 16 }
  0x71   : > { %v714_v20 = vsel %vm4839_vm8, %v706_v14, %v713_v16  ;;  %336 = vst [vmem:[#allocation2 + $0xb0] sm:$0x1] %v335_v23  ;;  %v1357_v26 = vrot.slane %v5094_v15, 1  ;;  %v5157_v18 = vld [vmem:[#allocation2 + $0x5c] ss:$0 sps:$4 sm:$0x11]  }
  0x72   : > { %1396 = vrot.lane.b32.xlu1 %v5112_v39, %s4693_s10  ;;  %905 = vst.msk [vmem:[#allocation2 + $0xa0] sm:$0xf] %vm224_vm0, %v714_v20  ;;  %v1200_v27 = vshll.u32 %v5139_v12, 16  ;;  %v715_v29 = vrot.slane %v710_v0, 4  ;;  %v902_v33 = vld [vmem:[#allocation2 + $0x9c] sm:$0xf]  ;;  %v722_v30 = vor.u32 %v720_v10, %v719_v21  ;;  %v730_v22 = vor.u32 %v728_v25, %v727_v24 }
  0x73   : > { %v903_v50 = vsel %vm4831_vm7, %v705_v19, %v902_v33  ;;  %v1198_v15 = vshrl.u32 %v5139_v12, 16  ;;  %v5168_v37 = vsel %vm1337_vm9, %v1356_v17, %v1357_v26  ;;  %v281_v41 = vld [vmem:[#allocation2 + $0xb4] sm:$0x1]  ;;  %v723_v43 = vrot.slane %v719_v21, 4  ;;  %v489_v45 = vld [vmem:[%s4817_s9 + $0x70] sm:$0xf] }
  0x74   : > { %1394 = vrot.lane.b32.xlu0 %v5036_v31, %s4693_s10  ;;  %v5154_v31 = vsel %vm1112_vm10, %v1191_v4, %v1195_v11  ;;  %v906_v34 = vld [vmem:[#allocation2 + $0xa4] sm:$0x1]  ;;  %904 = vst [vmem:[#allocation2 + $0x9c] sm:$0xf] %v903_v50  ;;  %v909_v35 = vld [vmem:[#allocation2 + $0xa8] sm:$0xf] }
  0x75   : > { %v1202_v38 = vrot.slane %v1200_v27, 1  ;;  %v907_v40 = vsel %vm4785_vm3, %v715_v29, %v906_v34  ;;  %v910_v44 = vsel %vm4831_vm7, %v722_v30, %v909_v35  ;;  %v732_v59 = vrot.slane %v727_v24, 4  ;;  %v490_v49 = vld [vmem:[%s4817_s9 + $0x74] sm:$0xf]  ;;  %v337_v51 = vld [vmem:[#allocation2 + $0xbc] sm:$0x1] }
  0x76   : > { %1433 = vrot.lane.b32.xlu1 %v5078_v57, %s4694_s11  ;;  %908 = vst [vmem:[#allocation2 + $0xa4] sm:$0x1] %v907_v40  ;;  %911 = vst [vmem:[#allocation2 + $0xa8] sm:$0xf] %v910_v44  ;;  %v731_v47 = vsel %vm4839_vm8, %v723_v43, %v730_v22  ;;  %v734_v42 = vshrl.u32 %v489_v45, 16  ;;  %v742_v53 = vshrl.u32 %v490_v49, 16 }
  0x77   : > { %v1203_v28 = vor.u32 %v1202_v38, %v1198_v15  ;;  %912 = vst.msk [vmem:[#allocation2 + $0xac] sm:$0xf] %vm224_vm0, %v731_v47  ;;  %v745_v55 = vshll.u32 %v490_v49, 16  ;;  %v338_v56 = vsel %vm4806_vm5, 0, %v337_v51  ;;  %v284_v58 = vld [vmem:[#allocation2 + $0xc0] sm:$0x1] }
  0x78   : > { %1431 = vrot.lane.b32.xlu0 %v5005_v2, %s4694_s11  ;;  %v1205_v2 = vshll.u32 %v5157_v18, 16  ;;  %v913_v46 = vld [vmem:[#allocation2 + $0xb0] sm:$0x1]  ;;  %v736_v60 = vrot.slane %v734_v42, 7  ;;  %v737_v61 = vshll.u32 %v489_v45, 16  ;;  %v285_v62 = vsel %vm4785_vm3, 0, %v284_v58 }
  0x79   : > { %v914_v48 = vsel %vm4785_vm3, %v732_v59, %v913_v46  ;;  %339 = vst [vmem:[#allocation2 + $0xbc] sm:$0x1] %v338_v56  ;;  %v744_v63 = vrot.slane %v742_v53, 7  ;;  %286 = vst [vmem:[#allocation2 + $0xc0] sm:$0x1] %v285_v62  ;;  %v5205_v9 = vld [vmem:[#allocation2 + $0x60] sm:$0xff]  }
  0x7a   : > { %1480 = vrot.lane.b32.xlu1 %v5154_v31, %s4699_s16  ;;  %v1207_v52 = vrot.slane %v1205_v2, 1  ;;  %915 = vst [vmem:[#allocation2 + $0xb0] sm:$0x1] %v914_v48  ;;  %v340_v0 = vld [vmem:[#allocation2 + $0xc8] sm:$0x1]  ;;  %v740_v3 = vrot.slane %v736_v60, 4  ;;  %v739_v4 = vor.u32 %v737_v61, %v736_v60 }
  0x7b   : > { %v747_v6 = vor.u32 %v745_v55, %v744_v63  ;;  %v749_v5 = vrot.slane %v744_v63, 4  ;;  %v341_v8 = vsel %vm4806_vm5, 0, %v340_v0  ;;  %v1359_v14 = vrot.slane %v5139_v12, 1  ;;  %v4519_v10 = vld [vmem:[#allocation2 + $0x68] ss:$0 sps:$4 sm:$0x11]  }
  0x7c   : > { %1478 = vrot.lane.b32.xlu0 %v5071_v54, %s4699_s16  ;;  %v282_v54 = vsel %vm4785_vm3, 0, %v281_v41  ;;  %342 = vst [vmem:[#allocation2 + $0xc8] sm:$0x1] %v341_v8  ;;  %v1360_v17 = vrot.slane %v5157_v18, 1  ;;  %v492_v21 = vld [vmem:[%s4817_s9 + $0x7c] sm:$0xf] }
  0x7d   : > { %283 = vst [vmem:[#allocation2 + $0xb4] sm:$0x1] %v282_v54  ;;  %v748_v11 = vsel %vm4839_vm8, %v740_v3, %v747_v6  ;;  %v1212_v23 = vshll.u32 %v5205_v9, 16  ;;  %v759_v26 = vshrl.u32 %v492_v21, 16  ;;  %v762_v27 = vshll.u32 %v492_v21, 16  ;;  %v5238_v45 = vld [vmem:[#allocation2 + $0x6c] sm:$0xff]  }
  0x7e   : > { %1515 = vrot.lane.b32.xlu1 %v5168_v37, %s4697_s14  ;;  %919 = vst.msk [vmem:[#allocation2 + $0xb8] sm:$0xf] %vm224_vm0, %v748_v11  ;;  %v1361_v33 = vsel %vm1337_vm9, %v1359_v14, %v1360_v17  ;;  %v1217_v35 = vshll.u32 %v4519_v10, 16  ;;  %v287_v46 = vld [vmem:[#allocation2 + $0xcc] sm:$0x1]  ;;  %v1362_v47 = vrot.slane %v5205_v9, 1 }
  0x7f   : > { %v761_v30 = vrot.slane %v759_v26, 7  ;;  %v1214_v22 = vrot.slane %v1212_v23, 1  ;;  %v1363_v48 = vrot.slane %v4519_v10, 1  ;;  %v288_v54 = vsel %vm4785_vm3, 0, %v287_v46  ;;  %v4580_v26 = vld [vmem:[#allocation2] sm:$0xff]  }
  0x80   : > { %1513 = vrot.lane.b32.xlu0 %v5112_v39, %s4697_s14  ;;  %v5197_v39 = vsel %vm1112_vm10, %v1203_v28, %v1207_v52  ;;  %v920_v16 = vld [vmem:[#allocation2 + $0xbc] sm:$0x1]  ;;  %v923_v18 = vld [vmem:[#allocation2 + $0xc0] sm:$0xf]  ;;  %v1219_v59 = vrot.slane %v1217_v35, 1  ;;  %v1224_v28 = vshll.u32 %v5238_v45, 16 }
  0x81   : > { %v921_v20 = vsel %vm4785_vm3, %v749_v5, %v920_v16  ;;  %v764_v38 = vor.u32 %v762_v27, %v761_v30  ;;  %v766_v2 = vrot.slane %v761_v30, 4  ;;  %v4521_v51 = vld [vmem:[#allocation2 + $0x74] ss:$0 sps:$4 sm:$0x11]   ;;  %289 = vst [vmem:[#allocation2 + $0xcc] sm:$0x1] %v288_v54  ;;  %v1364_v42 = vsel %vm1337_vm9, %v1362_v47, %v1363_v48 }
  0x82   : > { %1552 = vrot.lane.b32.xlu1 %v5139_v12, %s4695_s12  ;;  %922 = vst [vmem:[#allocation2 + $0xbc] sm:$0x1] %v921_v20  ;;  %v343_v52 = vld [vmem:[#allocation2 + $0xd4] sm:$0x1]  ;;  %v1222_v53 = vshrl.u32 %v5238_v45, 16  ;;  %v1226_v55 = vrot.slane %v1224_v28, 1 }
  0x83   : > { %v927_v50 = vld [vmem:[#allocation2 + $0xc8] sm:$0x1]  ;;  %v1229_v56 = vshll.u32 %v4521_v51, 16  ;;  %v1366_v5 = vrot.slane %v4521_v51, 1  ;;  %vm1689_vm13 = vcmask 64512   ;;  %vm1722_vm14 = vcmask 97280  }
  0x84   : > { %1550 = vrot.lane.b32.xlu0 %v5078_v57, %s4695_s12  ;;  %v916_v13 = vld [vmem:[#allocation2 + $0xb4] sm:$0xf]  ;;  %v491_v57 = vld [vmem:[%s4817_s9 + $0x78] sm:$0xf]  ;;  %v928_v43 = vsel %vm4785_vm3, %v766_v2, %v927_v50  ;;  %v1227_v60 = vor.u32 %v1226_v55, %v1222_v53  ;;  %vm1755_vm15 = vcmask 130048   ;;  %vm1788_vm1 = vcmask 162816  }
  0x85   : > { %v917_v19 = vsel %vm4831_vm7, %v739_v4, %v916_v13  ;;  %v751_v24 = vshrl.u32 %v491_v57, 16  ;;  %v754_v25 = vshll.u32 %v491_v57, 16  ;;  %929 = vst [vmem:[#allocation2 + $0xc8] sm:$0x1] %v928_v43  ;;  %v1231_v61 = vrot.slane %v1229_v56, 1 }
  0x86   : > { %1599 = vrot.lane.b32.xlu1 %v5197_v39, %s4700_s17  ;;  %918 = vst [vmem:[#allocation2 + $0xb4] sm:$0xf] %v917_v19  ;;  %v1365_v4 = vrot.slane %v5238_v45, 1  ;;  %v4524_v11 = vld [vmem:[#allocation2 + $0x80] ss:$0 sps:$4 sm:$0x11]  }
  0x87   : > { %v753_v29 = vrot.slane %v751_v24, 7  ;;  %v5263_v0 = vsel %vm1112_vm10, %v1227_v60, %v1231_v61  ;;  %v1241_v19 = vshll.u32 %v4524_v11, 16  ;;  %v1369_v30 = vrot.slane %v4524_v11, 1 }
  0x88   : > { %1597 = vrot.lane.b32.xlu0 %v5154_v31, %s4700_s17  ;;  %v1367_v14 = vsel %vm1337_vm9, %v1365_v4, %v1366_v5  ;;  %vm1821_vm2 = vcmask 195584   ;;  %vm6570_vm4 = vcmask 261120   ;;  %vm1854_vm6 = vcmask 228352   ;;  %v5329_v4 = vld [vmem:[#allocation2 + $0x90] sm:$0xff]  }
  0x89   : > { %v756_v34 = vor.u32 %v754_v25, %v753_v29  ;;  %v757_v15 = vrot.slane %v753_v29, 4  ;;  %v1243_v24 = vrot.slane %v1241_v19, 1  ;;  %v5286_v25 = vld [vmem:[#allocation2 + $0x84] sm:$0xff]   ;;  %vm6569_vm11 = vcmask 293888  }
  0x8a   : > { %1317 = vrot.lane.b32.xlu1 %v5154_v31, %s4696_s13  ;;  %v1210_v31 = vshrl.u32 %v5205_v9, 16  ;;  %v1248_v35 = vshll.u32 %v5286_v25, 16  ;;  %v1258_v19 = vshrl.u32 %v5329_v4, 16 }
  0x8b   : > { %v924_v40 = vsel %vm4831_vm7, %v756_v34, %v923_v18  ;;  %v765_v41 = vsel %vm4839_vm8, %v757_v15, %v764_v38 }
  0x8c   : > { %1632 = vrot.lane.b32.xlu0 %v5168_v37, %s4698_s15  ;;  %925 = vst [vmem:[#allocation2 + $0xc0] sm:$0xf] %v924_v40  ;;  %926 = vst.msk [vmem:[#allocation2 + $0xc4] sm:$0xf] %vm224_vm0, %v765_v41  ;;  %v1215_v44 = vor.u32 %v1214_v22, %v1210_v31  ;;  %v4581_v31 = vld [vmem:[#allocation2 + $0xc] sm:$0xff]   ;;  %v1250_v48 = vrot.slane %v1248_v35, 1 }
  0x8d   : > { %v4528_v22 = vld [vmem:[#allocation2 + $0x8c] ss:$0 sps:$4 sm:$0x11]  }
  0x8e   : > { %1319 = vrot.lane.b32.xlu1 %v5197_v39, %s4696_s13  ;;  %v1220_v49 = vsel %vm1112_vm10, %v1215_v44, %v1219_v59  ;;  %v1246_v59 = vshrl.u32 %v5286_v25, 16  ;;  %v1253_v54 = vshll.u32 %v4528_v22, 16  ;;  %v1372_v11 = vrot.slane %v4528_v22, 1  ;;  %v4582_v22 = vld [vmem:[#allocation2 + $0x18] sm:$0xff]  }
  0x90   : > { %1634 = vrot.lane.b32.xlu0 %v1361_v33, %s4698_s15  ;;  %v1251_v55 = vor.u32 %v1250_v48, %v1246_v59  ;;  %v1255_v56 = vrot.slane %v1253_v54, 1 }
  0x92   : > { %1400 = vrot.lane.b32.xlu1 %v1361_v33, %s4693_s10 }
  0x94   : > { %1398 = vrot.lane.b32.xlu0 %v5168_v37, %s4693_s10  ;;  %v344_v37 = vsel %vm4806_vm5, 0, %v343_v52 }
  0x95   : > { %345 = vst [vmem:[#allocation2 + $0xd4] sm:$0x1] %v344_v37 }
  0x96   : > { %1437 = vrot.lane.b32.xlu1 %v5205_v9, %s4694_s11 }
  0x98   : > { %1435 = vrot.lane.b32.xlu0 %v5139_v12, %s4694_s11 }
  0x9a   : > { %1484 = vrot.lane.b32.xlu1 %v1220_v49, %s4699_s16 }
  0x9c   : > { %1482 = vrot.lane.b32.xlu0 %v5197_v39, %s4699_s16  ;;  %v5271_v39 = vld [vmem:[#allocation2 + $0x78] sm:$0xff]  }
  0x9d   : > { %v1236_v13 = vshll.u32 %v5271_v39, 16  ;;  %v1234_v17 = vshrl.u32 %v5271_v39, 16 }
  0x9e   : > { %1519 = vrot.lane.b32.xlu1 %v1364_v42, %s4697_s14 }
  0x9f   : > { %v1387_v58 = vpop.permute.xlu1 %1386  ;;  %v1238_v10 = vrot.slane %v1236_v13, 1 }
  0xa0   : > { %1517 = vrot.lane.b32.xlu0 %v1361_v33, %s4697_s14  ;;  %v1368_v33 = vrot.slane %v5271_v39, 1 }
  0xa1   : > { %v1239_v23 = vor.u32 %v1238_v10, %v1234_v17 }
  0xa2   : > { %v1424_v62 = vpop.permute.xlu0 %1423  ;;  %1556 = vrot.lane.b32.xlu1 %v5238_v45, %s4695_s12  ;;  %v1370_v47 = vsel %vm1337_vm9, %v1368_v33, %v1369_v30  ;;  %v1374_v30 = vrot.slane %v5329_v4, 1 }
  0xa3   : > { %v1426_v63 = vpop.permute.xlu1 %1425  ;;  %v1244_v15 = vsel %vm1112_vm10, %v1239_v23, %v1243_v24 }
  0xa4   : > { %1554 = vrot.lane.b32.xlu0 %v5205_v9, %s4695_s12 }
  0xa6   : > { %v5267_v3 = vpop.permute.xlu0 %1542  ;;  %1603 = vrot.lane.b32.xlu1 %v5263_v0, %s4700_s17 }
  0xa8   : > { %1601 = vrot.lane.b32.xlu0 %v1220_v49, %s4700_s17  ;;  %v5274_v6 = vpop.permute.xlu1 %1544 }
  0xaa   : > { %v1306_v8 = vpop.permute.xlu0 %1305  ;;  %1321 = vrot.lane.b32.xlu1 %v1220_v49, %s4696_s13 }
  0xab   : > { %v1658_v27 = vsel %vm1656_vm12, %v4580_v26, %v1306_v8  ;;  %v1371_v8 = vrot.slane %v5286_v25, 1 }
  0xac   : > { %1636 = vrot.lane.b32.xlu0 %v1364_v42, %s4698_s15  ;;  %v1389_v57 = vpop.permute.xlu1 %1388  ;;  %v1691_v50 = vsel %vm1689_vm13, %v1658_v27, %v1387_v58 }
  0xad   : > { %v1724_v43 = vsel %vm1722_vm14, %v1691_v50, %v1424_v62  ;;  %v1373_v17 = vsel %vm1337_vm9, %v1371_v8, %v1372_v11 }
  0xae   : > { %v1506_v16 = vpop.permute.xlu0 %1505  ;;  %1323 = vrot.lane.b32.xlu1 %v5263_v0, %s4696_s13 }
  0xb0   : > { %1638 = vrot.lane.b32.xlu0 %v1367_v14, %s4698_s15  ;;  %v1508_v20 = vpop.permute.xlu1 %1507 }
  0xb2   : > { %v1625_v21 = vpop.permute.xlu0 %1624  ;;  %1404 = vrot.lane.b32.xlu1 %v1367_v14, %s4693_s10 }
  0xb4   : > { %1402 = vrot.lane.b32.xlu0 %v1364_v42, %s4693_s10  ;;  %v1473_v18 = vpop.permute.xlu1 %1472 }
  0xb6   : > { %v1308_v29 = vpop.permute.xlu0 %1307  ;;  %1441 = vrot.lane.b32.xlu1 %v5271_v39, %s4694_s11 }
  0xb7   : > { %v1660_v34 = vsel %vm1656_vm12, %v4581_v31, %v1308_v29 }
  0xb8   : > { %v1693_v38 = vsel %vm1689_vm13, %v1660_v34, %v1389_v57  ;;  %1439 = vrot.lane.b32.xlu0 %v5238_v45, %s4694_s11  ;;  %v1592_v2 = vpop.permute.xlu1 %1591  ;;  %v4530_v57 = vld [vmem:[#allocation2 + $0x98] ss:$0 sps:$4 sm:$0x11]   ;;  %v4532_v34 = vld [vmem:[#allocation2 + $0xa4] ss:$0 sps:$4 sm:$0x11]  }
  0xb9   : > { %v1726_v40 = vsel %vm1722_vm14, %v1693_v38, %v1426_v63  ;;  %v1375_v50 = vrot.slane %v4530_v57, 1  ;;  %v4583_v38 = vld [vmem:[#allocation2 + $0x24] sm:$0xff]  }
  0xba   : > { %v1759_v41 = vsel %vm1755_vm15, %v1726_v40, %v1473_v18  ;;  %v1471_v44 = vpop.permute.xlu0 %1470  ;;  %1488 = vrot.lane.b32.xlu1 %v1244_v15, %s4699_s16  ;;  %v5341_v18 = vld [vmem:[#allocation2 + $0x9c] sm:$0xff]  }
  0xbb   : > { %v1757_v46 = vsel %vm1755_vm15, %v1724_v43, %v1471_v44  ;;  %v1792_v49 = vsel %vm1788_vm1, %v1759_v41, %v1508_v20  ;;  %v1376_v59 = vsel %vm1337_vm9, %v1374_v30, %v1375_v50 }
  0xbc   : > { %v1790_v51 = vsel %vm1788_vm1, %v1757_v46, %v1506_v16  ;;  %1486 = vrot.lane.b32.xlu0 %v5263_v0, %s4699_s16  ;;  %v1310_v28 = vpop.permute.xlu1 %1309  ;;  %v1825_v42 = vsel %vm1821_vm2, %v1792_v49, %v5274_v6  ;;  %v1256_v0 = vsel %vm1112_vm10, %v1251_v55, %v1255_v56  ;;  %v1270_v46 = vshrl.u32 %v5341_v18, 16 }
  0xbd   : > { %v1823_v52 = vsel %vm1821_vm2, %v1790_v51, %v5267_v3  ;;  %v1858_v61 = vsel %vm1854_vm6, %v1825_v42, %v1592_v2  ;;  %v1662_v35 = vsel %vm1656_vm12, %v4582_v22, %v1310_v28  ;;  %v1277_v49 = vshll.u32 %v4532_v34, 16 }
  0xbe   : > { %v1590_v37 = vpop.permute.xlu0 %1589  ;;  %1523 = vrot.lane.b32.xlu1 %v1370_v47, %s4697_s14 }
  0xbf   : > { %v1856_v53 = vsel %vm1854_vm6, %v1823_v52, %v1590_v37 }
  0xc0   : > { %1521 = vrot.lane.b32.xlu0 %v1367_v14, %s4697_s14  ;;  %v1312_v58 = vpop.permute.xlu1 %1311  ;;  %v1889_v60 = vsel %vm6570_vm4, %v1856_v53, %v1625_v21  ;;  %v1260_v14 = vshll.u32 %v5329_v4, 16  ;;  %v1265_v21 = vshll.u32 %v4530_v57, 16 }
  0xc1   : > { %4382 = vmatprep.mubr.msk.bf16.mxu0 %vm6569_vm11, %v1889_v60  ;;  %v1664_v2 = vsel %vm1656_vm12, %v4583_v38, %v1312_v58  ;;  %v1279_v60 = vrot.slane %v1277_v49, 1 }
  0xc2   : > { %v1627_v62 = vpop.permute.xlu0 %1626  ;;  %1560 = vrot.lane.b32.xlu1 %v5286_v25, %s4695_s12  ;;  %v1262_v20 = vrot.slane %v1260_v14, 1  ;;  %v1267_v27 = vrot.slane %v1265_v21, 1  ;;  %v1377_v14 = vrot.slane %v5341_v18, 1 }
  0xc3   : > { %v1891_v63 = vsel %vm6570_vm4, %v1858_v61, %v1627_v62 }
  0xc4   : > { %1558 = vrot.lane.b32.xlu0 %v5271_v39, %s4695_s12  ;;  %4383 = vmatmul.mubr.msk.bf16.vlgmr.msra.gmra.mxu0 %vm6569_vm11, %v1891_v63  ;;  %v1393_v3 = vpop.permute.xlu1 %1392  ;;  %v1263_v26 = vor.u32 %v1262_v20, %v1258_v19 }
  0xc6   : > { %v1391_v6 = vpop.permute.xlu0 %1390  ;;  %1607 = vrot.lane.b32.xlu1 %v1256_v0, %s4700_s17  ;;  %v1268_v31 = vsel %vm1112_vm10, %v1263_v26, %v1267_v27 }
  0xc7   : > { %v1695_v41 = vsel %vm1689_vm13, %v1662_v35, %v1391_v6 }
  0xc8   : > { %1605 = vrot.lane.b32.xlu0 %v1244_v15, %s4700_s17  ;;  %v1430_v5 = vpop.permute.xlu1 %1429 }
  0xca   : > { %v1428_v13 = vpop.permute.xlu0 %1427  ;;  %1325 = vrot.lane.b32.xlu1 %v1244_v15, %s4696_s13  ;;  %v1272_v15 = vshll.u32 %v5341_v18, 16 }
  0xcb   : > { %v1728_v43 = vsel %vm1722_vm14, %v1695_v41, %v1428_v13  ;;  %v5381_v13 = vld [vmem:[#allocation2 + $0xa8] sm:$0xff]   ;;  %v4584_v41 = vld [vmem:[#allocation2 + $0x30] sm:$0xff]  }
  0xcc   : > { %1640 = vrot.lane.b32.xlu0 %v1370_v47, %s4698_s15  ;;  %v1477_v16 = vpop.permute.xlu1 %1476  ;;  %v1274_v54 = vrot.slane %v1272_v15, 1  ;;  %v1284_v19 = vshll.u32 %v5381_v13, 16  ;;  %v1380_v22 = vrot.slane %v5381_v13, 1 }
  0xce   : > { %v1475_v10 = vpop.permute.xlu0 %1474  ;;  %1327 = vrot.lane.b32.xlu1 %v1256_v0, %s4696_s13  ;;  %v1275_v58 = vor.u32 %v1274_v54, %v1270_v46  ;;  %v1286_v26 = vrot.slane %v1284_v19, 1 }
  0xcf   : > { %v1761_v48 = vsel %vm1755_vm15, %v1728_v43, %v1475_v10  ;;  %v4534_v10 = vld [vmem:[#allocation2 + $0xb0] ss:$0 sps:$4 sm:$0x11]  }
  0xd0   : > { %1642 = vrot.lane.b32.xlu0 %v1373_v17, %s4698_s15  ;;  %v1512_v23 = vpop.permute.xlu1 %1511  ;;  %v1289_v27 = vshll.u32 %v4534_v10, 16  ;;  %v1381_v35 = vrot.slane %v4534_v10, 1 }
  0xd2   : > { %v1510_v24 = vpop.permute.xlu0 %1509  ;;  %1408 = vrot.lane.b32.xlu1 %v1373_v17, %s4693_s10  ;;  %v1291_v50 = vrot.slane %v1289_v27, 1  ;;  %v5411_v49 = vsel %vm1337_vm9, %v1380_v22, %v1381_v35  ;;  %v407_v27 = vld [vmem:[#allocation3 + $0x8] sm:$0x1]  ;;  %v4538_v22 = vld [vmem:[#allocation2 + $0xc8] ss:$0 sps:$4 sm:$0x11]  }
  0xd3   : > { %v1794_v51 = vsel %vm1788_vm1, %v1761_v48, %v1510_v24  ;;  %v1282_v24 = vshrl.u32 %v5381_v13, 16 }
  0xd4   : > { %1406 = vrot.lane.b32.xlu0 %v1370_v47, %s4693_s10  ;;  %v1549_v29 = vpop.permute.xlu1 %1548  ;;  %v1697_v47 = vsel %vm1689_vm13, %v1664_v2, %v1393_v3  ;;  %v5400_v2 = vld [vmem:[#allocation2 + $0xbc] ss:$0 sps:$4 sm:$0x11]  }
  0xd5   : > { %v1730_v37 = vsel %vm1722_vm14, %v1697_v47, %v1430_v5  ;;  %v1280_v5 = vsel %vm1112_vm10, %v1275_v58, %v1279_v60  ;;  %v1287_v30 = vor.u32 %v1286_v26, %v1282_v24 }
  0xd6   : > { %v1547_v33 = vpop.permute.xlu0 %1546  ;;  %1445 = vrot.lane.b32.xlu1 %v5329_v4, %s4694_s11  ;;  %v1763_v55 = vsel %vm1755_vm15, %v1730_v37, %v1477_v16  ;;  %v1378_v16 = vrot.slane %v4532_v34, 1 }
  0xd7   : > { %v1827_v52 = vsel %vm1821_vm2, %v1794_v51, %v1547_v33  ;;  %v1796_v61 = vsel %vm1788_vm1, %v1763_v55, %v1512_v23  ;;  %v1292_v38 = vsel %vm1112_vm10, %v1287_v30, %v1291_v50  ;;  %v356_v30 = vld [vmem:[#allocation3 + $0xc] sm:$0x1]  ;;  %v408_v50 = vsel %vm4806_vm5, 0, %v407_v27 }
  0xd8   : > { %1443 = vrot.lane.b32.xlu0 %v5286_v25, %s4694_s11  ;;  %v1596_v40 = vpop.permute.xlu1 %1595  ;;  %v1829_v63 = vsel %vm1821_vm2, %v1796_v61, %v1549_v29  ;;  %v1379_v21 = vsel %vm1337_vm9, %v1377_v14, %v1378_v16  ;;  %409 = vst [vmem:[#allocation3 + $0x8] sm:$0x1] %v408_v50 }
  0xda   : > { %v1594_v44 = vpop.permute.xlu0 %1593  ;;  %1492 = vrot.lane.b32.xlu1 %v1268_v31, %s4699_s16 }
  0xdb   : > { %v1860_v42 = vsel %vm1854_vm6, %v1827_v52, %v1594_v44  ;;  %v4585_v44 = vld [vmem:[#allocation2 + $0x3c] sm:$0xff]  }
  0xdc   : > { %1490 = vrot.lane.b32.xlu0 %v1256_v0, %s4699_s16  ;;  %v1314_v28 = vpop.permute.xlu1 %1313  ;;  %v1862_v0 = vsel %vm1854_vm6, %v1829_v63, %v1596_v40 }
  0xdd   : > { %v1666_v43 = vsel %vm1656_vm12, %v4584_v41, %v1314_v28 }
  0xde   : > { %v1629_v53 = vpop.permute.xlu0 %1628  ;;  %1527 = vrot.lane.b32.xlu1 %v1376_v59, %s4697_s14 }
  0xdf   : > { %v1893_v56 = vsel %vm6570_vm4, %v1860_v42, %v1629_v53  ;;  %v1301_v42 = vshll.u32 %v5400_v2, 16 }
  0xe0   : > { %1525 = vrot.lane.b32.xlu0 %v1373_v17, %s4697_s14  ;;  %4386 = vmatprep.mubr.msk.bf16.mxu0 %vm6569_vm11, %v1893_v56  ;;  %v1316_v62 = vpop.permute.xlu1 %1315 }
  0xe2   : > { %v1631_v3 = vpop.permute.xlu0 %1630  ;;  %1564 = vrot.lane.b32.xlu1 %v5341_v18, %s4695_s12 }
  0xe3   : > { %v1895_v6 = vsel %vm6570_vm4, %v1862_v0, %v1631_v3  ;;  %v1303_v3 = vrot.slane %v1301_v42, 1 }
  0xe4   : > { %1562 = vrot.lane.b32.xlu0 %v5329_v4, %s4695_s12  ;;  %4387 = vmatmul.mubr.msk.bf16.gmra.mxu0 %vm6569_vm11, %v1895_v6  ;;  %v1397_v8 = vpop.permute.xlu1 %1396 }
  0xe6   : > { %v1395_v11 = vpop.permute.xlu0 %1394  ;;  %1611 = vrot.lane.b32.xlu1 %v1280_v5, %s4700_s17 }
  0xe7   : > { %v1699_v47 = vsel %vm1689_vm13, %v1666_v43, %v1395_v11 }
  0xe8   : > { %1609 = vrot.lane.b32.xlu0 %v1268_v31, %s4700_s17  ;;  %v1434_v57 = vpop.permute.xlu1 %1433 }
  0xea   : > { %v1432_v17 = vpop.permute.xlu0 %1431  ;;  %1329 = vrot.lane.b32.xlu1 %v1268_v31, %s4696_s13  ;;  %v5393_v31 = vld [vmem:[#allocation2 + $0xb4] sm:$0xff]  }
  0xeb   : > { %v1296_v40 = vshll.u32 %v5393_v31, 16  ;;  %v1732_v48 = vsel %vm1722_vm14, %v1699_v47, %v1432_v17  ;;  %v1294_v51 = vshrl.u32 %v5393_v31, 16  ;;  %v359_v17 = vld [vmem:[#allocation3 + $0x18] sm:$0x1]  ;;  %v1466_v47 = vshll.u32 %v4538_v22, 16 }
  0xec   : > { %1644 = vrot.lane.b32.xlu0 %v1376_v59, %s4698_s15  ;;  %v1481_v20 = vpop.permute.xlu1 %1480  ;;  %v360_v19 = vsel %vm4785_vm3, 0, %v359_v17 }
  0xed   : > { %v1298_v37 = vrot.slane %v1296_v40, 1  ;;  %361 = vst [vmem:[#allocation3 + $0x18] sm:$0x1] %v360_v19  ;;  %v413_v40 = vld [vmem:[#allocation3 + $0x20] sm:$0x1] }
  0xee   : > { %v1479_v23 = vpop.permute.xlu0 %1478  ;;  %1331 = vrot.lane.b32.xlu1 %v1280_v5, %s4696_s13  ;;  %v414_v41 = vsel %vm4806_vm5, 0, %v413_v40 }
  0xef   : > { %v1765_v52 = vsel %vm1755_vm15, %v1732_v48, %v1479_v23  ;;  %v1299_v0 = vor.u32 %v1298_v37, %v1294_v51  ;;  %v5450_v23 = vld [vmem:[#allocation2 + $0xc0] sm:$0xff]   ;;  %415 = vst [vmem:[#allocation3 + $0x20] sm:$0x1] %v414_v41  ;;  %v5477_v37 = vld [vmem:[#allocation2 + $0xcc] sm:$0xff]  }
  0xf0   : > { %1646 = vrot.lane.b32.xlu0 %v1379_v21, %s4698_s15  ;;  %v1516_v29 = vpop.permute.xlu1 %1515  ;;  %v1461_v35 = vshll.u32 %v5450_v23, 16 }
  0xf1   : > { %v5439_v16 = vsel %vm1112_vm10, %v1299_v0, %v1303_v3 }
  0xf2   : > { %v1514_v33 = vpop.permute.xlu0 %1513  ;;  %1412 = vrot.lane.b32.xlu1 %v1379_v21, %s4693_s10 }
  0xf3   : > { %v1798_v53 = vsel %vm1788_vm1, %v1765_v52, %v1514_v33  ;;  %v1384_v33 = vrot.slane %v5400_v2, 1  ;;  %v1468_v52 = vrot.slane %v1466_v47, 1 }
  0xf4   : > { %1410 = vrot.lane.b32.xlu0 %v1376_v59, %s4693_s10  ;;  %v1553_v34 = vpop.permute.xlu1 %1552  ;;  %v1668_v59 = vsel %vm1656_vm12, %v4585_v44, %v1316_v62  ;;  %v410_v44 = vld [vmem:[#allocation3 + $0x14] sm:$0x1] }
  0xf5   : > { %v1701_v28 = vsel %vm1689_vm13, %v1668_v59, %v1397_v8  ;;  %v1459_v59 = vshrl.u32 %v5450_v23, 16  ;;  %v411_v48 = vsel %vm4806_vm5, 0, %v410_v44  ;;  %v1621_v44 = vrot.slane %v5477_v37, 1 }
  0xf6   : > { %v1551_v15 = vpop.permute.xlu0 %1550  ;;  %1449 = vrot.lane.b32.xlu1 %v5381_v13, %s4694_s11  ;;  %v1734_v58 = vsel %vm1722_vm14, %v1701_v28, %v1434_v57  ;;  %412 = vst [vmem:[#allocation3 + $0x14] sm:$0x1] %v411_v48 }
  0xf7   : > { %v1831_v56 = vsel %vm1821_vm2, %v1798_v53, %v1551_v15  ;;  %v1767_v62 = vsel %vm1755_vm15, %v1734_v58, %v1481_v20  ;;  %v357_v15 = vsel %vm4785_vm3, 0, %v356_v30  ;;  %v1503_v58 = vrot.slane %v4538_v22, 1  ;;  %v4542_v22 = vld [vmem:[#allocation3 + $0x8] ss:$0 sps:$4 sm:$0x11]  }
  0xf8   : > { %1447 = vrot.lane.b32.xlu0 %v5341_v18, %s4694_s11  ;;  %v1600_v46 = vpop.permute.xlu1 %1599  ;;  %v1800_v6 = vsel %vm1788_vm1, %v1767_v62, %v1516_v29  ;;  %v1383_v29 = vrot.slane %v5393_v31, 1  ;;  %358 = vst [vmem:[#allocation3 + $0xc] sm:$0x1] %v357_v15  ;;  %v1580_v62 = vshll.u32 %v5477_v37, 16 }
  0xf9   : > { %v1833_v8 = vsel %vm1821_vm2, %v1800_v6, %v1553_v34 }
  0xfa   : > { %v1598_v54 = vpop.permute.xlu0 %1597  ;;  %1496 = vrot.lane.b32.xlu1 %v1292_v38, %s4699_s16  ;;  %v1866_v11 = vsel %vm1854_vm6, %v1833_v8, %v1600_v46  ;;  %v1385_v43 = vsel %vm1337_vm9, %v1383_v29, %v1384_v33  ;;  %v1463_v46 = vrot.slane %v1461_v35, 1 }
  0xfb   : > { %v1864_v60 = vsel %vm1854_vm6, %v1831_v56, %v1598_v54  ;;  %v1502_v56 = vrot.slane %v5450_v23, 1 }
  0xfc   : > { %1494 = vrot.lane.b32.xlu0 %v1280_v5, %s4699_s16  ;;  %v5419_v55 = vpop.permute.xlu1 %1317  ;;  %v1464_v28 = vor.u32 %v1463_v46, %v1459_v59  ;;  %v365_v59 = vld [vmem:[#allocation3 + $0x30] sm:$0x1] }
  0xfd   : > { %v366_v47 = vsel %vm4785_vm3, 0, %v365_v59 }
  0xfe   : > { %v1633_v61 = vpop.permute.xlu0 %1632  ;;  %1531 = vrot.lane.b32.xlu1 %v5411_v49, %s4697_s14  ;;  %367 = vst [vmem:[#allocation3 + $0x30] sm:$0x1] %v366_v47  ;;  %v368_v47 = vld [vmem:[#allocation3 + $0x3c] sm:$0x1] }
  0xff   : > { %v1897_v63 = vsel %vm6570_vm4, %v1864_v60, %v1633_v61  ;;  %v1469_v60 = vsel %vm1112_vm10, %v1464_v28, %v1468_v52  ;;  %v4540_v61 = vld [vmem:[#allocation2 + $0xd4] ss:$0 sps:$4 sm:$0x11]  }
 0x100   : > { %1529 = vrot.lane.b32.xlu0 %v1379_v21, %s4697_s14  ;;  %4390 = vmatprep.mubr.msk.bf16.mxu0 %vm6569_vm11, %v1897_v63  ;;  %v5431_v5 = vpop.permute.xlu1 %1319  ;;  %v353_v21 = vld [vmem:[#allocation3] sm:$0x1]  ;;  %v4586_v63 = vld [vmem:[#allocation2 + $0x48] sm:$0xff]   ;;  %v1585_v17 = vshll.u32 %v4540_v61, 16 }
 0x101   : > { %v354_v24 = vsel %vm4785_vm3, 0, %v353_v21  ;;  %v1670_v0 = vsel %vm1656_vm12, %v4586_v63, %v5419_v55 }
 0x102   : > { %v1635_v57 = vpop.permute.xlu0 %1634  ;;  %1568 = vrot.lane.b32.xlu1 %v5393_v31, %s4695_s12  ;;  %355 = vst [vmem:[#allocation3] sm:$0x1] %v354_v24 }
 0x103   : > { %v1899_v14 = vsel %vm6570_vm4, %v1866_v11, %v1635_v57  ;;  %v1504_v57 = vsel %vm1337_vm9, %v1502_v56, %v1503_v58  ;;  %v362_v56 = vld [vmem:[#allocation3 + $0x24] sm:$0x1] }
 0x104   : > { %1566 = vrot.lane.b32.xlu0 %v5381_v13, %s4695_s12  ;;  %4391 = vmatmul.mubr.msk.bf16.gmra.mxu0 %vm6569_vm11, %v1899_v14  ;;  %v5444_v10 = vpop.permute.xlu1 %1400  ;;  %v1578_v14 = vshrl.u32 %v5477_v37, 16  ;;  %v363_v58 = vsel %vm4785_vm3, 0, %v362_v56 }
 0x105   : > { %364 = vst [vmem:[#allocation3 + $0x24] sm:$0x1] %v363_v58 }
 0x106   : > { %v1399_v20 = vpop.permute.xlu0 %1398  ;;  %1615 = vrot.lane.b32.xlu1 %v5439_v16, %s4700_s17 }
 0x107   : > { %v1703_v6 = vsel %vm1689_vm13, %v1670_v0, %v1399_v20  ;;  %v3113_v0 = vrot.slane %v4542_v22, 1 }
 0x108   : > { %1613 = vrot.lane.b32.xlu0 %v1292_v38, %s4700_s17  ;;  %v5455_v26 = vpop.permute.xlu1 %1437 }
 0x109   : > { %v4541_v24 = vld [vmem:[#allocation3] sm:$0xff]  }
 0x10a   : > { %v1436_v34 = vpop.permute.xlu0 %1435  ;;  %1333 = vrot.lane.b32.xlu1 %v1292_v38, %s4696_s13  ;;  %v2891_v35 = vshll.u32 %v4541_v24, 16  ;;  %v2889_v48 = vshrl.u32 %v4541_v24, 16  ;;  %v3112_v63 = vrot.slane %v4541_v24, 1 }
 0x10b   : > { %v1736_v8 = vsel %vm1722_vm14, %v1703_v6, %v1436_v34  ;;  %v1587_v34 = vrot.slane %v1585_v17, 1  ;;  %v416_v6 = vld [vmem:[#allocation3 + $0x2c] sm:$0x1] }
 0x10c   : > { %1648 = vrot.lane.b32.xlu0 %v5411_v49, %s4698_s15  ;;  %v1485_v2 = vpop.permute.xlu1 %1484 }
 0x10e   : > { %v1483_v38 = vpop.permute.xlu0 %1482  ;;  %1335 = vrot.lane.b32.xlu1 %v5439_v16, %s4696_s13 }
 0x110   : > { %1650 = vrot.lane.b32.xlu0 %v1385_v43, %s4698_s15  ;;  %v1520_v54 = vpop.permute.xlu1 %1519 }
 0x112   : > { %v1518_v51 = vpop.permute.xlu0 %1517  ;;  %1416 = vrot.lane.b32.xlu1 %v1385_v43, %s4693_s10 }
 0x114   : > { %1414 = vrot.lane.b32.xlu0 %v5411_v49, %s4693_s10  ;;  %v1557_v42 = vpop.permute.xlu1 %1556  ;;  %v1672_v49 = vsel %vm1656_vm12, %v5139_v12, %v5431_v5  ;;  %v1769_v12 = vsel %vm1755_vm15, %v1736_v8, %v1483_v38  ;;  %v1582_v5 = vrot.slane %v1580_v62, 1 }
 0x115   : > { %v1705_v55 = vsel %vm1689_vm13, %v1672_v49, %v5444_v10  ;;  %v1802_v19 = vsel %vm1788_vm1, %v1769_v12, %v1518_v51  ;;  %v2896_v51 = vshll.u32 %v4542_v22, 16  ;;  %v419_v49 = vld [vmem:[#allocation3 + $0x38] sm:$0x1] }
 0x116   : > { %v1555_v53 = vpop.permute.xlu0 %1554  ;;  %1453 = vrot.lane.b32.xlu1 %v5450_v23, %s4694_s11  ;;  %v1738_v27 = vsel %vm1722_vm14, %v1705_v55, %v5455_v26  ;;  %v1583_v50 = vor.u32 %v1582_v5, %v1578_v14 }
 0x117   : > { %v1835_v21 = vsel %vm1821_vm2, %v1802_v19, %v1555_v53  ;;  %v1771_v33 = vsel %vm1755_vm15, %v1738_v27, %v1485_v2 }
 0x118   : > { %1451 = vrot.lane.b32.xlu0 %v5393_v31, %s4694_s11  ;;  %v1604_v3 = vpop.permute.xlu1 %1603  ;;  %v1588_v38 = vsel %vm1112_vm10, %v1583_v50, %v1587_v34 }
 0x11a   : > { %v1602_v11 = vpop.permute.xlu0 %1601  ;;  %1500 = vrot.lane.b32.xlu1 %v1469_v60, %s4699_s16 }
 0x11b   : > { %v1868_v29 = vsel %vm1854_vm6, %v1835_v21, %v1602_v11  ;;  %v417_v11 = vsel %vm4806_vm5, 0, %v416_v6 }
 0x11c   : > { %1498 = vrot.lane.b32.xlu0 %v5439_v16, %s4699_s16  ;;  %v5504_v20 = vpop.permute.xlu1 %1321  ;;  %v1804_v16 = vsel %vm1788_vm1, %v1771_v33, %v1520_v54  ;;  %v2893_v54 = vrot.slane %v2891_v35, 1  ;;  %418 = vst [vmem:[#allocation3 + $0x2c] sm:$0x1] %v417_v11 }
 0x11d   : > { %v1837_v26 = vsel %vm1821_vm2, %v1804_v16, %v1557_v42  ;;  %v1674_v5 = vsel %vm1656_vm12, %v5205_v9, %v5504_v20 }
 0x11e   : > { %v1637_v10 = vpop.permute.xlu0 %1636  ;;  %1535 = vrot.lane.b32.xlu1 %v1504_v57, %s4697_s14  ;;  %v1870_v40 = vsel %vm1854_vm6, %v1837_v26, %v1604_v3  ;;  %v2894_v42 = vor.u32 %v2893_v54, %v2889_v48  ;;  %v420_v3 = vsel %vm4806_vm5, 0, %v419_v49  ;;  %v369_v54 = vsel %vm4785_vm3, 0, %v368_v47 }
 0x11f   : > { %v1901_v30 = vsel %vm6570_vm4, %v1868_v29, %v1637_v10  ;;  %421 = vst [vmem:[#allocation3 + $0x38] sm:$0x1] %v420_v3  ;;  %370 = vst [vmem:[#allocation3 + $0x3c] sm:$0x1] %v369_v54 }
 0x120   : > { %1533 = vrot.lane.b32.xlu0 %v1385_v43, %s4697_s14  ;;  %4394 = vmatprep.mubr.msk.bf16.mxu0 %vm6569_vm11, %v1901_v30  ;;  %v1324_v15 = vpop.permute.xlu1 %1323  ;;  %v1622_v43 = vrot.slane %v4540_v61, 1 }
 0x121   : > { %v1676_v17 = vsel %vm1656_vm12, %v5238_v45, %v1324_v15 }
 0x122   : > { %v1639_v41 = vpop.permute.xlu0 %1638  ;;  %1572 = vrot.lane.b32.xlu1 %v5477_v37, %s4695_s12  ;;  %v1623_v52 = vsel %vm1337_vm9, %v1621_v44, %v1622_v43 }
 0x123   : > { %v1903_v2 = vsel %vm6570_vm4, %v1870_v40, %v1639_v41 }
 0x124   : > { %1570 = vrot.lane.b32.xlu0 %v5450_v23, %s4695_s12  ;;  %4395 = vmatmul.mubr.msk.bf16.gmra.mxu0 %vm6569_vm11, %v1903_v2  ;;  %v1405_v46 = vpop.permute.xlu1 %1404  ;;  %v2898_v23 = vrot.slane %v2896_v51, 1  ;;  %v371_v2 = vld [vmem:[#allocation3 + $0x48] sm:$0x1]  ;;  %v425_v51 = vld [vmem:[#allocation3 + $0x50] sm:$0x1] }
 0x125   : > { %v1709_v29 = vsel %vm1689_vm13, %v1676_v17, %v1405_v46  ;;  %v372_v44 = vsel %vm4785_vm3, 0, %v371_v2 }
 0x126   : > { %v1403_v28 = vpop.permute.xlu0 %1402  ;;  %1619 = vrot.lane.b32.xlu1 %v1588_v38, %s4700_s17  ;;  %v2899_v62 = vsel %vm1112_vm10, %v2894_v42, %v2898_v23  ;;  %373 = vst [vmem:[#allocation3 + $0x48] sm:$0x1] %v372_v44 }
 0x127   : > { %v1707_v21 = vsel %vm1689_vm13, %v1674_v5, %v1403_v28 }
 0x128   : > { %1617 = vrot.lane.b32.xlu0 %v1469_v60, %s4700_s17  ;;  %v1442_v37 = vpop.permute.xlu1 %1441 }
 0x129   : > { %v1742_v9 = vsel %vm1722_vm14, %v1709_v29, %v1442_v37  ;;  %v422_v37 = vld [vmem:[#allocation3 + $0x44] sm:$0x1]  ;;  %v377_v29 = vld [vmem:[#allocation3 + $0x60] sm:$0x1] }
 0x12a   : > { %v1440_v53 = vpop.permute.xlu0 %1439  ;;  %1654 = vrot.lane.b32.xlu1 %v1623_v52, %s4698_s15  ;;  %v426_v52 = vsel %vm4806_vm5, 0, %v425_v51  ;;  %v423_v23 = vsel %vm4806_vm5, 0, %v422_v37 }
 0x12b   : > { %v1740_v24 = vsel %vm1722_vm14, %v1707_v21, %v1440_v53  ;;  %427 = vst [vmem:[#allocation3 + $0x50] sm:$0x1] %v426_v52  ;;  %424 = vst [vmem:[#allocation3 + $0x44] sm:$0x1] %v423_v23 }
 0x12c   : > { %1652 = vrot.lane.b32.xlu0 %v1504_v57, %s4698_s15  ;;  %v1489_v61 = vpop.permute.xlu1 %1488  ;;  %v3114_v57 = vsel %vm1337_vm9, %v3112_v63, %v3113_v0 }
 0x12d   : > { %v1775_v34 = vsel %vm1755_vm15, %v1742_v9, %v1489_v61 }
 0x12e   : > { %v1487_v60 = vpop.permute.xlu0 %1486 }
 0x12f   : > { %v1773_v10 = vsel %vm1755_vm15, %v1740_v24, %v1487_v60 }
 0x130   : > { %v1524_v8 = vpop.permute.xlu1 %1523  ;;  %3080 = vrot.lane.b32.xlu0 %v2899_v62, %s4696_s13 }
 0x131   : > { %v1808_v15 = vsel %vm1788_vm1, %v1775_v34, %v1524_v8 }
 0x132   : > { %v1522_v14 = vpop.permute.xlu0 %1521 }
 0x133   : > { %v1806_v33 = vsel %vm1788_vm1, %v1773_v10, %v1522_v14 }
 0x134   : > { %v1561_v55 = vpop.permute.xlu1 %1560  ;;  %3160 = vrot.lane.b32.xlu0 %v3114_v57, %s4693_s10 }
 0x135   : > { %v1841_v22 = vsel %vm1821_vm2, %v1808_v15, %v1561_v55 }
 0x136   : > { %v1559_v12 = vpop.permute.xlu0 %1558 }
 0x137   : > { %v1839_v50 = vsel %vm1821_vm2, %v1806_v33, %v1559_v12  ;;  %v378_v33 = vsel %vm4785_vm3, 0, %v377_v29 }
 0x138   : > { %v1608_v19 = vpop.permute.xlu1 %1607  ;;  %379 = vst [vmem:[#allocation3 + $0x60] sm:$0x1] %v378_v33  ;;  %v380_v33 = vld [vmem:[#allocation3 + $0x6c] sm:$0x1] }
 0x139   : > { %v1874_v35 = vsel %vm1854_vm6, %v1841_v22, %v1608_v19  ;;  %v428_v22 = vld [vmem:[#allocation3 + $0x5c] sm:$0x1] }
 0x13a   : > { %v1606_v27 = vpop.permute.xlu0 %1605 }
 0x13b   : > { %v1872_v20 = vsel %vm1854_vm6, %v1839_v50, %v1606_v27 }
 0x13c   : > { %v1326_v30 = vpop.permute.xlu1 %1325 }
 0x13d   : > { %v1678_v61 = vsel %vm1656_vm12, %v5271_v39, %v1326_v30 }
 0x13e   : > { %v1641_v45 = vpop.permute.xlu0 %1640 }
 0x13f   : > { %v1905_v16 = vsel %vm6570_vm4, %v1872_v20, %v1641_v45  ;;  %v374_v20 = vld [vmem:[#allocation3 + $0x54] sm:$0x1] }
 0x140   : > { %4398 = vmatprep.mubr.msk.bf16.mxu0 %vm6569_vm11, %v1905_v16  ;;  %v1328_v26 = vpop.permute.xlu1 %1327  ;;  %v375_v34 = vsel %vm4785_vm3, 0, %v374_v20  ;;  %v431_v16 = vld [vmem:[#allocation3 + $0x68] sm:$0x1] }
 0x141   : > { %v1680_v62 = vsel %vm1656_vm12, %v5286_v25, %v1328_v26  ;;  %376 = vst [vmem:[#allocation3 + $0x54] sm:$0x1] %v375_v34  ;;  %v432_v26 = vsel %vm4806_vm5, 0, %v431_v16 }
 0x142   : > { %v1643_v40 = vpop.permute.xlu0 %1642  ;;  %433 = vst [vmem:[#allocation3 + $0x68] sm:$0x1] %v432_v26  ;;  %v2601_v26 = vld [vmem:[#allocation3 + $0x18] sm:$0xf] }
 0x143   : > { %v1907_v41 = vsel %vm6570_vm4, %v1874_v35, %v1643_v40  ;;  %v429_v40 = vsel %vm4806_vm5, 0, %v428_v22 }
 0x144   : > { %4399 = vmatmul.mubr.msk.bf16.gmra.mxu0 %vm6569_vm11, %v1907_v41  ;;  %v1409_v38 = vpop.permute.xlu1 %1408  ;;  %430 = vst [vmem:[#allocation3 + $0x5c] sm:$0x1] %v429_v40 }
 0x145   : > { %v1713_v3 = vsel %vm1689_vm13, %v1680_v62, %v1409_v38 }
 0x146   : > { %v1407_v43 = vpop.permute.xlu0 %1406 }
 0x147   : > { %v1711_v0 = vsel %vm1689_vm13, %v1678_v61, %v1407_v43 }
 0x148   : > { %v1446_v59 = vpop.permute.xlu1 %1445 }
 0x149   : > { %v1746_v39 = vsel %vm1722_vm14, %v1713_v3, %v1446_v59 }
 0x14a   : > { %v1444_v46 = vpop.permute.xlu0 %1443 }
 0x14b   : > { %v1744_v49 = vsel %vm1722_vm14, %v1711_v0, %v1444_v46  ;;  %v5625_v0 = vld [vmem:[%s6564_s2] ss:$0 sm:$0xff] }
 0x14c   : > { %v1493_v48 = vpop.permute.xlu1 %1492 }
 0x14d   : > { %v1779_v55 = vsel %vm1755_vm15, %v1746_v39, %v1493_v48 }
 0x14e   : > { %v1491_v28 = vpop.permute.xlu0 %1490 }
 0x14f   : > { %v1777_v6 = vsel %vm1755_vm15, %v1744_v49, %v1491_v28 }
 0x150   : > { %v1528_v42 = vpop.permute.xlu1 %1527 }
 0x151   : > { %v1812_v5 = vsel %vm1788_vm1, %v1779_v55, %v1528_v42 }
 0x152   : > { %v1526_v53 = vpop.permute.xlu0 %1525 }
 0x153   : > { %v1810_v8 = vsel %vm1788_vm1, %v1777_v6, %v1526_v53 }
 0x154   : > { %v1565_v56 = vpop.permute.xlu1 %1564 }
 0x155   : > { %v1845_v19 = vsel %vm1821_vm2, %v1812_v5, %v1565_v56 }
 0x156   : > { %v1563_v58 = vpop.permute.xlu0 %1562 }
 0x157   : > { %v1843_v57 = vsel %vm1821_vm2, %v1810_v8, %v1563_v58 }
 0x158   : > { %v1612_v63 = vpop.permute.xlu1 %1611 }
 0x159   : > { %v1878_v21 = vsel %vm1854_vm6, %v1845_v19, %v1612_v63 }
 0x15a   : > { %v1610_v60 = vpop.permute.xlu0 %1609 }
 0x15b   : > { %v1876_v14 = vsel %vm1854_vm6, %v1843_v57, %v1610_v60  ;;  %v383_v60 = vld [vmem:[#allocation3 + $0x78] sm:$0x1] }
 0x15c   : > { %v1330_v11 = vpop.permute.xlu1 %1329  ;;  %v384_v8 = vsel %vm4785_vm3, 0, %v383_v60 }
 0x15d   : > { %v1682_v44 = vsel %vm1656_vm12, %v5329_v4, %v1330_v11  ;;  %385 = vst [vmem:[#allocation3 + $0x78] sm:$0x1] %v384_v8 }
 0x15e   : > { %v1645_v25 = vpop.permute.xlu0 %1644 }
 0x15f   : > { %v1909_v12 = vsel %vm6570_vm4, %v1876_v14, %v1645_v25 }
 0x160   : > { %4402 = vmatprep.mubr.msk.bf16.mxu0 %vm6569_vm11, %v1909_v12  ;;  %v1332_v17 = vpop.permute.xlu1 %1331 }
 0x161   : > { %v1684_v43 = vsel %vm1656_vm12, %v5341_v18, %v1332_v17 }
 0x162   : > { %v1647_v24 = vpop.permute.xlu0 %1646 }
 0x163   : > { %v1911_v27 = vsel %vm6570_vm4, %v1878_v21, %v1647_v24 }
 0x164   : > { %4403 = vmatmul.mubr.msk.bf16.gmra.mxu0 %vm6569_vm11, %v1911_v27  ;;  %v1413_v10 = vpop.permute.xlu1 %1412 }
 0x165   : > { %v1717_v54 = vsel %vm1689_vm13, %v1684_v43, %v1413_v10  ;;  %v2594_v43 = vld [vmem:[#allocation3 + $0xc] sm:$0xf] }
 0x166   : > { %v1411_v30 = vpop.permute.xlu0 %1410 }
 0x167   : > { %v1715_v46 = vsel %vm1689_vm13, %v1682_v44, %v1411_v30 }
 0x168   : > { %v1450_v50 = vpop.permute.xlu1 %1449 }
 0x169   : > { %v1750_v4 = vsel %vm1722_vm14, %v1717_v54, %v1450_v50 }
 0x16a   : > { %v1448_v9 = vpop.permute.xlu0 %1447 }
 0x16b   : > { %v1748_v47 = vsel %vm1722_vm14, %v1715_v46, %v1448_v9  ;;  %v381_v9 = vsel %vm4785_vm3, 0, %v380_v33 }
 0x16c   : > { %v1497_v45 = vpop.permute.xlu1 %1496  ;;  %382 = vst [vmem:[#allocation3 + $0x6c] sm:$0x1] %v381_v9 }
 0x16d   : > { %v1783_v23 = vsel %vm1755_vm15, %v1750_v4, %v1497_v45 }
 0x16e   : > { %v1495_v15 = vpop.permute.xlu0 %1494 }
 0x16f   : > { %v1781_v51 = vsel %vm1755_vm15, %v1748_v47, %v1495_v15  ;;  %v437_v15 = vld [vmem:[#allocation3 + $0x80] sm:$0x1]  ;;  %v434_v47 = vld [vmem:[#allocation3 + $0x74] sm:$0x1] }
 0x170   : > { %v1532_v35 = vpop.permute.xlu1 %1531  ;;  %v438_v40 = vsel %vm4806_vm5, 0, %v437_v15 }
 0x171   : > { %v1816_v56 = vsel %vm1788_vm1, %v1783_v23, %v1532_v35  ;;  %439 = vst [vmem:[#allocation3 + $0x80] sm:$0x1] %v438_v40 }
 0x172   : > { %v1530_v41 = vpop.permute.xlu0 %1529 }
 0x173   : > { %v1814_v28 = vsel %vm1788_vm1, %v1781_v51, %v1530_v41 }
 0x174   : > { %v1569_v2 = vpop.permute.xlu1 %1568 }
 0x175   : > { %v1849_v61 = vsel %vm1821_vm2, %v1816_v56, %v1569_v2 }
 0x176   : > { %v1567_v38 = vpop.permute.xlu0 %1566 }
 0x177   : > { %v1847_v37 = vsel %vm1821_vm2, %v1814_v28, %v1567_v38 }
 0x178   : > { %v1616_v59 = vpop.permute.xlu1 %1615 }
 0x179   : > { %v1882_v62 = vsel %vm1854_vm6, %v1849_v61, %v1616_v59 }
 0x17a   : > { %v1614_v48 = vpop.permute.xlu0 %1613 }
 0x17b   : > { %v1880_v18 = vsel %vm1854_vm6, %v1847_v37, %v1614_v48  ;;  %v2605_v37 = vld [vmem:[#allocation3 + $0x20] sm:$0x1] }
 0x17c   : > { %v5609_v52 = vpop.permute.xlu1 %1333 }
 0x17e   : > { %v1649_v42 = vpop.permute.xlu0 %1648 }
 0x17f   : > { %v1913_v53 = vsel %vm6570_vm4, %v1880_v18, %v1649_v42  ;;  %v435_v42 = vsel %vm4806_vm5, 0, %v434_v47 }
 0x180   : > { %4406 = vmatprep.mubr.msk.bf16.mxu0 %vm6569_vm11, %v1913_v53  ;;  %v5618_v58 = vpop.permute.xlu1 %1335  ;;  %436 = vst [vmem:[#allocation3 + $0x74] sm:$0x1] %v435_v42 }
 0x181   : > { %v1688_v60 = vsel %vm1656_vm12, %v5393_v31, %v5618_v58 }
 0x182   : > { %v1651_v63 = vpop.permute.xlu0 %1650 }
 0x183   : > { %v1915_v49 = vsel %vm6570_vm4, %v1882_v62, %v1651_v63 }
 0x184   : > { %v4384_v3 = vpop.f32.mrf.mxu0  ;;  %4407 = vmatmul.mubr.msk.bf16.gmra.mxu0 %vm6569_vm11, %v1915_v49  ;;  %v5629_v6 = vpop.permute.xlu1 %1416 }
 0x185   : > { %v2027_v11 = vadd.f32 %v4384_v3, %v5625_v0  ;;  %v1721_v31 = vsel %vm1689_vm13, %v1688_v60, %v5629_v6 }
 0x186   : > { %v2018_v57 = vpop.f32.mrf.mxu0  ;;  %v5634_v39 = vpop.permute.xlu0 %1414 }
 0x187   : > { %v2147_v14 = vmax.f32 %v2027_v11, 0.0  ;;  %v2019_v25 = vadd.f32 %v5625_v0, %v2018_v57  ;;  %v2598_v11 = vld [vmem:[#allocation3 + $0x14] sm:$0x1] }
 0x188   : > { %v4385_v55 = vpop.f32.mrf.mxu0  ;;  %v5637_v12 = vpop.permute.xlu1 %1453 }
 0x189   : > { %v4307_v5 = vpack.c.bf16 %v2147_v14, %v2147_v14  ;;  %v2145_v17 = vmax.f32 %v2019_v25, 0.0  ;;  %v2030_v19 = vadd.f32 %v4385_v55, %v5625_v0 }
 0x18a   : > { %v2021_v21 = vpop.f32.mrf.mxu0  ;;  %v5640_v24 = vpop.permute.xlu0 %1451 }
 0x18b   : > { %v2291_v27 = vshrl.u32 %v4307_v5, 16  ;;  %v4305_v29 = vpack.c.bf16 %v2145_v17, %v2145_v17  ;;  %v2148_v10 = vmax.f32 %v2030_v19, 0.0  ;;  %v2022_v30 = vadd.f32 %v5625_v0, %v2021_v21 }
 0x18c   : > { %v1501_v50 = vpop.permute.xlu1 %1500  ;;  %v2294_v45 = vshll.u32 %v4307_v5, 16  ;;  %v1686_v5 = vsel %vm1656_vm12, %v5381_v13, %v5609_v52  ;;  %v1754_v52 = vsel %vm1722_vm14, %v1721_v31, %v5637_v12  ;;  %v443_v31 = vld [vmem:[#allocation3 + $0x98] sm:$0x1] }
 0x18d   : > { %v2293_v20 = vrot.slane %v2291_v27, 7  ;;  %v2274_v34 = vshrl.u32 %v4305_v29, 16  ;;  %v4308_v16 = vpack.c.bf16 %v2148_v10, %v2148_v10  ;;  %v2146_v22 = vmax.f32 %v2022_v30, 0.0 }
 0x18e   : > { %v1499_v35 = vpop.permute.xlu0 %1498  ;;  %v2277_v38 = vshll.u32 %v4305_v29, 16  ;;  %v1719_v21 = vsel %vm1689_vm13, %v1686_v5, %v5634_v39  ;;  %v1787_v29 = vsel %vm1755_vm15, %v1754_v52, %v1501_v50 }
 0x18f   : > { %v2296_v41 = vor.u32 %v2294_v45, %v2293_v20  ;;  %v2276_v2 = vrot.slane %v2274_v34, 7  ;;  %v2299_v44 = vshrl.u32 %v4308_v16, 16  ;;  %v4306_v59 = vpack.c.bf16 %v2146_v22, %v2146_v22 }
 0x190   : > { %v1536_v46 = vpop.permute.xlu1 %1535  ;;  %v2302_v28 = vshll.u32 %v4308_v16, 16  ;;  %v2297_v23 = vrot.slane %v2293_v20, 4  ;;  %v1752_v27 = vsel %vm1722_vm14, %v1719_v21, %v5640_v24 }
 0x191   : > { %v2602_v48 = vsel %vm4831_vm7, %v2296_v41, %v2601_v26  ;;  %v2279_v54 = vor.u32 %v2277_v38, %v2276_v2  ;;  %v2301_v51 = vrot.slane %v2299_v44, 7  ;;  %v2282_v4 = vshrl.u32 %v4306_v59, 16 }
 0x192   : > { %2603 = vst [vmem:[#allocation3 + $0x18] sm:$0xf] %v2602_v48  ;;  %v1534_v18 = vpop.permute.xlu0 %1533  ;;  %v2285_v63 = vshll.u32 %v4306_v59, 16  ;;  %v2280_v57 = vrot.slane %v2276_v2, 4  ;;  %v1785_v6 = vsel %vm1755_vm15, %v1752_v27, %v1499_v35  ;;  %v1820_v33 = vsel %vm1788_vm1, %v1787_v29, %v1536_v46 }
 0x193   : > { %v2595_v53 = vsel %vm4831_vm7, %v2279_v54, %v2594_v43  ;;  %v2304_v56 = vor.u32 %v2302_v28, %v2301_v51  ;;  %v2306_v61 = vrot.slane %v2301_v51, 4  ;;  %v2284_v62 = vrot.slane %v2282_v4, 7  ;;  %v389_v43 = vld [vmem:[#allocation3 + $0x90] sm:$0x1] }
 0x194   : > { %2596 = vst [vmem:[#allocation3 + $0xc] sm:$0xf] %v2595_v53  ;;  %v1573_v49 = vpop.permute.xlu1 %1572  ;;  %v1818_v10 = vsel %vm1788_vm1, %v1785_v6, %v1534_v18  ;;  %v390_v48 = vsel %vm4785_vm3, 0, %v389_v43  ;;  %v2608_v6 = vld [vmem:[#allocation3 + $0x24] sm:$0xf] }
 0x195   : > { %v2305_v3 = vsel %vm4839_vm8, %v2297_v23, %v2304_v56  ;;  %v2606_v8 = vsel %vm4785_vm3, %v2306_v61, %v2605_v37  ;;  %v2287_v14 = vor.u32 %v2285_v63, %v2284_v62  ;;  %v2289_v25 = vrot.slane %v2284_v62, 4  ;;  %391 = vst [vmem:[#allocation3 + $0x90] sm:$0x1] %v390_v48 }
 0x196   : > { %2604 = vst.msk [vmem:[#allocation3 + $0x1c] sm:$0xf] %vm224_vm0, %v2305_v3  ;;  %2607 = vst [vmem:[#allocation3 + $0x20] sm:$0x1] %v2606_v8  ;;  %v1571_v55 = vpop.permute.xlu0 %1570  ;;  %v1853_v20 = vsel %vm1821_vm2, %v1820_v33, %v1573_v49  ;;  %v386_v8 = vld [vmem:[#allocation3 + $0x84] sm:$0x1] }
 0x197   : > { %v2288_v58 = vsel %vm4839_vm8, %v2280_v57, %v2287_v14  ;;  %v2599_v17 = vsel %vm4785_vm3, %v2289_v25, %v2598_v11  ;;  %v1851_v39 = vsel %vm1821_vm2, %v1818_v10, %v1571_v55  ;;  %v387_v57 = vsel %vm4785_vm3, 0, %v386_v8  ;;  %v440_v10 = vld [vmem:[#allocation3 + $0x8c] sm:$0x1] }
 0x198   : > { %v1620_v19 = vpop.permute.xlu1 %1619  ;;  %2597 = vst.msk [vmem:[#allocation3 + $0x10] sm:$0xf] %vm224_vm0, %v2288_v58  ;;  %2600 = vst [vmem:[#allocation3 + $0x14] sm:$0x1] %v2599_v17  ;;  %v2615_v58 = vld [vmem:[#allocation3 + $0x30] sm:$0xf] }
 0x199   : > { %v1886_v12 = vsel %vm1854_vm6, %v1853_v20, %v1620_v19  ;;  %388 = vst [vmem:[#allocation3 + $0x84] sm:$0x1] %v387_v57  ;;  %v444_v19 = vsel %vm4806_vm5, 0, %v443_v31  ;;  %v2619_v20 = vld [vmem:[#allocation3 + $0x38] sm:$0x1] }
 0x19a   : > { %v1618_v13 = vpop.permute.xlu0 %1617  ;;  %445 = vst [vmem:[#allocation3 + $0x98] sm:$0x1] %v444_v19 }
 0x19b   : > { %v1884_v24 = vsel %vm1854_vm6, %v1851_v39, %v1618_v13 }
 0x19c   : > { %v1655_v30 = vpop.permute.xlu1 %1654 }
 0x19d   : > { %v4543_v9 = vld [vmem:[#allocation3 + $0x18] sm:$0xff]   ;;  %v4544_v34 = vld [vmem:[#allocation3 + $0x20] ss:$0 sps:$4 sm:$0x11]   ;;  %v1919_v26 = vsel %vm6570_vm4, %v1886_v12, %v1655_v30 }
 0x19e   : > { %v1653_v45 = vpop.permute.xlu0 %1652  ;;  %3199 = vrot.lane.b32.xlu1 %v4543_v9, %s4694_s11  ;;  %3316 = vrot.lane.b32.xlu0 %v4543_v9, %s4695_s12  ;;  %v3118_v50 = vrot.slane %v4543_v9, 1  ;;  %v2915_v15 = vshll.u32 %v4543_v9, 16  ;;  %v3119_v22 = vrot.slane %v4544_v34, 1  ;;  %v2913_v46 = vshrl.u32 %v4543_v9, 16 }
 0x19f   : > { %v1917_v16 = vsel %vm6570_vm4, %v1884_v24, %v1653_v45  ;;  %v5690_v35 = vld [vmem:[#allocation3 + $0xc] sm:$0xff]   ;;  %v5693_v40 = vld [vmem:[#allocation3 + $0x14] ss:$0 sps:$4 sm:$0x11]   ;;  %v2920_v47 = vshll.u32 %v4544_v34, 16  ;;  %v441_v45 = vsel %vm4806_vm5, 0, %v440_v10 }
 0x1a0   : > { %4410 = vmatprep.mubr.msk.bf16.mxu0 %vm6569_vm11, %v1917_v16  ;;  %v3120_v41 = vsel %vm1337_vm9, %v3118_v50, %v3119_v22  ;;  %v3115_v2 = vrot.slane %v5690_v35, 1  ;;  %v2917_v38 = vrot.slane %v2915_v15, 1  ;;  %v3116_v44 = vrot.slane %v5693_v40, 1  ;;  %442 = vst [vmem:[#allocation3 + $0x8c] sm:$0x1] %v441_v45 }
 0x1a1   : > { %4411 = vmatmul.mubr.msk.bf16.gmra.mxu0 %vm6569_vm11, %v1919_v26  ;;  %v2922_v23 = vrot.slane %v2920_v47, 1  ;;  %vm6581_vm11 = vcmask 1041408  }
 0x1a2   : > { %3281 = vrot.lane.b32.xlu1 %v3120_v41, %s4697_s14  ;;  %3197 = vrot.lane.b32.xlu0 %v5690_v35, %s4694_s11  ;;  %v3117_v28 = vsel %vm1337_vm9, %v3115_v2, %v3116_v44  ;;  %v2918_v37 = vor.u32 %v2917_v38, %v2913_v46  ;;  %v2612_v2 = vld [vmem:[#allocation3 + $0x2c] sm:$0x1]  ;;  %vm6582_vm4 = vmmov %vm6581_vm11 }
 0x1a4   : > { %v4388_v59 = vpop.f32.mrf.mxu0  ;;  %v2923_v63 = vsel %vm1112_vm10, %v2918_v37, %v2922_v23  ;;  %v395_v23 = vld [vmem:[#allocation3 + $0xa8] sm:$0x1] }
 0x1a5   : > { %v2043_v54 = vadd.f32 %v4388_v59, %v5625_v0  ;;  %v2903_v59 = vshll.u32 %v5690_v35, 16 }
 0x1a6   : > { %v2034_v51 = vpop.f32.mrf.mxu0  ;;  %3162 = vrot.lane.b32.xlu1 %v3117_v28, %s4693_s10  ;;  %3398 = vrot.lane.b32.xlu0 %v3120_v41, %s4698_s15 }
 0x1a7   : > { %v2151_v4 = vmax.f32 %v2043_v54, 0.0  ;;  %v2035_v18 = vadd.f32 %v5625_v0, %v2034_v51  ;;  %v2905_v48 = vrot.slane %v2903_v59, 1  ;;  %v2901_v54 = vshrl.u32 %v5690_v35, 16 }
 0x1a8   : > { %v4389_v42 = vpop.f32.mrf.mxu0  ;;  %v2908_v51 = vshll.u32 %v5693_v40, 16  ;;  %v396_v35 = vsel %vm4785_vm3, 0, %v395_v23 }
 0x1a9   : > { %v4311_v53 = vpack.c.bf16 %v2151_v4, %v2151_v4  ;;  %v2149_v56 = vmax.f32 %v2035_v18, 0.0  ;;  %v2046_v61 = vadd.f32 %v4389_v42, %v5625_v0  ;;  %v2906_v37 = vor.u32 %v2905_v48, %v2901_v54  ;;  %397 = vst [vmem:[#allocation3 + $0xa8] sm:$0x1] %v396_v35 }
 0x1aa   : > { %v2037_v62 = vpop.f32.mrf.mxu0  ;;  %3246 = vrot.lane.b32.xlu1 %v2923_v63, %s4699_s16  ;;  %3164 = vrot.lane.b32.xlu0 %v3120_v41, %s4693_s10  ;;  %v2910_v4 = vrot.slane %v2908_v51, 1  ;;  %v4566_v51 = vld [vmem:[%s6565_s3 + $0x8] sm:$0xff]  }
 0x1ab   : > { %v2325_v49 = vshrl.u32 %v4311_v53, 16  ;;  %v4309_v60 = vpack.c.bf16 %v2149_v56, %v2149_v56  ;;  %v2152_v3 = vmax.f32 %v2046_v61, 0.0  ;;  %v2038_v11 = vadd.f32 %v5625_v0, %v2037_v62 }
 0x1ac   : > { %v2328_v25 = vshll.u32 %v4311_v53, 16  ;;  %v2911_v18 = vsel %vm1112_vm10, %v2906_v37, %v2910_v4 }
 0x1ad   : > { %v2327_v14 = vrot.slane %v2325_v49, 7  ;;  %v2308_v55 = vshrl.u32 %v4309_v60, 16  ;;  %v4312_v5 = vpack.c.bf16 %v2152_v3, %v2152_v3  ;;  %v2150_v17 = vmax.f32 %v2038_v11, 0.0 }
 0x1ae   : > { %v2311_v13 = vshll.u32 %v4309_v60, 16  ;;  %3084 = vrot.lane.b32.xlu1 %v2923_v63, %s4696_s13  ;;  %3279 = vrot.lane.b32.xlu0 %v3117_v28, %s4697_s14 }
 0x1af   : > { %v2330_v21 = vor.u32 %v2328_v25, %v2327_v14  ;;  %v2310_v27 = vrot.slane %v2308_v55, 7  ;;  %v2333_v52 = vshrl.u32 %v4312_v5, 16  ;;  %v4310_v29 = vpack.c.bf16 %v2150_v17, %v2150_v17 }
 0x1b0   : > { %v2336_v9 = vshll.u32 %v4312_v5, 16  ;;  %v2331_v34 = vrot.slane %v2327_v14, 4 }
 0x1b1   : > { %v2616_v33 = vsel %vm4831_vm7, %v2330_v21, %v2615_v58  ;;  %v2313_v39 = vor.u32 %v2311_v13, %v2310_v27  ;;  %v2335_v30 = vrot.slane %v2333_v52, 7  ;;  %v2316_v24 = vshrl.u32 %v4310_v29, 16 }
 0x1b2   : > { %2617 = vst [vmem:[#allocation3 + $0x30] sm:$0xf] %v2616_v33  ;;  %3363 = vrot.lane.b32.xlu0 %v2923_v63, %s4700_s17  ;;  %v2319_v26 = vshll.u32 %v4310_v29, 16  ;;  %v2314_v38 = vrot.slane %v2310_v27, 4  ;;  %v392_v29 = vld [vmem:[#allocation3 + $0x9c] sm:$0x1] }
 0x1b3   : > { %v2609_v12 = vsel %vm4831_vm7, %v2313_v39, %v2608_v6  ;;  %v2338_v16 = vor.u32 %v2336_v9, %v2335_v30  ;;  %v2340_v50 = vrot.slane %v2335_v30, 4  ;;  %v2318_v15 = vrot.slane %v2316_v24, 7  ;;  %v4565_v9 = vld [vmem:[%s6565_s3 + $0x10] ss:$0 sps:$4 sm:$0x33]  }
 0x1b4   : > { %2610 = vst [vmem:[#allocation3 + $0x24] sm:$0xf] %v2609_v12  ;;  %v393_v12 = vsel %vm4785_vm3, 0, %v392_v29  ;;  %4453 = vmatprep.subr.msk.bf16.mxu1 %vm6581_vm11, %v4565_v9  ;;  %v3746_v59 = vsel %vm6582_vm4, %v4565_v9, 0  ;;  %vm6584_vm11 = vcmask 293888  }
 0x1b5   : > { %v2339_v22 = vsel %vm4839_vm8, %v2331_v34, %v2338_v16  ;;  %v2620_v41 = vsel %vm4785_vm3, %v2340_v50, %v2619_v20  ;;  %v2321_v44 = vor.u32 %v2319_v26, %v2318_v15  ;;  %v2323_v43 = vrot.slane %v2318_v15, 4  ;;  %v2629_v20 = vld [vmem:[#allocation3 + $0x48] sm:$0xf]  ;;  %v449_v16 = vld [vmem:[#allocation3 + $0xb0] sm:$0x1]  ;;  %4415 = vmatpush3.bf16.msra.mxu1 %v3746_v59 }
 0x1b6   : > { %2618 = vst.msk [vmem:[#allocation3 + $0x34] sm:$0xf] %vm224_vm0, %v2339_v22  ;;  %2621 = vst [vmem:[#allocation3 + $0x38] sm:$0x1] %v2620_v41  ;;  %v2622_v22 = vld [vmem:[#allocation3 + $0x3c] sm:$0xf]  ;;  %4416 = vmatprep.subr.bf16.mxu1 %v4566_v51 }
 0x1b7   : > { %v2322_v46 = vsel %vm4839_vm8, %v2314_v38, %v2321_v44  ;;  %v2613_v47 = vsel %vm4785_vm3, %v2323_v43, %v2612_v2  ;;  %394 = vst [vmem:[#allocation3 + $0x9c] sm:$0x1] %v393_v12  ;;  %v450_v44 = vsel %vm4806_vm5, 0, %v449_v16  ;;  %v446_v43 = vld [vmem:[#allocation3 + $0xa4] sm:$0x1] }
 0x1b8   : > { %2611 = vst.msk [vmem:[#allocation3 + $0x28] sm:$0xf] %vm224_vm0, %v2322_v46  ;;  %2614 = vst [vmem:[#allocation3 + $0x2c] sm:$0x1] %v2613_v47  ;;  %v398_v16 = vld [vmem:[#allocation3 + $0xb4] sm:$0x1] }
 0x1b9   : > { %451 = vst [vmem:[#allocation3 + $0xb0] sm:$0x1] %v450_v44  ;;  %4417 = vmatpush3.bf16.msra.mxu1 %v4566_v51  ;;  %v455_v44 = vld [vmem:[#allocation3 + $0xc8] sm:$0x1] }
 0x1bd   : > { %v4547_v28 = vld [vmem:[#allocation3 + $0x30] sm:$0xff]   ;;  %v4549_v42 = vld [vmem:[#allocation3 + $0x38] ss:$0 sps:$4 sm:$0x11]  }
 0x1be   : > { %3203 = vrot.lane.b32.xlu1 %v4547_v28, %s4694_s11  ;;  %3320 = vrot.lane.b32.xlu0 %v4547_v28, %s4695_s12  ;;  %v3124_v62 = vrot.slane %v4547_v28, 1  ;;  %v3125_v63 = vrot.slane %v4549_v42, 1  ;;  %v2939_v60 = vshll.u32 %v4547_v28, 16  ;;  %v2937_v52 = vshrl.u32 %v4547_v28, 16  ;;  %v2633_v28 = vld [vmem:[#allocation3 + $0x50] sm:$0x1] }
 0x1bf   : > { %v5747_v56 = vld [vmem:[#allocation3 + $0x24] sm:$0xff]   ;;  %v5749_v49 = vld [vmem:[#allocation3 + $0x2c] ss:$0 sps:$4 sm:$0x11]   ;;  %v2944_v6 = vshll.u32 %v4549_v42, 16 }
 0x1c0   : > { %v3126_v5 = vsel %vm1337_vm9, %v3124_v62, %v3125_v63  ;;  %v3121_v31 = vrot.slane %v5747_v56, 1  ;;  %v3122_v58 = vrot.slane %v5749_v49, 1  ;;  %v2941_v17 = vrot.slane %v2939_v60, 1  ;;  %v2626_v60 = vld [vmem:[#allocation3 + $0x44] sm:$0x1] }
 0x1c1   : > { %v2946_v38 = vrot.slane %v2944_v6, 1 }
 0x1c2   : > { %3082 = vrot.lane.b32.xlu1 %v2911_v18, %s4696_s13  ;;  %3244 = vrot.lane.b32.xlu0 %v2911_v18, %s4699_s16  ;;  %v3123_v45 = vsel %vm1337_vm9, %v3121_v31, %v3122_v58  ;;  %v2942_v34 = vor.u32 %v2941_v17, %v2937_v52  ;;  %v447_v18 = vsel %vm4806_vm5, 0, %v446_v43  ;;  %v2925_v31 = vshrl.u32 %v5747_v56, 16  ;;  %v401_v52 = vld [vmem:[#allocation3 + $0xc0] sm:$0x1] }
 0x1c3   : > { %448 = vst [vmem:[#allocation3 + $0xa4] sm:$0x1] %v447_v18  ;;  %v2932_v58 = vshll.u32 %v5749_v49, 16  ;;  %v402_v49 = vsel %vm4785_vm3, 0, %v401_v52 }
 0x1c4   : > { %v4392_v53 = vpop.f32.mrf.mxu0  ;;  %v2947_v4 = vsel %vm1112_vm10, %v2942_v34, %v2946_v38  ;;  %403 = vst [vmem:[#allocation3 + $0xc0] sm:$0x1] %v402_v49 }
 0x1c5   : > { %v2059_v40 = vadd.f32 %v4392_v53, %v5625_v0 }
 0x1c6   : > { %v2050_v61 = vpop.f32.mrf.mxu0  ;;  %3318 = vrot.lane.b32.xlu1 %v5747_v56, %s4695_s12  ;;  %3201 = vrot.lane.b32.xlu0 %v5747_v56, %s4694_s11 }
 0x1c7   : > { %v2155_v3 = vmax.f32 %v2059_v40, 0.0  ;;  %v2051_v8 = vadd.f32 %v5625_v0, %v2050_v61 }
 0x1c8   : > { %v4393_v11 = vpop.f32.mrf.mxu0 }
 0x1c9   : > { %v4315_v57 = vpack.c.bf16 %v2155_v3, %v2155_v3  ;;  %v2153_v14 = vmax.f32 %v2051_v8, 0.0  ;;  %v2062_v25 = vadd.f32 %v4393_v11, %v5625_v0  ;;  %v4567_v3 = vld [vmem:[%s6565_s3] sm:$0xff]  }
 0x1ca   : > { %v2053_v55 = vpop.f32.mrf.mxu0  ;;  %3285 = vrot.lane.b32.xlu1 %v3126_v5, %s4697_s14  ;;  %3402 = vrot.lane.b32.xlu0 %v3126_v5, %s4698_s15 }
 0x1cb   : > { %v2359_v19 = vshrl.u32 %v4315_v57, 16  ;;  %v4313_v21 = vpack.c.bf16 %v2153_v14, %v2153_v14  ;;  %v2156_v27 = vmax.f32 %v2062_v25, 0.0  ;;  %v2054_v13 = vadd.f32 %v5625_v0, %v2053_v55  ;;  %4418 = vmatprep.subr.bf16.mxu1 %v4567_v3 }
 0x1cc   : > { %v2362_v33 = vshll.u32 %v4315_v57, 16  ;;  %v2927_v14 = vshll.u32 %v5747_v56, 16  ;;  %4419 = vmatpush3.bf16.msra.mxu1 %v4567_v3 }
 0x1cd   : > { %v2361_v10 = vrot.slane %v2359_v19, 7  ;;  %v2342_v39 = vshrl.u32 %v4313_v21, 16  ;;  %v4316_v30 = vpack.c.bf16 %v2156_v27, %v2156_v27  ;;  %v2154_v24 = vmax.f32 %v2054_v13, 0.0 }
 0x1ce   : > { %v2345_v26 = vshll.u32 %v4313_v21, 16  ;;  %3166 = vrot.lane.b32.xlu1 %v3123_v45, %s4693_s10  ;;  %3168 = vrot.lane.b32.xlu0 %v3126_v5, %s4693_s10  ;;  %v2929_v5 = vrot.slane %v2927_v14, 1  ;;  %v2934_v21 = vrot.slane %v2932_v58, 1 }
 0x1cf   : > { %v2364_v50 = vor.u32 %v2362_v33, %v2361_v10  ;;  %v2344_v15 = vrot.slane %v2342_v39, 7  ;;  %v2367_v41 = vshrl.u32 %v4316_v30, 16  ;;  %v4314_v2 = vpack.c.bf16 %v2154_v24, %v2154_v24 }
 0x1d0   : > { %v2370_v54 = vshll.u32 %v4316_v30, 16  ;;  %v2365_v42 = vrot.slane %v2361_v10, 4  ;;  %v2930_v19 = vor.u32 %v2929_v5, %v2925_v31 }
 0x1d1   : > { %v2630_v46 = vsel %vm4831_vm7, %v2364_v50, %v2629_v20  ;;  %v2347_v47 = vor.u32 %v2345_v26, %v2344_v15  ;;  %v2369_v48 = vrot.slane %v2367_v41, 7  ;;  %v2350_v37 = vshrl.u32 %v4314_v2, 16 }
 0x1d2   : > { %2631 = vst [vmem:[#allocation3 + $0x48] sm:$0xf] %v2630_v46  ;;  %3250 = vrot.lane.b32.xlu1 %v2947_v4, %s4699_s16  ;;  %3400 = vrot.lane.b32.xlu0 %v3123_v45, %s4698_s15  ;;  %v2353_v61 = vshll.u32 %v4314_v2, 16  ;;  %v2348_v8 = vrot.slane %v2344_v15, 4  ;;  %v2935_v27 = vsel %vm1112_vm10, %v2930_v19, %v2934_v21  ;;  %v456_v46 = vsel %vm4806_vm5, 0, %v455_v44 }
 0x1d3   : > { %v2623_v23 = vsel %vm4831_vm7, %v2347_v47, %v2622_v22  ;;  %v2372_v53 = vor.u32 %v2370_v54, %v2369_v48  ;;  %v2374_v35 = vrot.slane %v2369_v48, 4  ;;  %v2352_v40 = vrot.slane %v2350_v37, 7  ;;  %457 = vst [vmem:[#allocation3 + $0xc8] sm:$0x1] %v456_v46  ;;  %v2643_v37 = vld [vmem:[#allocation3 + $0x60] sm:$0xf] }
 0x1d4   : > { %2624 = vst [vmem:[#allocation3 + $0x3c] sm:$0xf] %v2623_v23  ;;  %v399_v22 = vsel %vm4785_vm3, 0, %v398_v16 }
 0x1d5   : > { %v2373_v62 = vsel %vm4839_vm8, %v2365_v42, %v2372_v53  ;;  %v2634_v63 = vsel %vm4785_vm3, %v2374_v35, %v2633_v28  ;;  %v2355_v11 = vor.u32 %v2353_v61, %v2352_v40  ;;  %v2357_v57 = vrot.slane %v2352_v40, 4  ;;  %400 = vst [vmem:[#allocation3 + $0xb4] sm:$0x1] %v399_v22  ;;  %v452_v28 = vld [vmem:[#allocation3 + $0xbc] sm:$0x1] }
 0x1d6   : > { %2632 = vst.msk [vmem:[#allocation3 + $0x4c] sm:$0xf] %vm224_vm0, %v2373_v62  ;;  %2635 = vst [vmem:[#allocation3 + $0x50] sm:$0x1] %v2634_v63  ;;  %3088 = vrot.lane.b32.xlu1 %v2947_v4, %s4696_s13  ;;  %3283 = vrot.lane.b32.xlu0 %v3123_v45, %s4697_s14  ;;  %v453_v23 = vsel %vm4806_vm5, 0, %v452_v28 }
 0x1d7   : > { %v2356_v25 = vsel %vm4839_vm8, %v2348_v8, %v2355_v11  ;;  %v2627_v55 = vsel %vm4785_vm3, %v2357_v57, %v2626_v60  ;;  %454 = vst [vmem:[#allocation3 + $0xbc] sm:$0x1] %v453_v23  ;;  %v2636_v62 = vld [vmem:[#allocation3 + $0x54] sm:$0xf] }
 0x1d8   : > { %2625 = vst.msk [vmem:[#allocation3 + $0x40] sm:$0xf] %vm224_vm0, %v2356_v25  ;;  %2628 = vst [vmem:[#allocation3 + $0x44] sm:$0x1] %v2627_v55  ;;  %v2647_v25 = vld [vmem:[#allocation3 + $0x68] sm:$0x1] }
 0x1da   : > { %3367 = vrot.lane.b32.xlu0 %v2947_v4, %s4700_s17 }
 0x1dd   : > { %v5806_v17 = vld [vmem:[#allocation3 + $0x48] sm:$0xff]   ;;  %v5813_v13 = vld [vmem:[#allocation3 + $0x50] ss:$0 sps:$4 sm:$0x11]  }
 0x1de   : > { %3207 = vrot.lane.b32.xlu1 %v5806_v17, %s4694_s11  ;;  %3324 = vrot.lane.b32.xlu0 %v5806_v17, %s4695_s12  ;;  %v3130_v33 = vrot.slane %v5806_v17, 1  ;;  %v3131_v39 = vrot.slane %v5813_v13, 1  ;;  %v2963_v24 = vshll.u32 %v5806_v17, 16  ;;  %v2961_v60 = vshrl.u32 %v5806_v17, 16 }
 0x1df   : > { %v5820_v29 = vld [vmem:[#allocation3 + $0x3c] sm:$0xff]   ;;  %v5831_v26 = vld [vmem:[#allocation3 + $0x44] ss:$0 sps:$4 sm:$0x11]   ;;  %v2968_v3 = vshll.u32 %v5813_v13, 16 }
 0x1e0   : > { %v3132_v15 = vsel %vm1337_vm9, %v3130_v33, %v3131_v39  ;;  %v2965_v59 = vrot.slane %v2963_v24, 1  ;;  %v3127_v18 = vrot.slane %v5820_v29, 1  ;;  %v3128_v42 = vrot.slane %v5831_v26, 1 }
 0x1e1   : > { %v2970_v52 = vrot.slane %v2968_v3, 1 }
 0x1e2   : > { %3365 = vrot.lane.b32.xlu1 %v2935_v27, %s4700_s17  ;;  %3248 = vrot.lane.b32.xlu0 %v2935_v27, %s4699_s16  ;;  %v3129_v5 = vsel %vm1337_vm9, %v3127_v18, %v3128_v42  ;;  %v2966_v31 = vor.u32 %v2965_v59, %v2961_v60 }
 0x1e4   : > { %v4396_v56 = vpop.f32.mrf.mxu0 }
 0x1e5   : > { %v2075_v6 = vadd.f32 %v4396_v56, %v5625_v0 }
 0x1e6   : > { %v2066_v10 = vpop.f32.mrf.mxu0  ;;  %3086 = vrot.lane.b32.xlu1 %v2935_v27, %s4696_s13  ;;  %3205 = vrot.lane.b32.xlu0 %v5820_v29, %s4694_s11 }
 0x1e7   : > { %v2159_v30 = vmax.f32 %v2075_v6, 0.0  ;;  %v2067_v9 = vadd.f32 %v5625_v0, %v2066_v10  ;;  %v2640_v6 = vld [vmem:[#allocation3 + $0x5c] sm:$0x1]  ;;  %v2951_v10 = vshll.u32 %v5820_v29, 16 }
 0x1e8   : > { %v4397_v20 = vpop.f32.mrf.mxu0 }
 0x1e9   : > { %v4319_v45 = vpack.c.bf16 %v2159_v30, %v2159_v30  ;;  %v2157_v34 = vmax.f32 %v2067_v9, 0.0  ;;  %v2078_v12 = vadd.f32 %v4397_v20, %v5625_v0  ;;  %v2971_v9 = vsel %vm1112_vm10, %v2966_v31, %v2970_v52 }
 0x1ea   : > { %v2069_v50 = vpop.f32.mrf.mxu0  ;;  %3322 = vrot.lane.b32.xlu1 %v5820_v29, %s4695_s12  ;;  %3406 = vrot.lane.b32.xlu0 %v3132_v15, %s4698_s15 }
 0x1eb   : > { %v2393_v41 = vshrl.u32 %v4319_v45, 16  ;;  %v4317_v2 = vpack.c.bf16 %v2157_v34, %v2157_v34  ;;  %v2160_v38 = vmax.f32 %v2078_v12, 0.0  ;;  %v2070_v43 = vadd.f32 %v5625_v0, %v2069_v50 }
 0x1ec   : > { %v2396_v48 = vshll.u32 %v4319_v45, 16  ;;  %v2953_v45 = vrot.slane %v2951_v10, 1  ;;  %v2949_v34 = vshrl.u32 %v5820_v29, 16  ;;  %v2956_v12 = vshll.u32 %v5831_v26, 16 }
 0x1ed   : > { %v2395_v47 = vrot.slane %v2393_v41, 7  ;;  %v2376_v54 = vshrl.u32 %v4317_v2, 16  ;;  %v4320_v51 = vpack.c.bf16 %v2160_v38, %v2160_v38  ;;  %v2158_v4 = vmax.f32 %v2070_v43, 0.0  ;;  %v5888_v38 = vpop.permute.xlu0 %3080 }
 0x1ee   : > { %v2379_v40 = vshll.u32 %v4317_v2, 16  ;;  %3289 = vrot.lane.b32.xlu1 %v3132_v15, %s4697_s14  ;;  %3172 = vrot.lane.b32.xlu0 %v3132_v15, %s4693_s10  ;;  %v2954_v50 = vor.u32 %v2953_v45, %v2949_v34  ;;  %v2958_v15 = vrot.slane %v2956_v12, 1 }
 0x1ef   : > { %v2398_v53 = vor.u32 %v2396_v48, %v2395_v47  ;;  %v2378_v35 = vrot.slane %v2376_v54, 7  ;;  %v2401_v61 = vshrl.u32 %v4320_v51, 16  ;;  %v4318_v63 = vpack.c.bf16 %v2158_v4, %v2158_v4 }
 0x1f0   : > { %v2404_v14 = vshll.u32 %v4320_v51, 16  ;;  %v2399_v58 = vrot.slane %v2395_v47, 4  ;;  %v2959_v22 = vsel %vm1112_vm10, %v2954_v50, %v2958_v15  ;;  %v2654_v15 = vld [vmem:[#allocation3 + $0x74] sm:$0x1] }
 0x1f1   : > { %v2644_v8 = vsel %vm4831_vm7, %v2398_v53, %v2643_v37  ;;  %v2381_v11 = vor.u32 %v2379_v40, %v2378_v35  ;;  %v2403_v57 = vrot.slane %v2401_v61, 7  ;;  %v2384_v55 = vshrl.u32 %v4318_v63, 16  ;;  %v5904_v40 = vpop.permute.xlu0 %3160 }
 0x1f2   : > { %2645 = vst [vmem:[#allocation3 + $0x60] sm:$0xf] %v2644_v8  ;;  %3170 = vrot.lane.b32.xlu1 %v3129_v5, %s4693_s10  ;;  %3404 = vrot.lane.b32.xlu0 %v3129_v5, %s4698_s15  ;;  %v2387_v13 = vshll.u32 %v4318_v63, 16  ;;  %v2382_v33 = vrot.slane %v2378_v35, 4  ;;  %v2657_v8 = vld [vmem:[#allocation3 + $0x78] sm:$0xf] }
 0x1f3   : > { %v2637_v19 = vsel %vm4831_vm7, %v2381_v11, %v2636_v62  ;;  %v2406_v21 = vor.u32 %v2404_v14, %v2403_v57  ;;  %v2408_v17 = vrot.slane %v2403_v57, 4  ;;  %v2386_v27 = vrot.slane %v2384_v55, 7 }
 0x1f4   : > { %2638 = vst [vmem:[#allocation3 + $0x54] sm:$0xf] %v2637_v19 }
 0x1f5   : > { %v2407_v56 = vsel %vm4839_vm8, %v2399_v58, %v2406_v21  ;;  %v2648_v49 = vsel %vm4785_vm3, %v2408_v17, %v2647_v25  ;;  %v2389_v39 = vor.u32 %v2387_v13, %v2386_v27  ;;  %v2391_v30 = vrot.slane %v2386_v27, 4 }
 0x1f6   : > { %2646 = vst.msk [vmem:[#allocation3 + $0x64] sm:$0xf] %vm224_vm0, %v2407_v56  ;;  %2649 = vst [vmem:[#allocation3 + $0x68] sm:$0x1] %v2648_v49  ;;  %3254 = vrot.lane.b32.xlu1 %v2971_v9, %s4699_s16  ;;  %3287 = vrot.lane.b32.xlu0 %v3129_v5, %s4697_s14 }
 0x1f7   : > { %v2390_v20 = vsel %vm4839_vm8, %v2382_v33, %v2389_v39  ;;  %v2641_v24 = vsel %vm4785_vm3, %v2391_v30, %v2640_v6  ;;  %v2661_v6 = vld [vmem:[#allocation3 + $0x80] sm:$0x1] }
 0x1f8   : > { %2639 = vst.msk [vmem:[#allocation3 + $0x58] sm:$0xf] %vm224_vm0, %v2390_v20  ;;  %2642 = vst [vmem:[#allocation3 + $0x5c] sm:$0x1] %v2641_v24 }
 0x1fa   : > { %3092 = vrot.lane.b32.xlu1 %v2971_v9, %s4696_s13  ;;  %3371 = vrot.lane.b32.xlu0 %v2971_v9, %s4700_s17 }
 0x1fd   : > { %v5874_v16 = vld [vmem:[#allocation3 + $0x60] sm:$0xff]   ;;  %v5881_v41 = vld [vmem:[#allocation3 + $0x68] ss:$0 sps:$4 sm:$0x11]  }
 0x1fe   : > { %3211 = vrot.lane.b32.xlu1 %v5874_v16, %s4694_s11  ;;  %3328 = vrot.lane.b32.xlu0 %v5874_v16, %s4695_s12  ;;  %v3136_v43 = vrot.slane %v5874_v16, 1  ;;  %v3137_v59 = vrot.slane %v5881_v41, 1  ;;  %v2987_v42 = vshll.u32 %v5874_v16, 16  ;;  %v2985_v21 = vshrl.u32 %v5874_v16, 16 }
 0x1ff   : > { %v5886_v2 = vld [vmem:[#allocation3 + $0x54] sm:$0xff]   ;;  %v5898_v18 = vld [vmem:[#allocation3 + $0x5c] ss:$0 sps:$4 sm:$0x11]   ;;  %v2992_v17 = vshll.u32 %v5881_v41, 16 }
 0x200   : > { %v3138_v4 = vsel %vm1337_vm9, %v3136_v43, %v3137_v59  ;;  %v3133_v57 = vrot.slane %v5886_v2, 1  ;;  %v3134_v14 = vrot.slane %v5898_v18, 1  ;;  %v2989_v25 = vrot.slane %v2987_v42, 1 }
 0x201   : > { %v2994_v12 = vrot.slane %v2992_v17, 1  ;;  %v2973_v42 = vshrl.u32 %v5886_v2, 16 }
 0x202   : > { %3369 = vrot.lane.b32.xlu1 %v2959_v22, %s4700_s17  ;;  %3252 = vrot.lane.b32.xlu0 %v2959_v22, %s4699_s16  ;;  %v3135_v33 = vsel %vm1337_vm9, %v3133_v57, %v3134_v14  ;;  %v2990_v39 = vor.u32 %v2989_v25, %v2985_v21 }
 0x204   : > { %v4400_v29 = vpop.f32.mrf.mxu0  ;;  %v2995_v59 = vsel %vm1112_vm10, %v2990_v39, %v2994_v12 }
 0x205   : > { %v2091_v26 = vadd.f32 %v4400_v29, %v5625_v0  ;;  %v2975_v29 = vshll.u32 %v5886_v2, 16 }
 0x206   : > { %v2082_v44 = vpop.f32.mrf.mxu0  ;;  %3090 = vrot.lane.b32.xlu1 %v2959_v22, %s4696_s13  ;;  %3209 = vrot.lane.b32.xlu0 %v5886_v2, %s4694_s11 }
 0x207   : > { %v2163_v46 = vmax.f32 %v2091_v26, 0.0  ;;  %v2083_v47 = vadd.f32 %v5625_v0, %v2082_v44 }
 0x208   : > { %v4401_v48 = vpop.f32.mrf.mxu0 }
 0x209   : > { %v4323_v54 = vpack.c.bf16 %v2163_v46, %v2163_v46  ;;  %v2161_v51 = vmax.f32 %v2083_v47, 0.0  ;;  %v2094_v28 = vadd.f32 %v4401_v48, %v5625_v0  ;;  %v404_v48 = vld [vmem:[#allocation3 + $0xcc] sm:$0x1] }
 0x20a   : > { %v2085_v37 = vpop.f32.mrf.mxu0  ;;  %3326 = vrot.lane.b32.xlu1 %v5886_v2, %s4695_s12  ;;  %3410 = vrot.lane.b32.xlu0 %v3138_v4, %s4698_s15 }
 0x20b   : > { %v2427_v23 = vshrl.u32 %v4323_v54, 16  ;;  %v4321_v53 = vpack.c.bf16 %v2161_v51, %v2161_v51  ;;  %v2164_v35 = vmax.f32 %v2094_v28, 0.0  ;;  %v2086_v61 = vadd.f32 %v5625_v0, %v2085_v37  ;;  %v2650_v0 = vld [vmem:[#allocation3 + $0x6c] sm:$0xf] }
 0x20c   : > { %v2430_v63 = vshll.u32 %v4323_v54, 16  ;;  %v2977_v54 = vrot.slane %v2975_v29, 1  ;;  %v405_v51 = vsel %vm4785_vm3, 0, %v404_v48 }
 0x20d   : > { %v2429_v62 = vrot.slane %v2427_v23, 7  ;;  %v2410_v60 = vshrl.u32 %v4321_v53, 16  ;;  %v4324_v3 = vpack.c.bf16 %v2164_v35, %v2164_v35  ;;  %v2162_v11 = vmax.f32 %v2086_v61, 0.0  ;;  %406 = vst [vmem:[#allocation3 + $0xcc] sm:$0x1] %v405_v51 }
 0x20e   : > { %v2413_v31 = vshll.u32 %v4321_v53, 16  ;;  %3293 = vrot.lane.b32.xlu1 %v3138_v4, %s4697_s14  ;;  %3176 = vrot.lane.b32.xlu0 %v3138_v4, %s4693_s10  ;;  %v458_v4 = vld [vmem:[#allocation3 + $0xd4] sm:$0x1]  ;;  %v2980_v23 = vshll.u32 %v5898_v18, 16  ;;  %v2978_v61 = vor.u32 %v2977_v54, %v2973_v42  ;;  %v2664_v42 = vld [vmem:[#allocation3 + $0x84] sm:$0xf] }
 0x20f   : > { %v2432_v55 = vor.u32 %v2430_v63, %v2429_v62  ;;  %v2412_v5 = vrot.slane %v2410_v60, 7  ;;  %v2435_v58 = vshrl.u32 %v4324_v3, 16  ;;  %v4322_v19 = vpack.c.bf16 %v2162_v11, %v2162_v11 }
 0x210   : > { %v2438_v56 = vshll.u32 %v4324_v3, 16  ;;  %v5915_v49 = vpop.permute.xlu0 %3316  ;;  %v2433_v30 = vrot.slane %v2429_v62, 4  ;;  %v5926_v22 = vpop.permute.xlu1 %3199  ;;  %v459_v53 = vsel %vm4806_vm5, 0, %v458_v4  ;;  %v2982_v62 = vrot.slane %v2980_v23, 1  ;;  %v5970_v3 = vld [vmem:[%s6564_s2] ss:$0 sm:$0xff] }
 0x211   : > { %v2658_v27 = vsel %vm4831_vm7, %v2432_v55, %v2657_v8  ;;  %v2415_v13 = vor.u32 %v2413_v31, %v2412_v5  ;;  %v2437_v52 = vrot.slane %v2435_v58, 7  ;;  %v2418_v10 = vshrl.u32 %v4322_v19, 16  ;;  %460 = vst [vmem:[#allocation3 + $0xd4] sm:$0x1] %v459_v53 }
 0x212   : > { %2659 = vst [vmem:[#allocation3 + $0x78] sm:$0xf] %v2658_v27  ;;  %3174 = vrot.lane.b32.xlu1 %v3135_v33, %s4693_s10  ;;  %3408 = vrot.lane.b32.xlu0 %v3135_v33, %s4698_s15  ;;  %v2421_v34 = vshll.u32 %v4322_v19, 16  ;;  %v2416_v26 = vrot.slane %v2412_v5, 4  ;;  %v2983_v2 = vsel %vm1112_vm10, %v2978_v61, %v2982_v62  ;;  %vm6583_vm5 = vcmask 261120  }
 0x213   : > { %v2651_v9 = vsel %vm4831_vm7, %v2415_v13, %v2650_v0  ;;  %v2440_v20 = vor.u32 %v2438_v56, %v2437_v52  ;;  %v2442_v24 = vrot.slane %v2437_v52, 4  ;;  %v2420_v45 = vrot.slane %v2418_v10, 7  ;;  %vm6585_vm4 = vmmov %vm6583_vm5 }
 0x214   : > { %2652 = vst [vmem:[#allocation3 + $0x6c] sm:$0xf] %v2651_v9  ;;  %v5928_v41 = vpop.permute.xlu0 %3197  ;;  %v5942_v28 = vpop.permute.xlu1 %3281  ;;  %v4588_v9 = vld [vmem:[#allocation3] sm:$0xff]  }
 0x215   : > { %v2441_v16 = vsel %vm4839_vm8, %v2433_v30, %v2440_v20  ;;  %v2662_v50 = vsel %vm4785_vm3, %v2442_v24, %v2661_v6  ;;  %v2423_v44 = vor.u32 %v2421_v34, %v2420_v45  ;;  %v2425_v43 = vrot.slane %v2420_v45, 4 }
 0x216   : > { %2660 = vst.msk [vmem:[#allocation3 + $0x7c] sm:$0xf] %vm224_vm0, %v2441_v16  ;;  %2663 = vst [vmem:[#allocation3 + $0x80] sm:$0x1] %v2662_v50  ;;  %3258 = vrot.lane.b32.xlu1 %v2995_v59, %s4699_s16  ;;  %3291 = vrot.lane.b32.xlu0 %v3135_v33, %s4697_s14  ;;  %v3431_v20 = vsel %vm1656_vm12, %v4588_v9, %v5888_v38 }
 0x217   : > { %v2424_v46 = vsel %vm4839_vm8, %v2416_v26, %v2423_v44  ;;  %v2655_v47 = vsel %vm4785_vm3, %v2425_v43, %v2654_v15  ;;  %v2671_v44 = vld [vmem:[#allocation3 + $0x90] sm:$0xf]  ;;  %v3463_v4 = vsel %vm1689_vm13, %v3431_v20, %v5904_v40 }
 0x218   : > { %2653 = vst.msk [vmem:[#allocation3 + $0x70] sm:$0xf] %vm224_vm0, %v2424_v46  ;;  %2656 = vst [vmem:[#allocation3 + $0x74] sm:$0x1] %v2655_v47  ;;  %v5944_v37 = vpop.permute.xlu0 %3398  ;;  %v5958_v63 = vpop.permute.xlu1 %3162 }
 0x21a   : > { %3096 = vrot.lane.b32.xlu1 %v2995_v59, %s4696_s13  ;;  %3375 = vrot.lane.b32.xlu0 %v2995_v59, %s4700_s17 }
 0x21c   : > { %v5960_v60 = vpop.permute.xlu0 %3164  ;;  %v5979_v5 = vpop.permute.xlu1 %3246 }
 0x21d   : > { %v5952_v35 = vld [vmem:[#allocation3 + $0x78] sm:$0xff]   ;;  %v5963_v18 = vld [vmem:[#allocation3 + $0x80] ss:$0 sps:$4 sm:$0x11]  }
 0x21e   : > { %3215 = vrot.lane.b32.xlu1 %v5952_v35, %s4694_s11  ;;  %3332 = vrot.lane.b32.xlu0 %v5952_v35, %s4695_s12  ;;  %v3142_v14 = vrot.slane %v5952_v35, 1  ;;  %v3143_v25 = vrot.slane %v5963_v18, 1  ;;  %v3011_v21 = vshll.u32 %v5952_v35, 16  ;;  %v3009_v46 = vshrl.u32 %v5952_v35, 16 }
 0x21f   : > { %v5973_v11 = vld [vmem:[#allocation3 + $0x6c] sm:$0xff]   ;;  %v5977_v55 = vld [vmem:[#allocation3 + $0x74] ss:$0 sps:$4 sm:$0x11]   ;;  %v3016_v38 = vshll.u32 %v5963_v18, 16 }
 0x220   : > { %v5981_v31 = vpop.permute.xlu0 %3279  ;;  %v5990_v56 = vsel %vm1337_vm9, %v3142_v14, %v3143_v25  ;;  %v3139_v6 = vrot.slane %v5973_v11, 1  ;;  %v3140_v10 = vrot.slane %v5977_v55, 1  ;;  %v3013_v45 = vrot.slane %v3011_v21, 1  ;;  %v6002_v12 = vpop.permute.xlu1 %3084 }
 0x221   : > { %v2999_v34 = vshll.u32 %v5973_v11, 16  ;;  %v3018_v25 = vrot.slane %v3016_v38, 1  ;;  %v2997_v40 = vshrl.u32 %v5973_v11, 16 }
 0x222   : > { %3373 = vrot.lane.b32.xlu1 %v2983_v2, %s4700_s17  ;;  %3256 = vrot.lane.b32.xlu0 %v2983_v2, %s4699_s16  ;;  %v3141_v59 = vsel %vm1337_vm9, %v3139_v6, %v3140_v10  ;;  %v3014_v53 = vor.u32 %v3013_v45, %v3009_v46 }
 0x223   : > { %v3001_v61 = vrot.slane %v2999_v34, 1 }
 0x224   : > { %v4404_v7 = vpop.f32.mrf.mxu0  ;;  %v6004_v29 = vpop.permute.xlu0 %3363  ;;  %v3019_v9 = vsel %vm1112_vm10, %v3014_v53, %v3018_v25 }
 0x225   : > { %v2107_v8 = vadd.f32 %v5970_v3, %v4404_v7  ;;  %v3002_v20 = vor.u32 %v3001_v61, %v2997_v40 }
 0x226   : > { %v2098_v57 = vpop.f32.mrf.mxu0  ;;  %3094 = vrot.lane.b32.xlu1 %v2983_v2, %s4696_s13  ;;  %3213 = vrot.lane.b32.xlu0 %v5973_v11, %s4694_s11 }
 0x227   : > { %v2167_v58 = vmax.f32 %v2107_v8, 0.0  ;;  %v2099_v0 = vadd.f32 %v5970_v3, %v2098_v57  ;;  %v2675_v57 = vld [vmem:[#allocation3 + $0x98] sm:$0x1] }
 0x228   : > { %v4405_v19 = vpop.f32.mrf.mxu0 }
 0x229   : > { %v4327_v17 = vpack.c.bf16 %v2167_v58, %v2167_v58  ;;  %v2165_v27 = vmax.f32 %v2099_v0, 0.0  ;;  %v2110_v13 = vadd.f32 %v5970_v3, %v4405_v19 }
 0x22a   : > { %v2101_v52 = vpop.f32.mrf.mxu0  ;;  %3330 = vrot.lane.b32.xlu1 %v5973_v11, %s4695_s12  ;;  %3414 = vrot.lane.b32.xlu0 %v5990_v56, %s4698_s15 }
 0x22b   : > { %v2461_v33 = vshrl.u32 %v4327_v17, 16  ;;  %v4325_v39 = vpack.c.bf16 %v2165_v27, %v2165_v27  ;;  %v2168_v30 = vmax.f32 %v2110_v13, 0.0  ;;  %v2102_v24 = vadd.f32 %v5970_v3, %v2101_v52 }
 0x22c   : > { %v2464_v50 = vshll.u32 %v4327_v17, 16  ;;  %v3495_v17 = vsel %vm1722_vm14, %v3463_v4, %v5928_v41  ;;  %v3004_v52 = vshll.u32 %v5977_v55, 16  ;;  %v4589_v4 = vld [vmem:[#allocation3 + $0xc] sm:$0xff]  }
 0x22d   : > { %v2463_v16 = vrot.slane %v2461_v33, 7  ;;  %v2444_v15 = vshrl.u32 %v4325_v39, 16  ;;  %v4328_v26 = vpack.c.bf16 %v2168_v30, %v2168_v30  ;;  %v2166_v43 = vmax.f32 %v2102_v24, 0.0  ;;  %v2668_v33 = vld [vmem:[#allocation3 + $0x8c] sm:$0x1] }
 0x22e   : > { %v2447_v54 = vshll.u32 %v4325_v39, 16  ;;  %3297 = vrot.lane.b32.xlu1 %v5990_v56, %s4697_s14  ;;  %3412 = vrot.lane.b32.xlu0 %v3141_v59, %s4698_s15 }
 0x22f   : > { %v2466_v47 = vor.u32 %v2464_v50, %v2463_v16  ;;  %v2446_v48 = vrot.slane %v2444_v15, 7  ;;  %v2469_v51 = vshrl.u32 %v4328_v26, 16  ;;  %v4326_v23 = vpack.c.bf16 %v2166_v43, %v2166_v43 }
 0x230   : > { %v2472_v18 = vshll.u32 %v4328_v26, 16  ;;  %v6016_v7 = vpop.permute.xlu1 %3203  ;;  %v6018_v8 = vpop.permute.xlu0 %3320  ;;  %v2467_v58 = vrot.slane %v2463_v16, 4  ;;  %v3006_v15 = vrot.slane %v3004_v52, 1 }
 0x231   : > { %v2672_v35 = vsel %vm4831_vm7, %v2466_v47, %v2671_v44  ;;  %v2449_v62 = vor.u32 %v2447_v54, %v2446_v48  ;;  %v2471_v2 = vrot.slane %v2469_v51, 7  ;;  %v2452_v14 = vshrl.u32 %v4326_v23, 16 }
 0x232   : > { %2673 = vst [vmem:[#allocation3 + $0x90] sm:$0xf] %v2672_v35  ;;  %3178 = vrot.lane.b32.xlu1 %v3141_v59, %s4693_s10  ;;  %3295 = vrot.lane.b32.xlu0 %v3141_v59, %s4697_s14  ;;  %v2455_v13 = vshll.u32 %v4326_v23, 16  ;;  %v2450_v24 = vrot.slane %v2446_v48, 4  ;;  %v3007_v59 = vsel %vm1112_vm10, %v3002_v20, %v3006_v15  ;;  %v2685_v15 = vld [vmem:[#allocation3 + $0xa8] sm:$0xf] }
 0x233   : > { %v2665_v0 = vsel %vm4831_vm7, %v2449_v62, %v2664_v42  ;;  %v2474_v19 = vor.u32 %v2472_v18, %v2471_v2  ;;  %v2476_v21 = vrot.slane %v2471_v2, 4  ;;  %v2454_v27 = vrot.slane %v2452_v14, 7 }
 0x234   : > { %2666 = vst [vmem:[#allocation3 + $0x84] sm:$0xf] %v2665_v0  ;;  %v3083_v39 = vpop.permute.xlu1 %3082  ;;  %v3245_v30 = vpop.permute.xlu0 %3244 }
 0x235   : > { %v2475_v6 = vsel %vm4839_vm8, %v2467_v58, %v2474_v19  ;;  %v2676_v10 = vsel %vm4785_vm3, %v2476_v21, %v2675_v57  ;;  %v2457_v41 = vor.u32 %v2455_v13, %v2454_v27  ;;  %v2459_v45 = vrot.slane %v2454_v27, 4 }
 0x236   : > { %2674 = vst.msk [vmem:[#allocation3 + $0x94] sm:$0xf] %vm224_vm0, %v2475_v6  ;;  %2677 = vst [vmem:[#allocation3 + $0x98] sm:$0x1] %v2676_v10  ;;  %v3527_v55 = vsel %vm1755_vm15, %v3495_v17, %v3245_v30  ;;  %3262 = vrot.lane.b32.xlu1 %v3019_v9, %s4699_s16  ;;  %3379 = vrot.lane.b32.xlu0 %v3019_v9, %s4700_s17  ;;  %v3433_v42 = vsel %vm1656_vm12, %v4589_v4, %v3083_v39  ;;  %v2678_v4 = vld [vmem:[#allocation3 + $0x9c] sm:$0xf] }
 0x237   : > { %v3559_v34 = vsel %vm1788_vm1, %v3527_v55, %v5981_v31  ;;  %v2458_v16 = vsel %vm4839_vm8, %v2450_v24, %v2457_v41  ;;  %v2669_v50 = vsel %vm4785_vm3, %v2459_v45, %v2668_v33  ;;  %v3465_v2 = vsel %vm1689_vm13, %v3433_v42, %v5958_v63  ;;  %v4590_v33 = vld [vmem:[#allocation3 + $0x18] sm:$0xff]  }
 0x238   : > { %v3591_v26 = vsel %vm1821_vm2, %v3559_v34, %v5915_v49  ;;  %2667 = vst.msk [vmem:[#allocation3 + $0x88] sm:$0xf] %vm224_vm0, %v2458_v16  ;;  %2670 = vst [vmem:[#allocation3 + $0x8c] sm:$0x1] %v2669_v50  ;;  %v6046_v44 = vpop.permute.xlu1 %3318  ;;  %v6048_v31 = vpop.permute.xlu0 %3201  ;;  %v3497_v63 = vsel %vm1722_vm14, %v3465_v2, %v5926_v22  ;;  %v3435_v39 = vsel %vm1656_vm12, %v4590_v33, %v6002_v12 }
 0x239   : > { %v3623_v43 = vsel %vm1854_vm6, %v3591_v26, %v6004_v29  ;;  %v3529_v22 = vsel %vm1755_vm15, %v3497_v63, %v5979_v5 }
 0x23a   : > { %v3655_v46 = vsel %vm6583_vm5, %v3623_v43, %v5944_v37  ;;  %3100 = vrot.lane.b32.xlu1 %v3019_v9, %s4696_s13  ;;  %3260 = vrot.lane.b32.xlu0 %v3007_v59, %s4699_s16  ;;  %vm6586_vm5 = vmmov %vm6584_vm11 }
 0x23b   : > { %4420 = vmatprep.mubr.msk.bf16.mxu1 %vm6584_vm11, %v3655_v46  ;;  %vm6587_vm11 = vmmov %vm6585_vm4 }
 0x23c   : > { %v6058_v49 = vpop.permute.xlu1 %3285  ;;  %v6060_v38 = vpop.permute.xlu0 %3402 }
 0x23d   : > { %v6089_v21 = vld [vmem:[#allocation3 + $0x90] sm:$0xff]  }
 0x23e   : > { %3377 = vrot.lane.b32.xlu1 %v3007_v59, %s4700_s17 }
 0x23f   : > { %v6063_v47 = vld [vmem:[#allocation3 + $0x84] sm:$0xff]   ;;  %v4564_v54 = vld [vmem:[#allocation3 + $0x8c] ss:$0 sps:$4 sm:$0x11]  }
 0x240   : > { %v6065_v29 = vpop.permute.xlu1 %3166  ;;  %v6067_v48 = vpop.permute.xlu0 %3168  ;;  %v3145_v37 = vrot.slane %v6063_v47, 1  ;;  %v3023_v51 = vshll.u32 %v6063_v47, 16  ;;  %v3146_v23 = vrot.slane %v4564_v54, 1  ;;  %v3021_v0 = vshrl.u32 %v6063_v47, 16 }
 0x241   : > { %v3028_v19 = vshll.u32 %v4564_v54, 16 }
 0x242   : > { %3098 = vrot.lane.b32.xlu1 %v3007_v59, %s4696_s13  ;;  %v6075_v35 = vsel %vm1337_vm9, %v3145_v37, %v3146_v23  ;;  %v3025_v57 = vrot.slane %v3023_v51, 1  ;;  %v3561_v37 = vsel %vm1788_vm1, %v3529_v22, %v5942_v28  ;;  %v3467_v51 = vsel %vm1689_vm13, %v3435_v39, %v5960_v60  ;;  %v6118_v23 = vld [vmem:[#allocation3 + $0x98] ss:$0 sps:$4 sm:$0x11]   ;;  %v2689_v60 = vld [vmem:[#allocation3 + $0xb0] sm:$0x1] }
 0x243   : > { %3416 = vrot.lane.b32.xlu0 %v6075_v35, %s4698_s15  ;;  %v3030_v41 = vrot.slane %v3028_v19, 1  ;;  %v3499_v28 = vsel %vm1722_vm14, %v3467_v51, %v6048_v31 }
 0x244   : > { %v4408_v53 = vpop.f32.mrf.mxu0  ;;  %v6077_v62 = vpop.permute.xlu0 %3400  ;;  %v3026_v10 = vor.u32 %v3025_v57, %v3021_v0  ;;  %v3033_v0 = vshrl.u32 %v6089_v21, 16 }
 0x245   : > { %v2123_v61 = vadd.f32 %v5970_v3, %v4408_v53  ;;  %v6083_v25 = vpop.permute.xlu1 %3250 }
 0x246   : > { %v2114_v18 = vpop.f32.mrf.mxu0  ;;  %3334 = vrot.lane.b32.xlu1 %v6063_v47, %s4695_s12  ;;  %v3031_v5 = vsel %vm1112_vm10, %v3026_v10, %v3030_v41  ;;  %v3040_v10 = vshll.u32 %v6118_v23, 16 }
 0x247   : > { %v2171_v14 = vmax.f32 %v2123_v61, 0.0  ;;  %v2115_v40 = vadd.f32 %v5970_v3, %v2114_v18  ;;  %3180 = vrot.lane.b32.xlu0 %v5990_v56, %s4693_s10  ;;  %v3035_v56 = vshll.u32 %v6089_v21, 16 }
 0x248   : > { %v4409_v58 = vpop.f32.mrf.mxu0  ;;  %v6094_v52 = vpop.permute.xlu0 %3283 }
 0x249   : > { %v4331_v17 = vpack.c.bf16 %v2171_v14, %v2171_v14  ;;  %v2169_v27 = vmax.f32 %v2115_v40, 0.0  ;;  %v2126_v13 = vadd.f32 %v5970_v3, %v4409_v58  ;;  %v6106_v50 = vpop.permute.xlu1 %3088  ;;  %v3037_v53 = vrot.slane %v3035_v56, 1 }
 0x24a   : > { %v2117_v6 = vpop.f32.mrf.mxu0  ;;  %3182 = vrot.lane.b32.xlu1 %v6075_v35, %s4693_s10 }
 0x24b   : > { %v2495_v30 = vshrl.u32 %v4331_v17, 16  ;;  %v4329_v9 = vpack.c.bf16 %v2169_v27, %v2169_v27  ;;  %v2172_v20 = vmax.f32 %v2126_v13, 0.0  ;;  %v2118_v24 = vadd.f32 %v5970_v3, %v2117_v6  ;;  %3217 = vrot.lane.b32.xlu0 %v6063_v47, %s4694_s11 }
 0x24c   : > { %v2498_v55 = vshll.u32 %v4331_v17, 16  ;;  %v6108_v12 = vpop.permute.xlu0 %3367  ;;  %v3593_v13 = vsel %vm1821_vm2, %v3561_v37, %v6046_v44 }
 0x24d   : > { %v2497_v45 = vrot.slane %v2495_v30, 7  ;;  %v2478_v34 = vshrl.u32 %v4329_v9, 16  ;;  %v4332_v16 = vpack.c.bf16 %v2172_v20, %v2172_v20  ;;  %v2170_v26 = vmax.f32 %v2118_v24, 0.0 }
 0x24e   : > { %v2481_v46 = vshll.u32 %v4329_v9, 16  ;;  %3381 = vrot.lane.b32.xlu1 %v3031_v5, %s4700_s17  ;;  %v2682_v9 = vld [vmem:[#allocation3 + $0xa4] sm:$0x1]  ;;  %v3038_v24 = vor.u32 %v3037_v53, %v3033_v0 }
 0x24f   : > { %v2500_v43 = vor.u32 %v2498_v55, %v2497_v45  ;;  %v2480_v59 = vrot.slane %v2478_v34, 7  ;;  %v2503_v54 = vshrl.u32 %v4332_v16, 16  ;;  %v4330_v42 = vpack.c.bf16 %v2170_v26, %v2170_v26  ;;  %3264 = vrot.lane.b32.xlu0 %v3031_v5, %s4699_s16 }
 0x250   : > { %v2506_v57 = vshll.u32 %v4332_v16, 16  ;;  %v6122_v14 = vpop.permute.xlu1 %3207  ;;  %v6124_v40 = vpop.permute.xlu0 %3324  ;;  %v2501_v19 = vrot.slane %v2497_v45, 4  ;;  %v3042_v26 = vrot.slane %v3040_v10, 1 }
 0x251   : > { %v2686_v61 = vsel %vm4831_vm7, %v2500_v43, %v2685_v15  ;;  %v2483_v2 = vor.u32 %v2481_v46, %v2480_v59  ;;  %v2505_v18 = vrot.slane %v2503_v54, 7  ;;  %v2486_v58 = vshrl.u32 %v4330_v42, 16 }
 0x252   : > { %2687 = vst [vmem:[#allocation3 + $0xa8] sm:$0xf] %v2686_v61  ;;  %3102 = vrot.lane.b32.xlu1 %v3031_v5, %s4696_s13  ;;  %v2489_v6 = vshll.u32 %v4330_v42, 16  ;;  %v2484_v33 = vrot.slane %v2480_v59, 4  ;;  %v6166_v43 = vsel %vm1112_vm10, %v3038_v24, %v3042_v26  ;;  %v3148_v59 = vrot.slane %v6089_v21, 1 }
 0x253   : > { %v2679_v63 = vsel %vm4831_vm7, %v2483_v2, %v2678_v4  ;;  %v2508_v17 = vor.u32 %v2506_v57, %v2505_v18  ;;  %v2510_v27 = vrot.slane %v2505_v18, 4  ;;  %v2488_v31 = vrot.slane %v2486_v58, 7  ;;  %3299 = vrot.lane.b32.xlu0 %v6075_v35, %s4697_s14 }
 0x254   : > { %2680 = vst [vmem:[#allocation3 + $0x9c] sm:$0xf] %v2679_v63  ;;  %v3366_v20 = vpop.permute.xlu1 %3365  ;;  %v3249_v22 = vpop.permute.xlu0 %3248  ;;  %v3149_v46 = vrot.slane %v6118_v23, 1  ;;  %v4591_v63 = vld [vmem:[#allocation3 + $0x24] sm:$0xff]  }
 0x255   : > { %v2509_v39 = vsel %vm4839_vm8, %v2501_v19, %v2508_v17  ;;  %v2690_v30 = vsel %vm4785_vm3, %v2510_v27, %v2689_v60  ;;  %v2491_v44 = vor.u32 %v2489_v6, %v2488_v31  ;;  %v2493_v41 = vrot.slane %v2488_v31, 4 }
 0x256   : > { %2688 = vst.msk [vmem:[#allocation3 + $0xac] sm:$0xf] %vm224_vm0, %v2509_v39  ;;  %2691 = vst [vmem:[#allocation3 + $0xb0] sm:$0x1] %v2690_v30  ;;  %v3625_v56 = vsel %vm1854_vm6, %v3593_v13, %v3366_v20  ;;  %v3531_v45 = vsel %vm1755_vm15, %v3499_v28, %v3249_v22  ;;  %3219 = vrot.lane.b32.xlu1 %v6089_v21, %s4694_s11  ;;  %v3150_v37 = vsel %vm1337_vm9, %v3148_v59, %v3149_v46 }
 0x257   : > { %v3563_v55 = vsel %vm1788_vm1, %v3531_v45, %v6094_v52  ;;  %v3657_v34 = vsel %vm6585_vm4, %v3625_v56, %v6077_v62  ;;  %v2492_v16 = vsel %vm4839_vm8, %v2484_v33, %v2491_v44  ;;  %v2683_v15 = vsel %vm4785_vm3, %v2493_v41, %v2682_v9  ;;  %3336 = vrot.lane.b32.xlu0 %v6089_v21, %s4695_s12  ;;  %vm6588_vm4 = vmmov %vm6586_vm5 }
 0x258   : > { %v3595_v35 = vsel %vm1821_vm2, %v3563_v55, %v6018_v8  ;;  %4421 = vmatmul.mubr.msk.bf16.vlgmr.msra.gmra.mxu1 %vm6586_vm5, %v3657_v34  ;;  %2681 = vst.msk [vmem:[#allocation3 + $0xa0] sm:$0xf] %vm224_vm0, %v2492_v16  ;;  %2684 = vst [vmem:[#allocation3 + $0xa4] sm:$0x1] %v2683_v15  ;;  %v3087_v52 = vpop.permute.xlu1 %3086  ;;  %v6159_v5 = vpop.permute.xlu0 %3205 }
 0x259   : > { %v3627_v62 = vsel %vm1854_vm6, %v3595_v35, %v6108_v12  ;;  %v3437_v17 = vsel %vm1656_vm12, %v4591_v63, %v3087_v52  ;;  %v2699_v52 = vld [vmem:[#allocation3 + $0xc0] sm:$0xf] }
 0x25a   : > { %v3659_v8 = vsel %vm6587_vm11, %v3627_v62, %v6060_v38  ;;  %3266 = vrot.lane.b32.xlu1 %v6166_v43, %s4699_s16  ;;  %v3469_v22 = vsel %vm1689_vm13, %v3437_v17, %v6065_v29 }
 0x25b   : > { %4424 = vmatprep.mubr.msk.bf16.mxu1 %vm6588_vm4, %v3659_v8  ;;  %3383 = vrot.lane.b32.xlu0 %v6166_v43, %s4700_s17  ;;  %v3501_v29 = vsel %vm1722_vm14, %v3469_v22, %v6016_v7 }
 0x25c   : > { %v6175_v54 = vpop.permute.xlu1 %3322  ;;  %v6177_v12 = vpop.permute.xlu0 %3406 }
 0x25e   : > { %3301 = vrot.lane.b32.xlu1 %v3150_v37, %s4697_s14 }
 0x25f   : > { %v6183_v38 = vld [vmem:[#allocation3 + $0x9c] sm:$0xff]   ;;  %v4571_v42 = vld [vmem:[#allocation3 + $0xa4] ss:$0 sps:$4 sm:$0x11]   ;;  %3418 = vrot.lane.b32.xlu0 %v3150_v37, %s4698_s15 }
 0x260   : > { %v6185_v4 = vpop.permute.xlu1 %3289  ;;  %v6189_v53 = vpop.permute.xlu0 %3172  ;;  %v3151_v61 = vrot.slane %v6183_v38, 1  ;;  %v3047_v2 = vshll.u32 %v6183_v38, 16  ;;  %v3152_v57 = vrot.slane %v4571_v42, 1  ;;  %v3052_v28 = vshll.u32 %v4571_v42, 16 }
 0x261   : > { %v4412_v51 = vpop.f32.mrf.mxu0  ;;  %v3045_v0 = vshrl.u32 %v6183_v38, 16 }
 0x262   : > { %v2139_v23 = vadd.f32 %v5970_v3, %v4412_v51  ;;  %3338 = vrot.lane.b32.xlu1 %v6183_v38, %s4695_s12  ;;  %v3049_v19 = vrot.slane %v3047_v2, 1  ;;  %v6199_v13 = vsel %vm1337_vm9, %v3151_v61, %v3152_v57  ;;  %v3054_v20 = vrot.slane %v3052_v28, 1  ;;  %v2692_v51 = vld [vmem:[#allocation3 + $0xb4] sm:$0xf]  ;;  %v6222_v61 = vld [vmem:[#allocation3 + $0xa8] sm:$0xff]  }
 0x263   : > { %v2130_v18 = vpop.f32.mrf.mxu0  ;;  %3420 = vrot.lane.b32.xlu0 %v6199_v13, %s4698_s15  ;;  %v3533_v28 = vsel %vm1755_vm15, %v3501_v29, %v6083_v25  ;;  %v3059_v25 = vshll.u32 %v6222_v61, 16  ;;  %v3057_v29 = vshrl.u32 %v6222_v61, 16 }
 0x264   : > { %v2175_v60 = vmax.f32 %v2139_v23, 0.0  ;;  %v2131_v58 = vadd.f32 %v5970_v3, %v2130_v18  ;;  %v6201_v31 = vpop.permute.xlu1 %3170  ;;  %v6206_v39 = vpop.permute.xlu0 %3404  ;;  %v3050_v30 = vor.u32 %v3049_v19, %v3045_v0 }
 0x265   : > { %v4413_v27 = vpop.f32.mrf.mxu0 }
 0x266   : > { %v4335_v6 = vpack.c.bf16 %v2175_v60, %v2175_v60  ;;  %v2173_v10 = vmax.f32 %v2131_v58, 0.0  ;;  %v2142_v33 = vadd.f32 %v5970_v3, %v4413_v27  ;;  %v3055_v45 = vsel %vm1112_vm10, %v3050_v30, %v3054_v20  ;;  %v2703_v60 = vld [vmem:[#allocation3 + $0xc8] sm:$0x1]  ;;  %v4592_v27 = vld [vmem:[#allocation3 + $0x30] sm:$0xff]   ;;  %v2696_v20 = vld [vmem:[#allocation3 + $0xbc] sm:$0x1] }
 0x267   : > { %v2133_v9 = vpop.f32.mrf.mxu0  ;;  %3385 = vrot.lane.b32.xlu1 %v3055_v45, %s4700_s17  ;;  %3184 = vrot.lane.b32.xlu0 %v3150_v37, %s4693_s10  ;;  %v3565_v30 = vsel %vm1788_vm1, %v3533_v28, %v6058_v49  ;;  %v4573_v49 = vld [vmem:[#allocation3 + $0xb0] ss:$0 sps:$4 sm:$0x11]  }
 0x268   : > { %v2529_v24 = vshrl.u32 %v4335_v6, 16  ;;  %v4333_v44 = vpack.c.bf16 %v2173_v10, %v2173_v10  ;;  %v2176_v41 = vmax.f32 %v2142_v33, 0.0  ;;  %v2134_v56 = vadd.f32 %v5970_v3, %v2133_v9  ;;  %v6212_v55 = vpop.permute.xlu1 %3254  ;;  %v6216_v26 = vpop.permute.xlu0 %3287 }
 0x269   : > { %v2532_v16 = vshll.u32 %v4335_v6, 16 }
 0x26a   : > { %v2531_v34 = vrot.slane %v2529_v24, 7  ;;  %v2512_v15 = vshrl.u32 %v4333_v44, 16  ;;  %v4336_v35 = vpack.c.bf16 %v2176_v41, %v2176_v41  ;;  %v2174_v62 = vmax.f32 %v2134_v56, 0.0 }
 0x26b   : > { %v2515_v59 = vshll.u32 %v4333_v44, 16  ;;  %3104 = vrot.lane.b32.xlu1 %v6166_v43, %s4696_s13  ;;  %3221 = vrot.lane.b32.xlu0 %v6183_v38, %s4694_s11  ;;  %v3439_v43 = vsel %vm1656_vm12, %v4592_v27, %v6106_v50  ;;  %v3597_v56 = vsel %vm1821_vm2, %v3565_v30, %v6175_v54 }
 0x26c   : > { %v2534_v3 = vor.u32 %v2532_v16, %v2531_v34  ;;  %v2514_v8 = vrot.slane %v2512_v15, 7  ;;  %v2537_v46 = vshrl.u32 %v4336_v35, 16  ;;  %v4334_v42 = vpack.c.bf16 %v2174_v62, %v2174_v62  ;;  %v6220_v23 = vpop.permute.xlu1 %3092  ;;  %v3372_v7 = vpop.permute.xlu0 %3371 }
 0x26d   : > { %v2540_v57 = vshll.u32 %v4336_v35, 16  ;;  %v2535_v0 = vrot.slane %v2531_v34, 4  ;;  %v3471_v41 = vsel %vm1689_vm13, %v3439_v43, %v6067_v48  ;;  %v3061_v15 = vrot.slane %v3059_v25, 1 }
 0x26e   : > { %v2700_v37 = vsel %vm4831_vm7, %v2534_v3, %v2699_v52  ;;  %v2517_v2 = vor.u32 %v2515_v59, %v2514_v8  ;;  %v2539_v18 = vrot.slane %v2537_v46, 7  ;;  %v2520_v58 = vshrl.u32 %v4334_v42, 16 }
 0x26f   : > { %2701 = vst [vmem:[#allocation3 + $0xc0] sm:$0xf] %v2700_v37  ;;  %v2523_v10 = vshll.u32 %v4334_v42, 16  ;;  %3106 = vrot.lane.b32.xlu1 %v3055_v45, %s4696_s13  ;;  %3268 = vrot.lane.b32.xlu0 %v3055_v45, %s4699_s16  ;;  %v2518_v22 = vrot.slane %v2514_v8, 4  ;;  %v3503_v35 = vsel %vm1722_vm14, %v3471_v41, %v6159_v5  ;;  %v3064_v5 = vshll.u32 %v4573_v49, 16 }
 0x270   : > { %v2693_v19 = vsel %vm4831_vm7, %v2517_v2, %v2692_v51  ;;  %v2542_v63 = vor.u32 %v2540_v57, %v2539_v18  ;;  %v2544_v17 = vrot.slane %v2539_v18, 4  ;;  %v2522_v6 = vrot.slane %v2520_v58, 7  ;;  %v6236_v33 = vpop.permute.xlu1 %3211  ;;  %v6247_v50 = vpop.permute.xlu0 %3328 }
 0x271   : > { %2694 = vst [vmem:[#allocation3 + $0xb4] sm:$0xf] %v2693_v19  ;;  %v3062_v3 = vor.u32 %v3061_v15, %v3057_v29  ;;  %v3154_v46 = vrot.slane %v6222_v61, 1  ;;  %v3155_v42 = vrot.slane %v4573_v49, 1 }
 0x272   : > { %v2543_v32 = vsel %vm4839_vm8, %v2535_v0, %v2542_v63  ;;  %v2704_v9 = vsel %vm4785_vm3, %v2544_v17, %v2703_v60  ;;  %v2525_v24 = vor.u32 %v2523_v10, %v2522_v6  ;;  %v2527_v44 = vrot.slane %v2522_v6, 4  ;;  %v4593_v6 = vld [vmem:[#allocation3 + $0x3c] sm:$0xff]  }
 0x273   : > { %2702 = vst.msk [vmem:[#allocation3 + $0xc4] sm:$0xf] %vm224_vm0, %v2543_v32  ;;  %2705 = vst [vmem:[#allocation3 + $0xc8] sm:$0x1] %v2704_v9  ;;  %3186 = vrot.lane.b32.xlu1 %v6199_v13, %s4693_s10  ;;  %3303 = vrot.lane.b32.xlu0 %v6199_v13, %s4697_s14  ;;  %v3156_v57 = vsel %vm1337_vm9, %v3154_v46, %v3155_v42 }
 0x274   : > { %v2526_v34 = vsel %vm4839_vm8, %v2518_v22, %v2525_v24  ;;  %v2697_v45 = vsel %vm4785_vm3, %v2527_v44, %v2696_v20  ;;  %v3370_v16 = vpop.permute.xlu1 %3369  ;;  %v3253_v48 = vpop.permute.xlu0 %3252  ;;  %vm6589_vm3 = vmmov %vm6587_vm11 }
 0x275   : > { %2695 = vst.msk [vmem:[#allocation3 + $0xb8] sm:$0xf] %vm224_vm0, %v2526_v34  ;;  %2698 = vst [vmem:[#allocation3 + $0xbc] sm:$0x1] %v2697_v45  ;;  %v3629_v36 = vsel %vm1854_vm6, %v3597_v56, %v3370_v16  ;;  %v3535_v1 = vsel %vm1755_vm15, %v3503_v35, %v3253_v48  ;;  %v4594_v45 = vld [vmem:[#allocation3 + $0x48] sm:$0xff]  }
 0x276   : > { %v3661_v54 = vsel %vm6589_vm3, %v3629_v36, %v6206_v39  ;;  %v3567_v52 = vsel %vm1788_vm1, %v3535_v1, %v6216_v26  ;;  %vm6590_vm0 = vmmov %vm6588_vm4  ;;  %v3066_v26 = vrot.slane %v3064_v5, 1  ;;  %v3443_v16 = vsel %vm1656_vm12, %v4594_v45, %v6220_v23 }
 0x277   : > { %4425 = vmatmul.mubr.msk.bf16.gmra.mxu1 %vm6590_vm0, %v3661_v54  ;;  %v3599_v62 = vsel %vm1821_vm2, %v3567_v52, %v6124_v40  ;;  %3223 = vrot.lane.b32.xlu1 %v6222_v61, %s4694_s11  ;;  %vm6591_vm7 = vmmov %vm6589_vm3 }
 0x278   : > { %v3091_v13 = vpop.permute.xlu1 %3090  ;;  %3340 = vrot.lane.b32.xlu0 %v6222_v61, %s4695_s12  ;;  %v3210_v39 = vpop.permute.xlu0 %3209  ;;  %v3631_v8 = vsel %vm1854_vm6, %v3599_v62, %v3372_v7  ;;  %vm6592_vm8 = vmmov %vm6590_vm0  ;;  %v3067_v40 = vsel %vm1112_vm10, %v3062_v3, %v3066_v26 }
 0x279   : > { %v3663_v59 = vsel %vm6591_vm7, %v3631_v8, %v6177_v12  ;;  %v3441_v10 = vsel %vm1656_vm12, %v4593_v6, %v3091_v13  ;;  %vm6593_vm5 = vmmov %vm6589_vm3 }
 0x27a   : > { %4428 = vmatprep.mubr.msk.bf16.mxu1 %vm6592_vm8, %v3663_v59  ;;  %v3473_v32 = vsel %vm1689_vm13, %v3441_v10, %v6201_v31  ;;  %v4576_v49 = vld [vmem:[#allocation3 + $0xc0] sm:$0xff]   ;;  %v4577_v35 = vld [vmem:[#allocation3 + $0xc8] ss:$0 sps:$4 sm:$0x11]   ;;  %vm6594_vm11 = vmmov %vm6590_vm0 }
 0x27b   : > { %3270 = vrot.lane.b32.xlu1 %v3067_v40, %s4699_s16  ;;  %v3505_v24 = vsel %vm1722_vm14, %v3473_v32, %v6122_v14  ;;  %v3235_v34 = vshll.u32 %v4576_v49, 16  ;;  %v3233_v52 = vshrl.u32 %v4576_v49, 16  ;;  %v3240_v62 = vshll.u32 %v4577_v35, 16  ;;  %vm6595_vm4 = vmmov %vm6589_vm3 }
 0x27c   : > { %v3327_v51 = vpop.permute.xlu1 %3326  ;;  %v6285_v37 = vld [vmem:[#allocation3 + $0xb4] sm:$0xff]   ;;  %3387 = vrot.lane.b32.xlu0 %v3067_v40, %s4700_s17  ;;  %v6289_v2 = vpop.permute.xlu0 %3410  ;;  %v4575_v18 = vld [vmem:[#allocation3 + $0xbc] ss:$0 sps:$4 sm:$0x11]   ;;  %v3537_v41 = vsel %vm1755_vm15, %v3505_v24, %v6212_v55  ;;  %v3475_v55 = vsel %vm1689_vm13, %v3443_v16, %v6189_v53  ;;  %v4578_v53 = vld [vmem:[#allocation3 + $0xcc] sm:$0xff]  }
 0x27d   : > { %v3071_v12 = vshll.u32 %v6285_v37, 16  ;;  %v3157_v28 = vrot.slane %v6285_v37, 1  ;;  %v3158_v60 = vrot.slane %v4575_v18, 1  ;;  %v3069_v19 = vshrl.u32 %v6285_v37, 16  ;;  %vm6596_vm3 = vmmov %vm6590_vm0 }
 0x27e   : > { %v3076_v63 = vshll.u32 %v4575_v18, 16  ;;  %v3569_v14 = vsel %vm1788_vm1, %v3537_v41, %v6185_v4  ;;  %v3237_v1 = vrot.slane %v3235_v34, 1  ;;  %v3507_v54 = vsel %vm1722_vm14, %v3475_v55, %v3210_v39  ;;  %v4596_v34 = vld [vmem:[#allocation3 + $0x60] sm:$0xff]   ;;  %vm6600_vm7 = vmmov %vm6596_vm3 }
 0x27f   : > { %v3073_v58 = vrot.slane %v3071_v12, 1  ;;  %3305 = vrot.lane.b32.xlu1 %v3156_v57, %s4697_s14  ;;  %v3159_v17 = vsel %vm1337_vm9, %v3157_v28, %v3158_v60  ;;  %v3601_v36 = vsel %vm1821_vm2, %v3569_v14, %v3327_v51  ;;  %v4579_v51 = vld [vmem:[#allocation3 + $0xd4] ss:$0 sps:$4 sm:$0x11]   ;;  %v3354_v42 = vshll.u32 %v4578_v53, 16 }
 0x280   : > { %v6293_v7 = vpop.permute.xlu1 %3293  ;;  %3422 = vrot.lane.b32.xlu0 %v3156_v57, %s4698_s15  ;;  %v6298_v0 = vpop.permute.xlu0 %3176  ;;  %v3078_v30 = vrot.slane %v3076_v63, 1  ;;  %v3238_v8 = vor.u32 %v3237_v1, %v3233_v52  ;;  %v3276_v12 = vrot.slane %v4576_v49, 1  ;;  %v3352_v60 = vshrl.u32 %v4578_v53, 16 }
 0x281   : > { %v3074_v43 = vor.u32 %v3073_v58, %v3069_v19  ;;  %v3356_v58 = vrot.slane %v3354_v42, 1  ;;  %v3359_v19 = vshll.u32 %v4579_v51, 16  ;;  %v3395_v24 = vrot.slane %v4578_v53, 1 }
 0x283   : > { %3342 = vrot.lane.b32.xlu1 %v6285_v37, %s4695_s12  ;;  %v3079_v9 = vsel %vm1112_vm10, %v3074_v43, %v3078_v30  ;;  %v3357_v10 = vor.u32 %v3356_v58, %v3352_v60 }
 0x284   : > { %v6302_v27 = vpop.permute.xlu1 %3174  ;;  %3424 = vrot.lane.b32.xlu0 %v3159_v17, %s4698_s15  ;;  %v3409_v25 = vpop.permute.xlu0 %3408 }
 0x287   : > { %3389 = vrot.lane.b32.xlu1 %v3079_v9, %s4700_s17 }
 0x288   : > { %v6311_v20 = vpop.permute.xlu1 %3258  ;;  %3188 = vrot.lane.b32.xlu0 %v3156_v57, %s4693_s10  ;;  %v3292_v22 = vpop.permute.xlu0 %3291  ;;  %v3277_v57 = vrot.slane %v4577_v35, 1 }
 0x28b   : > { %3108 = vrot.lane.b32.xlu1 %v3067_v40, %s4696_s13  ;;  %v3242_v40 = vrot.slane %v3240_v62, 1 }
 0x28c   : > { %v6317_v44 = vpop.permute.xlu1 %3096  ;;  %3225 = vrot.lane.b32.xlu0 %v6285_v37, %s4694_s11  ;;  %v3376_v31 = vpop.permute.xlu0 %3375 }
 0x28d   : > { %v3243_v18 = vsel %vm1112_vm10, %v3238_v8, %v3242_v40  ;;  %v3447_v45 = vsel %vm1656_vm12, %v4596_v34, %v6317_v44 }
 0x28e   : > { %v3479_v35 = vsel %vm1689_vm13, %v3447_v45, %v6298_v0 }
 0x28f   : > { %3110 = vrot.lane.b32.xlu1 %v3079_v9, %s4696_s13 }
 0x290   : > { %v6324_v56 = vpop.permute.xlu1 %3215  ;;  %3272 = vrot.lane.b32.xlu0 %v3079_v9, %s4699_s16  ;;  %v6332_v15 = vpop.permute.xlu0 %3332 }
 0x293   : > { %3190 = vrot.lane.b32.xlu1 %v3159_v17, %s4693_s10 }
 0x294   : > { %v3374_v48 = vpop.permute.xlu1 %3373  ;;  %3307 = vrot.lane.b32.xlu0 %v3159_v17, %s4697_s14  ;;  %v3257_v23 = vpop.permute.xlu0 %3256  ;;  %v4595_v17 = vld [vmem:[#allocation3 + $0x54] sm:$0xff]  }
 0x295   : > { %v3633_v4 = vsel %vm1854_vm6, %v3601_v36, %v3374_v48  ;;  %v3539_v29 = vsel %vm1755_vm15, %v3507_v54, %v3257_v23 }
 0x296   : > { %v3665_v5 = vsel %vm6593_vm5, %v3633_v4, %v3409_v25  ;;  %v3571_v13 = vsel %vm1788_vm1, %v3539_v29, %v3292_v22  ;;  %v3361_v25 = vrot.slane %v3359_v19, 1  ;;  %vm6602_vm5 = vmmov %vm6596_vm3 }
 0x297   : > { %4429 = vmatmul.mubr.msk.bf16.gmra.mxu1 %vm6594_vm11, %v3665_v5  ;;  %v3603_v3 = vsel %vm1821_vm2, %v3571_v13, %v6247_v50  ;;  %3227 = vrot.lane.b32.xlu1 %v4576_v49, %s4694_s11 }
 0x298   : > { %v3095_v39 = vpop.permute.xlu1 %3094  ;;  %3344 = vrot.lane.b32.xlu0 %v4576_v49, %s4695_s12  ;;  %v3214_v59 = vpop.permute.xlu0 %3213  ;;  %v3635_v26 = vsel %vm1854_vm6, %v3603_v3, %v3376_v31  ;;  %v3362_v22 = vsel %vm1112_vm10, %v3357_v10, %v3361_v25  ;;  %v3396_v49 = vrot.slane %v4579_v51, 1  ;;  %vm6598_vm10 = vmmov %vm6590_vm0 }
 0x299   : > { %v3667_v46 = vsel %vm6595_vm4, %v3635_v26, %v6289_v2  ;;  %v3278_v2 = vsel %vm1337_vm9, %v3276_v12, %v3277_v57  ;;  %v3445_v43 = vsel %vm1656_vm12, %v4595_v17, %v3095_v39  ;;  %v3511_v36 = vsel %vm1722_vm14, %v3479_v35, %v3214_v59  ;;  %vm6599_vm0 = vmmov %vm6595_vm4 }
 0x29a   : > { %4432 = vmatprep.mubr.msk.bf16.mxu1 %vm6596_vm3, %v3667_v46  ;;  %v3477_v30 = vsel %vm1689_vm13, %v3445_v43, %v6302_v27  ;;  %v3397_v14 = vsel %vm1337_vm9, %v3395_v24, %v3396_v49  ;;  %vm6597_vm9 = vmmov %vm6595_vm4 }
 0x29b   : > { %3274 = vrot.lane.b32.xlu1 %v3243_v18, %s4699_s16  ;;  %v3509_v31 = vsel %vm1722_vm14, %v3477_v30, %v6236_v33  ;;  %vm6601_vm8 = vmmov %vm6599_vm0 }
 0x29c   : > { %v3331_v50 = vpop.permute.xlu1 %3330  ;;  %3391 = vrot.lane.b32.xlu0 %v3243_v18, %s4700_s17  ;;  %v3415_v28 = vpop.permute.xlu0 %3414  ;;  %v3541_v27 = vsel %vm1755_vm15, %v3509_v31, %v6311_v20  ;;  %vm6603_vm11 = vmmov %vm6599_vm0 }
 0x29d   : > { %v3573_v33 = vsel %vm1788_vm1, %v3541_v27, %v6293_v7  ;;  %vm6604_vm4 = vmmov %vm6596_vm3 }
 0x29e   : > { %v3605_v20 = vsel %vm1821_vm2, %v3573_v33, %v3331_v50  ;;  %vm6605_vm3 = vmmov %vm6599_vm0 }
 0x29f   : > { %3309 = vrot.lane.b32.xlu1 %v3278_v2, %s4697_s14  ;;  %s4337_s14 = sshll.u32 %s4753_s22, 7  ;;  %s4636_s22 = scalar_lea.vmem %s4635_s8, 256 }
 0x2a0   : > { %v3298_v63 = vpop.permute.xlu1 %3297  ;;  %3426 = vrot.lane.b32.xlu0 %v3278_v2, %s4698_s15  ;;  %v3413_v6 = vpop.permute.xlu0 %3412  ;;  %s4087_s30 = scalar_lea.hbm %s6567_s5, %s4337_s14 }
 0x2a3   : > { %3346 = vrot.lane.b32.xlu1 %v4578_v53, %s4695_s12  ;;  %s215_s12 = sand.u32 1, %s4682_s19  }
 0x2a4   : > { %v3179_v32 = vpop.permute.xlu1 %3178  ;;  %v3296_v9 = vpop.permute.xlu0 %3295  ;;  %s4152_s13 = sshll.u32 %s215_s12, 3 }
 0x2a7   : > { %3393 = vrot.lane.b32.xlu1 %v3362_v22, %s4700_s17 }
 0x2a8   : > { %v3263_v41 = vpop.permute.xlu1 %3262  ;;  %v3380_v16 = vpop.permute.xlu0 %3379 }
 0x2ab   : > { %3428 = vrot.lane.b32.xlu1 %v3397_v14, %s4698_s15  ;;  %s217_s15 = scalar_lea.vmem [#allocation4], %s4152_s13 }
 0x2ac   : > { %v3101_v55 = vpop.permute.xlu1 %3100  ;;  %v3261_v44 = vpop.permute.xlu0 %3260  ;;  %s4089_s16 = sshll.u32 %s217_s15, 4  ;;  %s4090_s16 = int_to_ptr.vmem [resolvable:$true] %s4089_s16 }
 0x2ad   : > { %v3543_v48 = vsel %vm1755_vm15, %v3511_v36, %v3261_v44  ;;  %s4630_s6 = scalar_lea.vmem %s4090_s16, 128  ;;  %p4637_p0 = scmp.lt.s32.totalorder %s4090_s16, %s4635_s8 }
 0x2ae   : > { %v3575_v1 = vsel %vm1788_vm1, %v3543_v48, %v3296_v9  ;;  %p4631_p11 = scmp.ne.s32.totalorder %s4090_s16, %s4630_s6  ;;  %p4638_p1 = scmp.lt.s32.totalorder %s4636_s22, %s4630_s6 }
 0x2af   : > { %v3607_v54 = vsel %vm1821_vm2, %v3575_v1, %v6332_v15 }
 0x2b0   : > { %v3378_v4 = vpop.permute.xlu1 %3377  ;;  %v3639_v23 = vsel %vm1854_vm6, %v3607_v54, %v3380_v16  ;;  %p4632_p12 = pnand %p4631_p11, %p4770_p5  ;;  %p4639_p2 = por %p4638_p1, %p4637_p0 }
 0x2b1   : > { %v3637_v0 = vsel %vm1854_vm6, %v3605_v20, %v3378_v4  ;;  %v3671_v7 = vsel %vm6599_vm0, %v3639_v23, %v3415_v28  ;;  %v4597_v28 = vld [vmem:[#allocation3 + $0x78] sm:$0xff]  }
 0x2b2   : > { %v3669_v29 = vsel %vm6597_vm9, %v3637_v0, %v3413_v6  ;;  %v3451_v60 = vsel %vm1656_vm12, %v4597_v28, %v3101_v55  ;;  %vm6606_vm9 = vmmov %vm6604_vm4  ;;  %p4633_p13 = pneg %p4632_p12 }
 0x2b3   : > { %4433 = vmatmul.mubr.msk.bf16.gmra.mxu1 %vm6598_vm10, %v3669_v29  ;;  %vm6607_vm10 = vmmov %vm6599_vm0 }
 0x2b4   : > { %v3099_v5 = vpop.permute.xlu1 %3098  ;;  %4436 = vmatprep.mubr.msk.bf16.mxu1 %vm6600_vm7, %v3671_v7  ;;  %vm6608_vm0 = vmmov %vm6604_vm4  ;;  %p4640_p3 = pnand %p4639_p2, %p4633_p13 }
 0x2b5   : > { %v3449_v52 = vsel %vm1656_vm12, %v5973_v11, %v3099_v5  ;;  %v3417_v53 = vpop.permute.xlu0 %3416  ;;  %vm6609_vm7 = vmmov %vm6605_vm3 }
 0x2b6   : > { %v3481_v62 = vsel %vm1689_vm13, %v3449_v52, %v3179_v32 }
 0x2b7   : > { %v3513_v15 = vsel %vm1722_vm14, %v3481_v62, %v6324_v56 }
 0x2b8   : > { %v3335_v13 = vpop.permute.xlu1 %3334  ;;  %v3545_v3 = vsel %vm1755_vm15, %v3513_v15, %v3263_v41 }
 0x2b9   : > { %v3181_v39 = vpop.permute.xlu0 %3180  ;;  %v3577_v59 = vsel %vm1788_vm1, %v3545_v3, %v3298_v63 }
 0x2ba   : > { %v3609_v46 = vsel %vm1821_vm2, %v3577_v59, %v3335_v13  ;;  %v3483_v58 = vsel %vm1689_vm13, %v3451_v60, %v3181_v39 }
 0x2bc   : > { %v3183_v8 = vpop.permute.xlu1 %3182 }
 0x2bd   : > { %v3218_v26 = vpop.permute.xlu0 %3217 }
 0x2be   : > { %v3515_v19 = vsel %vm1722_vm14, %v3483_v58, %v3218_v26 }
 0x2c0   : > { %v3382_v40 = vpop.permute.xlu1 %3381 }
 0x2c1   : > { %v3641_v51 = vsel %vm1854_vm6, %v3609_v46, %v3382_v40  ;;  %v3265_v42 = vpop.permute.xlu0 %3264 }
 0x2c2   : > { %v3673_v11 = vsel %vm6601_vm8, %v3641_v51, %v3417_v53  ;;  %v3547_v63 = vsel %vm1755_vm15, %v3515_v19, %v3265_v42  ;;  %vm6610_vm8 = vmmov %vm6608_vm0 }
 0x2c3   : > { %4437 = vmatmul.mubr.msk.bf16.gmra.mxu1 %vm6602_vm5, %v3673_v11  ;;  %vm6611_vm5 = vmmov %vm6605_vm3 }
 0x2c4   : > { %v3103_v56 = vpop.permute.xlu1 %3102 }
 0x2c5   : > { %v3300_v18 = vpop.permute.xlu0 %3299  ;;  %v3453_v30 = vsel %vm1656_vm12, %v6063_v47, %v3103_v56 }
 0x2c6   : > { %v3579_v43 = vsel %vm1788_vm1, %v3547_v63, %v3300_v18  ;;  %v3485_v22 = vsel %vm1689_vm13, %v3453_v30, %v3183_v8 }
 0x2c8   : > { %v3220_v50 = vpop.permute.xlu1 %3219 }
 0x2c9   : > { %v3337_v12 = vpop.permute.xlu0 %3336  ;;  %v3517_v49 = vsel %vm1722_vm14, %v3485_v22, %v3220_v50 }
 0x2ca   : > { %v3611_v6 = vsel %vm1821_vm2, %v3579_v43, %v3337_v12 }
 0x2cc   : > { %v3267_v57 = vpop.permute.xlu1 %3266 }
 0x2cd   : > { %v3384_v2 = vpop.permute.xlu0 %3383  ;;  %v3549_v31 = vsel %vm1755_vm15, %v3517_v49, %v3267_v57  ;;  %v6454_v49 = vld [vmem:[%s6566_s4] ss:$0 sm:$0xff] }
 0x2ce   : > { %v3643_v10 = vsel %vm1854_vm6, %v3611_v6, %v3384_v2 }
 0x2d0   : > { %v3302_v17 = vpop.permute.xlu1 %3301 }
 0x2d1   : > { %v3419_v25 = vpop.permute.xlu0 %3418  ;;  %v3581_v41 = vsel %vm1788_vm1, %v3549_v31, %v3302_v17 }
 0x2d2   : > { %v3675_v32 = vsel %vm6603_vm11, %v3643_v10, %v3419_v25  ;;  %vm6612_vm11 = vmmov %vm6608_vm0 }
 0x2d3   : > { %4440 = vmatprep.mubr.msk.bf16.mxu1 %vm6604_vm4, %v3675_v32 }
 0x2d4   : > { %v3339_v9 = vpop.permute.xlu1 %3338 }
 0x2d5   : > { %v3421_v24 = vpop.permute.xlu0 %3420  ;;  %v3613_v34 = vsel %vm1821_vm2, %v3581_v41, %v3339_v9 }
 0x2d9   : > { %v3386_v45 = vpop.permute.xlu1 %3385  ;;  %v3185_v16 = vpop.permute.xlu0 %3184 }
 0x2da   : > { %v3645_v47 = vsel %vm1854_vm6, %v3613_v34, %v3386_v45  ;;  %v4598_v45 = vld [vmem:[%s4817_s9] sm:$0xf] }
 0x2db   : > { %v3677_v27 = vsel %vm6605_vm3, %v3645_v47, %v3421_v24 }
 0x2dc   : > { %4441 = vmatmul.mubr.msk.bf16.gmra.mxu1 %vm6606_vm9, %v3677_v27 }
 0x2dd   : > { %v3105_v14 = vpop.permute.xlu1 %3104  ;;  %v3222_v35 = vpop.permute.xlu0 %3221 }
 0x2de   : > { %v3455_v33 = vsel %vm1656_vm12, %v6089_v21, %v3105_v14 }
 0x2df   : > { %v3487_v1 = vsel %vm1689_vm13, %v3455_v33, %v3185_v16  ;;  %v3941_v16 = vunpack.c.l.bf16 %v4598_v45  ;;  %v4599_v33 = vld [vmem:[%s4817_s9 + $0x4] sm:$0xf] }
 0x2e0   : > { %v3519_v4 = vsel %vm1722_vm14, %v3487_v1, %v3222_v35 }
 0x2e1   : > { %v3107_v55 = vpop.permute.xlu1 %3106  ;;  %v3269_v36 = vpop.permute.xlu0 %3268 }
 0x2e2   : > { %v3551_v29 = vsel %vm1755_vm15, %v3519_v4, %v3269_v36  ;;  %v3457_v53 = vsel %vm1656_vm12, %v6183_v38, %v3107_v55 }
 0x2e5   : > { %v3187_v44 = vpop.permute.xlu1 %3186  ;;  %v3304_v48 = vpop.permute.xlu0 %3303 }
 0x2e6   : > { %v3583_v7 = vsel %vm1788_vm1, %v3551_v29, %v3304_v48  ;;  %v3489_v13 = vsel %vm1689_vm13, %v3457_v53, %v3187_v44  ;;  %v3942_v44 = vunpack.c.l.bf16 %v4599_v33 }
 0x2e9   : > { %v3224_v20 = vpop.permute.xlu1 %3223 }
 0x2ea   : > { %v3341_v54 = vpop.permute.xlu0 %3340  ;;  %v3521_v8 = vsel %vm1722_vm14, %v3489_v13, %v3224_v20  ;;  %v4601_v13 = vld [vmem:[%s4817_s9 + $0xc] sm:$0xf] }
 0x2eb   : > { %v3615_v5 = vsel %vm1821_vm2, %v3583_v7, %v3341_v54 }
 0x2ed   : > { %v3271_v0 = vpop.permute.xlu1 %3270 }
 0x2ee   : > { %v3388_v23 = vpop.permute.xlu0 %3387  ;;  %v3553_v59 = vsel %vm1755_vm15, %v3521_v8, %v3271_v0 }
 0x2ef   : > { %v3647_v52 = vsel %vm1854_vm6, %v3615_v5, %v3388_v23  ;;  %v4600_v5 = vld [vmem:[%s4817_s9 + $0x8] sm:$0xf] }
 0x2f1   : > { %v3306_v62 = vpop.permute.xlu1 %3305 }
 0x2f2   : > { %v3423_v21 = vpop.permute.xlu0 %3422  ;;  %v3585_v26 = vsel %vm1788_vm1, %v3553_v59, %v3306_v62 }
 0x2f3   : > { %v3679_v15 = vsel %vm6607_vm10, %v3647_v52, %v3423_v21  ;;  %v3943_v52 = vunpack.c.l.bf16 %v4600_v5 }
 0x2f4   : > { %4444 = vmatprep.mubr.msk.bf16.mxu1 %vm6608_vm0, %v3679_v15 }
 0x2f5   : > { %v3343_v3 = vpop.permute.xlu1 %3342 }
 0x2f6   : > { %v3425_v39 = vpop.permute.xlu0 %3424  ;;  %v3617_v46 = vsel %vm1821_vm2, %v3585_v26, %v3343_v3  ;;  %v3944_v3 = vunpack.c.l.bf16 %v4601_v13 }
 0x2f9   : > { %v3390_v40 = vpop.permute.xlu1 %3389 }
 0x2fa   : > { %v3189_v51 = vpop.permute.xlu0 %3188  ;;  %v3649_v11 = vsel %vm1854_vm6, %v3617_v46, %v3390_v40  ;;  %v4602_v46 = vld [vmem:[%s4817_s9 + $0x10] sm:$0xf] }
 0x2fb   : > { %v3681_v42 = vsel %vm6609_vm7, %v3649_v11, %v3425_v39  ;;  %v3945_v40 = vunpack.c.l.bf16 %v4602_v46 }
 0x2fc   : > { %4445 = vmatmul.mubr.msk.bf16.gmra.mxu1 %vm6610_vm8, %v3681_v42 }
 0x2fd   : > { %v3109_v38 = vpop.permute.xlu1 %3108 }
 0x2fe   : > { %v3226_v56 = vpop.permute.xlu0 %3225  ;;  %v3459_v12 = vsel %vm1656_vm12, %v6222_v61, %v3109_v38 }
 0x2ff   : > { %v3491_v60 = vsel %vm1689_vm13, %v3459_v12, %v3189_v51 }
 0x300   : > { %v3523_v2 = vsel %vm1722_vm14, %v3491_v60, %v3226_v56  ;;  %v4604_v60 = vld [vmem:[%s4817_s9 + $0x18] sm:$0xf] }
 0x301   : > { %v3111_v18 = vpop.permute.xlu1 %3110 }
 0x302   : > { %v3273_v50 = vpop.permute.xlu0 %3272  ;;  %v3461_v24 = vsel %vm1656_vm12, %v6285_v37, %v3111_v18  ;;  %vm6613_vm12 = vmmov %vm6605_vm3 }
 0x303   : > { %v3555_v43 = vsel %vm1755_vm15, %v3523_v2, %v3273_v50  ;;  %v4603_v50 = vld [vmem:[%s4817_s9 + $0x14] sm:$0xf] }
 0x304   : > { %v3946_v12 = vunpack.c.l.bf16 %v4603_v50 }
 0x305   : > { %v3191_v57 = vpop.permute.xlu1 %3190 }
 0x306   : > { %v3308_v28 = vpop.permute.xlu0 %3307  ;;  %v3493_v41 = vsel %vm1689_vm13, %v3461_v24, %v3191_v57  ;;  %vm6614_vm13 = vmmov %vm6608_vm0 }
 0x307   : > { %v3587_v6 = vsel %vm1788_vm1, %v3555_v43, %v3308_v28  ;;  %v4605_v43 = vld [vmem:[%s4817_s9 + $0x1c] sm:$0xf] }
 0x309   : > { %v3228_v58 = vpop.permute.xlu1 %3227 }
 0x30a   : > { %v3345_v19 = vpop.permute.xlu0 %3344  ;;  %v3525_v47 = vsel %vm1722_vm14, %v3493_v41, %v3228_v58  ;;  %v3947_v58 = vunpack.c.l.bf16 %v4604_v60 }
 0x30b   : > { %v3619_v10 = vsel %vm1821_vm2, %v3587_v6, %v3345_v19  ;;  %v3948_v6 = vunpack.c.l.bf16 %v4605_v43 }
 0x30d   : > { %v3275_v63 = vpop.permute.xlu1 %3274 }
 0x30e   : > { %v3392_v17 = vpop.permute.xlu0 %3391  ;;  %v3557_v35 = vsel %vm1755_vm15, %v3525_v47, %v3275_v63 }
 0x30f   : > { %v3651_v25 = vsel %vm1854_vm6, %v3619_v10, %v3392_v17 }
 0x311   : > { %v3310_v61 = vpop.permute.xlu1 %3309 }
 0x312   : > { %v3427_v30 = vpop.permute.xlu0 %3426  ;;  %v3589_v37 = vsel %vm1788_vm1, %v3557_v35, %v3310_v61  ;;  %v4608_v35 = vld [vmem:[%s4817_s9 + $0x28] sm:$0xf] }
 0x313   : > { %v3683_v32 = vsel %vm6611_vm5, %v3651_v25, %v3427_v30 }
 0x314   : > { %4448 = vmatprep.mubr.msk.bf16.mxu1 %vm6612_vm11, %v3683_v32  ;;  %v4606_v32 = vld [vmem:[%s4817_s9 + $0x20] sm:$0xf] }
 0x315   : > { %v3347_v9 = vpop.permute.xlu1 %3346 }
 0x316   : > { %v3621_v48 = vsel %vm1821_vm2, %v3589_v37, %v3347_v9  ;;  %v3949_v9 = vunpack.c.l.bf16 %v4606_v32 }
 0x318   : > { %v4422_v22 = vpop.f32.mrf.mxu1 }
 0x319   : > { %v3394_v27 = vpop.permute.xlu1 %3393  ;;  %v3791_v1 = vadd.f32 %v4422_v22, %v6454_v49 }
 0x31a   : > { %v3782_v31 = vpop.f32.mrf.mxu1  ;;  %v3653_v4 = vsel %vm1854_vm6, %v3621_v48, %v3394_v27  ;;  %v4609_v48 = vld [vmem:[%s4817_s9 + $0x2c] sm:$0xf] }
 0x31b   : > { %v3783_v34 = vadd.f32 %v6454_v49, %v3782_v31  ;;  %v3911_v7 = vmul.f32 0.5, %v3791_v1  ;;  %v3952_v1 = vunpack.c.l.bf16 %v4609_v48 }
 0x31c   : > { %v4423_v14 = vpop.f32.mrf.mxu1 }
 0x31d   : > { %v3909_v55 = vmul.f32 0.5, %v3783_v34  ;;  %v3429_v0 = vpop.permute.xlu1 %3428  ;;  %v3794_v62 = vadd.f32 %v4423_v14, %v6454_v49  ;;  %v3975_v15 = vadd.f32 %v3943_v52, %v3911_v7 }
 0x31e   : > { %v3785_v36 = vpop.f32.mrf.mxu1  ;;  %v3685_v23 = vsel %vm6613_vm12, %v3653_v4, %v3429_v0 }
 0x31f   : > { %v3973_v20 = vadd.f32 %v3941_v16, %v3909_v55  ;;  %v3786_v54 = vadd.f32 %v6454_v49, %v3785_v36  ;;  %4449 = vmatmul.mubr.msk.bf16.gmra.mxu1 %vm6614_vm13, %v3685_v23  ;;  %v3912_v53 = vmul.f32 0.5, %v3794_v62  ;;  %v4607_v16 = vld [vmem:[%s4817_s9 + $0x24] sm:$0xf]  ;;  %v3951_v55 = vunpack.c.l.bf16 %v4608_v35  ;;  %v4610_v23 = vld [vmem:[%s4817_s9 + $0x30] sm:$0xf] }
 0x320   : > { %v3950_v47 = vunpack.c.l.bf16 %v4607_v16 }
 0x321   : > { %v3910_v29 = vmul.f32 0.5, %v3786_v54  ;;  %4005 = vxpose.xlu0.b32.start [1/16] (narrow) %v3973_v20, 8  ;;  %v3976_v39 = vadd.f32 %v3944_v3, %v3912_v53  ;;  %v4611_v53 = vld [vmem:[%s4817_s9 + $0x34] sm:$0xf] }
 0x322   : > { %v3954_v13 = vunpack.c.l.bf16 %v4611_v53 }
 0x323   : > { %v3974_v21 = vadd.f32 %v3942_v44, %v3910_v29  ;;  %v3953_v29 = vunpack.c.l.bf16 %v4610_v23 }
 0x325   : > { %4006 = vxpose.xlu0.b32.cont [2/16] (narrow) %v3974_v21, 8 }
 0x329   : > { %4007 = vxpose.xlu0.b32.cont [3/16] (narrow) %v3975_v15, 8 }
 0x32d   : > { %4008 = vxpose.xlu0.b32.cont [4/16] (narrow) %v3976_v39, 8 }
 0x337   : > { %v4426_v8 = vpop.f32.mrf.mxu1 }
 0x338   : > { %v3807_v38 = vadd.f32 %v4426_v8, %v6454_v49  ;;  %v4612_v8 = vld [vmem:[%s4817_s9 + $0x38] sm:$0xf] }
 0x339   : > { %v3798_v59 = vpop.f32.mrf.mxu1 }
 0x33a   : > { %v3799_v26 = vadd.f32 %v6454_v49, %v3798_v59  ;;  %v3915_v28 = vmul.f32 0.5, %v3807_v38  ;;  %v3955_v59 = vunpack.c.l.bf16 %v4612_v8 }
 0x33b   : > { %v4427_v51 = vpop.f32.mrf.mxu1 }
 0x33c   : > { %v3913_v11 = vmul.f32 0.5, %v3799_v26  ;;  %v3810_v19 = vadd.f32 %v4427_v51, %v6454_v49  ;;  %v3979_v63 = vadd.f32 %v3947_v58, %v3915_v28 }
 0x33d   : > { %v3801_v42 = vpop.f32.mrf.mxu1 }
 0x33e   : > { %v3977_v56 = vadd.f32 %v3945_v40, %v3913_v11  ;;  %v3802_v18 = vadd.f32 %v6454_v49, %v3801_v42  ;;  %v3916_v17 = vmul.f32 0.5, %v3810_v19  ;;  %v4613_v11 = vld [vmem:[%s4817_s9 + $0x3c] sm:$0xf] }
 0x33f   : > { %v3956_v42 = vunpack.c.l.bf16 %v4613_v11 }
 0x340   : > { %v3914_v57 = vmul.f32 0.5, %v3802_v18  ;;  %4009 = vxpose.xlu0.b32.cont [5/16] (narrow) %v3977_v56, 8  ;;  %v3980_v10 = vadd.f32 %v3948_v6, %v3916_v17  ;;  %v4615_v17 = vld [vmem:[%s4817_s9 + $0x44] sm:$0xf] }
 0x341   : > { %v3958_v43 = vunpack.c.l.bf16 %v4615_v17 }
 0x342   : > { %v3978_v2 = vadd.f32 %v3946_v12, %v3914_v57  ;;  %v4614_v12 = vld [vmem:[%s4817_s9 + $0x40] sm:$0xf] }
 0x343   : > { %v3957_v57 = vunpack.c.l.bf16 %v4614_v12 }
 0x344   : > { %4010 = vxpose.xlu0.b32.cont [6/16] (narrow) %v3978_v2, 8 }
 0x348   : > { %4011 = vxpose.xlu0.b32.cont [7/16] (narrow) %v3979_v63, 8 }
 0x34c   : > { %4012 = vxpose.xlu0.b32.cont [8/16] (narrow) %v3980_v10, 8 }
 0x357   : > { %v4430_v25 = vpop.f32.mrf.mxu1 }
 0x358   : > { %v3823_v41 = vadd.f32 %v4430_v25, %v6454_v49  ;;  %v4616_v25 = vld [vmem:[%s4817_s9 + $0x48] sm:$0xf] }
 0x359   : > { %v3814_v61 = vpop.f32.mrf.mxu1 }
 0x35a   : > { %v3815_v30 = vadd.f32 %v6454_v49, %v3814_v61  ;;  %v3919_v14 = vmul.f32 0.5, %v3823_v41  ;;  %v3959_v61 = vunpack.c.l.bf16 %v4616_v25 }
 0x35b   : > { %v4431_v22 = vpop.f32.mrf.mxu1 }
 0x35c   : > { %v3917_v24 = vmul.f32 0.5, %v3815_v30  ;;  %v3826_v37 = vadd.f32 %v4431_v22, %v6454_v49  ;;  %v3983_v33 = vadd.f32 %v3951_v55, %v3919_v14 }
 0x35d   : > { %v3817_v31 = vpop.f32.mrf.mxu1 }
 0x35e   : > { %v3981_v34 = vadd.f32 %v3949_v9, %v3917_v24  ;;  %v3818_v45 = vadd.f32 %v6454_v49, %v3817_v31  ;;  %v3920_v44 = vmul.f32 0.5, %v3826_v37  ;;  %v4617_v24 = vld [vmem:[%s4817_s9 + $0x4c] sm:$0xf] }
 0x35f   : > { %v3960_v31 = vunpack.c.l.bf16 %v4617_v24 }
 0x360   : > { %v3918_v27 = vmul.f32 0.5, %v3818_v45  ;;  %4013 = vxpose.xlu0.b32.cont [9/16] (narrow) %v3981_v34, 8  ;;  %v3984_v20 = vadd.f32 %v3952_v1, %v3920_v44  ;;  %v4619_v44 = vld [vmem:[%s4817_s9 + $0x54] sm:$0xf] }
 0x361   : > { %v3962_v48 = vunpack.c.l.bf16 %v4619_v44 }
 0x362   : > { %v3982_v36 = vadd.f32 %v3950_v47, %v3918_v27  ;;  %v4618_v47 = vld [vmem:[%s4817_s9 + $0x50] sm:$0xf] }
 0x363   : > { %v3961_v27 = vunpack.c.l.bf16 %v4618_v47 }
 0x364   : > { %4014 = vxpose.xlu0.b32.cont [10/16] (narrow) %v3982_v36, 8 }
 0x368   : > { %4015 = vxpose.xlu0.b32.cont [11/16] (narrow) %v3983_v33, 8 }
 0x36c   : > { %4016 = vxpose.xlu0.b32.cont [12/16] (narrow) %v3984_v20, 8 }
 0x373   : > { %v4434_v54 = vpop.f32.mrf.mxu1 }
 0x374   : > { %v3839_v62 = vadd.f32 %v4434_v54, %v6454_v49  ;;  %v4620_v54 = vld [vmem:[%s4817_s9 + $0x58] sm:$0xf] }
 0x375   : > { %v3830_v4 = vpop.f32.mrf.mxu1 }
 0x376   : > { %v3831_v0 = vadd.f32 %v6454_v49, %v3830_v4  ;;  %v3923_v39 = vmul.f32 0.5, %v3839_v62  ;;  %v3963_v4 = vunpack.c.l.bf16 %v4620_v54 }
 0x377   : > { %v4435_v7 = vpop.f32.mrf.mxu1 }
 0x378   : > { %v3921_v5 = vmul.f32 0.5, %v3831_v0  ;;  %v3842_v26 = vadd.f32 %v4435_v7, %v6454_v49  ;;  %v3987_v40 = vadd.f32 %v3955_v59, %v3923_v39 }
 0x379   : > { %v3833_v52 = vpop.f32.mrf.mxu1 }
 0x37a   : > { %v3985_v21 = vadd.f32 %v3953_v29, %v3921_v5  ;;  %v3834_v15 = vadd.f32 %v6454_v49, %v3833_v52  ;;  %v3924_v51 = vmul.f32 0.5, %v3842_v26  ;;  %v4621_v5 = vld [vmem:[%s4817_s9 + $0x5c] sm:$0xf] }
 0x37b   : > { %v3964_v52 = vunpack.c.l.bf16 %v4621_v5 }
 0x37c   : > { %v3922_v3 = vmul.f32 0.5, %v3834_v15  ;;  %4017 = vxpose.xlu0.b32.cont [13/16] (narrow) %v3985_v21, 8  ;;  %v3988_v18 = vadd.f32 %v3956_v42, %v3924_v51  ;;  %v4623_v51 = vld [vmem:[%s4817_s9 + $0x64] sm:$0xf] }
 0x37d   : > { %v3966_v11 = vunpack.c.l.bf16 %v4623_v51 }
 0x37e   : > { %v3986_v46 = vadd.f32 %v3954_v13, %v3922_v3  ;;  %v4622_v13 = vld [vmem:[%s4817_s9 + $0x60] sm:$0xf] }
 0x37f   : > { %v3965_v3 = vunpack.c.l.bf16 %v4622_v13 }
 0x380   : > { %4018 = vxpose.xlu0.b32.cont [14/16] (narrow) %v3986_v46, 8 }
 0x383   : > { %v4438_v38 = vpop.f32.mrf.mxu1 }
 0x384   : > { %4019 = vxpose.xlu0.b32.cont [15/16] (narrow) %v3987_v40, 8  ;;  %v3855_v19 = vadd.f32 %v4438_v38, %v6454_v49 }
 0x385   : > { %v3846_v56 = vpop.f32.mrf.mxu1 }
 0x386   : > { %v3847_v50 = vadd.f32 %v6454_v49, %v3846_v56  ;;  %v3927_v10 = vmul.f32 0.5, %v3855_v19  ;;  %v4624_v56 = vld [vmem:[%s4817_s9 + $0x68] sm:$0xf] }
 0x387   : > { %v4439_v28 = vpop.f32.mrf.mxu1 }
 0x388   : > { %v3925_v60 = vmul.f32 0.5, %v3847_v50  ;;  %4020 = vxpose.xlu0.b32.end [16/16] (narrow) %v3988_v18, 8  ;;  %v3858_v30 = vadd.f32 %v4439_v28, %v6454_v49  ;;  %v3991_v9 = vadd.f32 %v3959_v61, %v3927_v10  ;;  %v3967_v18 = vunpack.c.l.bf16 %v4624_v56 }
 0x389   : > { %v3849_v58 = vpop.f32.mrf.mxu1 }
 0x38a   : > { %v3989_v2 = vadd.f32 %v3957_v57, %v3925_v60  ;;  %v3850_v63 = vadd.f32 %v6454_v49, %v3849_v58  ;;  %v3928_v22 = vmul.f32 0.5, %v3858_v30  ;;  %v4625_v60 = vld [vmem:[%s4817_s9 + $0x6c] sm:$0xf] }
 0x38b   : > { %v3968_v58 = vunpack.c.l.bf16 %v4625_v60 }
 0x38c   : > { %v3926_v6 = vmul.f32 0.5, %v3850_v63  ;;  %4037 = vxpose.xlu1.b32.start [1/16] (narrow) %v3989_v2, 8  ;;  %v3992_v41 = vadd.f32 %v3960_v31, %v3928_v22  ;;  %v4627_v22 = vld [vmem:[%s4817_s9 + $0x74] sm:$0xf] }
 0x38d   : > { %v3970_v24 = vunpack.c.l.bf16 %v4627_v22 }
 0x38e   : > { %v3990_v32 = vadd.f32 %v3958_v43, %v3926_v6  ;;  %v4626_v43 = vld [vmem:[%s4817_s9 + $0x70] sm:$0xf] }
 0x38f   : > { %v3969_v6 = vunpack.c.l.bf16 %v4626_v43 }
 0x390   : > { %4038 = vxpose.xlu1.b32.cont [2/16] (narrow) %v3990_v32, 8 }
 0x394   : > { %4039 = vxpose.xlu1.b32.cont [3/16] (narrow) %v3991_v9, 8 }
 0x398   : > { %4040 = vxpose.xlu1.b32.cont [4/16] (narrow) %v3992_v41, 8 }
 0x39c   : > { %v4442_v34 = vpop.f32.mrf.mxu1 }
 0x39d   : > { %v3871_v37 = vadd.f32 %v4442_v34, %v6454_v49  ;;  %v4628_v34 = vld [vmem:[%s4817_s9 + $0x78] sm:$0xf] }
 0x39e   : > { %v3862_v45 = vpop.f32.mrf.mxu1 }
 0x39f   : > { %v3863_v16 = vadd.f32 %v6454_v49, %v3862_v45  ;;  %v3931_v20 = vmul.f32 0.5, %v3871_v37  ;;  %v3971_v45 = vunpack.c.l.bf16 %v4628_v34 }
 0x3a0   : > { %v4443_v14 = vpop.f32.mrf.mxu1 }
 0x3a1   : > { %v3929_v35 = vmul.f32 0.5, %v3863_v16  ;;  %v3874_v0 = vadd.f32 %v4443_v14, %v6454_v49  ;;  %v3995_v29 = vadd.f32 %v3963_v4, %v3931_v20 }
 0x3a2   : > { %v3865_v55 = vpop.f32.mrf.mxu1 }
 0x3a3   : > { %v3993_v36 = vadd.f32 %v3961_v27, %v3929_v35  ;;  %v3866_v33 = vadd.f32 %v6454_v49, %v3865_v55  ;;  %v3932_v7 = vmul.f32 0.5, %v3874_v0  ;;  %v4629_v35 = vld [vmem:[%s4817_s9 + $0x7c] sm:$0xf]  ;;  %s4075_s9 = scalar_lea.sflag [#allocation5], %s215_s12 }
 0x3a4   : > { %v3972_v55 = vunpack.c.l.bf16 %v4629_v35 }
 0x3a5   : > { %v3930_v1 = vmul.f32 0.5, %v3866_v33  ;;  %4041 = vxpose.xlu1.b32.cont [5/16] (narrow) %v3993_v36, 8  ;;  %v3996_v62 = vadd.f32 %v3964_v52, %v3932_v7 }
 0x3a7   : > { %v3994_v23 = vadd.f32 %v3962_v48, %v3930_v1 }
 0x3a9   : > { %4042 = vxpose.xlu1.b32.cont [6/16] (narrow) %v3994_v23, 8 }
 0x3ad   : > { %4043 = vxpose.xlu1.b32.cont [7/16] (narrow) %v3995_v29, 8 }
 0x3b1   : > { %4044 = vxpose.xlu1.b32.cont [8/16] (narrow) %v3996_v62, 8 }
 0x3bc   : > { %v4446_v21 = vpop.f32.mrf.mxu1 }
 0x3bd   : > { %v3887_v26 = vadd.f32 %v4446_v21, %v6454_v49 }
 0x3be   : > { %v3878_v15 = vpop.f32.mrf.mxu1 }
 0x3bf   : > { %v3879_v53 = vadd.f32 %v6454_v49, %v3878_v15  ;;  %v3935_v38 = vmul.f32 0.5, %v3887_v26 }
 0x3c0   : > { %v4447_v39 = vpop.f32.mrf.mxu1 }
 0x3c1   : > { %v3933_v8 = vmul.f32 0.5, %v3879_v53  ;;  %v3890_v50 = vadd.f32 %v4447_v39, %v6454_v49  ;;  %v3999_v57 = vadd.f32 %v3967_v18, %v3935_v38 }
 0x3c2   : > { %v3881_v59 = vpop.f32.mrf.mxu1 }
 0x3c3   : > { %v3997_v46 = vadd.f32 %v3965_v3, %v3933_v8  ;;  %v3882_v40 = vadd.f32 %v6454_v49, %v3881_v59  ;;  %v3936_v28 = vmul.f32 0.5, %v3890_v50 }
 0x3c5   : > { %v3934_v42 = vmul.f32 0.5, %v3882_v40  ;;  %4045 = vxpose.xlu1.b32.cont [9/16] (narrow) %v3997_v46, 8  ;;  %v4000_v19 = vadd.f32 %v3968_v58, %v3936_v28 }
 0x3c7   : > { %v3998_v12 = vadd.f32 %v3966_v11, %v3934_v42 }
 0x3c8   : > { %v4021_v36 = vpop.trf.xlu0 }
 0x3c9   : > { %4046 = vxpose.xlu1.b32.cont [10/16] (narrow) %v3998_v12, 8 }
 0x3cd   : > { %4047 = vxpose.xlu1.b32.cont [11/16] (narrow) %v3999_v57, 8 }
 0x3d1   : > { %4048 = vxpose.xlu1.b32.cont [12/16] (narrow) %v4000_v19, 8 }
 0x3df   : > { %v4450_v2 = vpop.f32.mrf.mxu1 }
 0x3e0   : > { %v3903_v30 = vadd.f32 %v4450_v2, %v6454_v49 }
 0x3e1   : > { %v3894_v63 = vpop.f32.mrf.mxu1 }
 0x3e2   : > { %v3895_v17 = vadd.f32 %v6454_v49, %v3894_v63  ;;  %v3939_v41 = vmul.f32 0.5, %v3903_v30 }
 0x3e3   : > { %v4451_v10 = vpop.f32.mrf.mxu1 }
 0x3e4   : > { %v3937_v25 = vmul.f32 0.5, %v3895_v17  ;;  %v3906_v16 = vadd.f32 %v4451_v10, %v6454_v49  ;;  %v4003_v27 = vadd.f32 %v3971_v45, %v3939_v41 }
 0x3e5   : > { %v3897_v61 = vpop.f32.mrf.mxu1 }
 0x3e6   : > { %v4001_v32 = vadd.f32 %v3969_v6, %v3937_v25  ;;  %v3898_v9 = vadd.f32 %v6454_v49, %v3897_v61  ;;  %v3940_v14 = vmul.f32 0.5, %v3906_v16 }
 0x3e8   : > { %v3938_v31 = vmul.f32 0.5, %v3898_v9  ;;  %4049 = vxpose.xlu1.b32.cont [13/16] (narrow) %v4001_v32, 8  ;;  %v4004_v37 = vadd.f32 %v3972_v55, %v3940_v14 }
 0x3ea   : > { %v4002_v47 = vadd.f32 %v3970_v24, %v3938_v31 }
 0x3ec   : > { %4050 = vxpose.xlu1.b32.cont [14/16] (narrow) %v4002_v47, 8 }
 0x3f0   : > { %4051 = vxpose.xlu1.b32.cont [15/16] (narrow) %v4003_v27, 8 }
 0x3f4   : > { %4052 = vxpose.xlu1.b32.end [16/16] (narrow) %v4004_v37, 8 }
 0x434   : > { %v4053_v33 = vpop.trf.xlu1 }
 0x435   : > { %v4071_v44 = vcombine.low %v4021_v36, %v4053_v33 }
 0x437   : > { %4073 = vst [vmem:[%s217_s15] sm:$0xff] %v4071_v44 }
 0x438   : > { %4643 = shalt.err (!%p4640_p3)
}
 0x439   : > { %s4644_s23 = scalar_lea.hbm %s4087_s30, 128  ;;  %s4648_s11 = scalar_lea.hbm %s6567_s5, 256 }
 0x43a   : > { %p4645_p4 = scmp.ne.s32.totalorder %s4087_s30, %s4644_s23  ;;  %p4649_p9 = scmp.lt.s32.totalorder %s4087_s30, %s6567_s5 }
 0x43b   : > { %p4650_p10 = scmp.lt.s32.totalorder %s4648_s11, %s4644_s23 }
 0x43c   : > { %p4646_p7 = pnand %p4645_p4, %p4770_p5 }
 0x43d   : > { %p4651_p11 = por %p4650_p10, %p4649_p9 }
 0x43e   : > { %p4647_p8 = pneg %p4646_p7 }
 0x440   : > { %p4652_p12 = pnand %p4651_p11, %p4647_p8 }
 0x442   : > { %4655 = shalt.err (!%p4652_p12)
}
 0x443   : > { %4454 = dma.vmem_to_hbm [thread:$0]  (%p4770_p5), %s4090_s16, 128, %s4087_s30, %s4075_s9  }
 0x444 PF: > { %p4460_p13 = scmp.ge.s32.totalorder %s4690_s21, 2  ;;  %s4101_s14 = sand.u32 1, %s4678_s18  }
 0x445   : > { %s4102_s15 = scalar_lea.sflag [#allocation5], %s4101_s14 }
 0x446   : > { %p4457_p0 = pnand %p4460_p13, %p4774_p6 }
 0x448   : > { %p4458_p1 = pneg %p4457_p0 }
 0x44a   : > { %4673 = dma.done.wait (%p4458_p1), %s4102_s15, 128  }
 0x44b   : > { %4675 = vsyncadd (%p4458_p1), %s4102_s15, 4294967168  ;;  %p15_p2 = scmp.ge.s32.totalorder %s4757_s24, 4   ;;  %s6615_s18 = smov %s4682_s19 }
 0x44c   : > { %s6616_s19 = smov %s4686_s20  ;;  %s6617_s20 = smov %s4768_s27 }
 0x44d   : > { %s6618_s21 = smov %s4757_s24  ;;  %17 = sbr.rel (!%p15_p2) target bundleno = 3 (0x3), region = 79 }
 0x452   :  { %4107 = vsyncpa [#allocation5], 1 }
 0x453   :  { %4109 = vsyncpa [#allocation5 + $0x1], 1 }

</bundles_post_ra>
